<compile_context>
chip_gen: v7x
topology: tpu7x:2x2x1
jax: 0.10.0
libtpu: 0.0.40
codegen_flags: <defaults>
</compile_context>

<pallas_src>
import numpy as np
import jax
import jax.numpy as jnp
from jax import lax
from jax.experimental import pallas as pl
from jax.experimental.pallas import tpu as pltpu


# ---------------------------------------------------------------------------
# Trace-time weight re-layout: 3x3 conv -> banded matmul weights.
# ---------------------------------------------------------------------------

def _band_selector(w_in, parity):
    """S[dx, wi, q] = 1 iff input col `wi` feeds output col w = 2q+parity at
    tap dx.  Out-of-range taps ('same' zero padding in W) are simply absent."""
    w_out = w_in // 2
    s = np.zeros((3, w_in, w_out), np.float32)
    for q in range(w_out):
        for dx in range(3):
            wi = 2 * q + parity + dx - 1
            if 0 <= wi < w_in:
                s[dx, wi, q] = 1.0
    return jnp.asarray(s)


def _banded_conv_weights(w_oihw, w_in):
    """(Cout,Cin,3,3) torch conv weight -> (2, 3, W*Cin, (W//2)*Cout).

    result[p, dy] maps one H-padded input row (lane = w*Cin + ci) to the
    even(p=0)/odd(p=1) output columns of one conv-output row
    (lane = (w//2)*Cout + co).  The 'same' W-padding is folded into the band
    structure, so zero-padded columns never exist anywhere.
    """
    cout, cin = w_oihw.shape[0], w_oihw.shape[1]
    mats = []
    for parity in (0, 1):
        s = _band_selector(w_in, parity)                      # (3, W, W//2)
        m = jnp.einsum("xwq,oiyx->ywiqo", s, w_oihw)          # (3, W, Cin, W//2, Cout)
        mats.append(m.reshape(3, w_in * cin, (w_in // 2) * cout))
    return jnp.stack(mats)                                    # (2, 3, K, N)


# ---------------------------------------------------------------------------
# Fused whole-network kernel (one grid step = block_b samples)
# ---------------------------------------------------------------------------

def _cnn_kernel(x_ref, bw1_ref, b1_ref, bw2_ref, b2_ref,
                fc1w_ref, fc1b_ref, fc2w_ref, fc2b_ref, fc3w_ref, fc3b_ref,
                o_ref, pad2_ref, flat_ref):
    tb = x_ref.shape[0]

    def conv_relu_pool(in_ref, n_rows, bw_ref, bias_ref):
        """3x3 'same' conv + bias + ReLU + 2x2/stride-2 max-pool, fused.

        in_ref : (tb, n_rows+2, W*Cin)   H-zero-padded rows, lane = w*Cin+ci
        bw_ref : (2, 3, W*Cin, (W//2)*Cout) banded weights [col-parity, dy]
        returns: (tb*(n_rows//2), (W//2)*Cout), row = b*(n_rows//2)+pooled_h,
                 lane = pooled_w*Cout + co
        """
        nh = n_rows // 2
        k = in_ref.shape[2]
        pooled = None
        for hp in range(2):                      # conv-row parity (H-pool pair)
            for wp in range(2):                  # conv-col parity (W-pool pair)
                acc = None
                for dy in range(3):
                    rows = in_ref[:, pl.ds(dy + hp, nh, stride=2), :]
                    d = jnp.dot(rows.reshape(tb * nh, k), bw_ref[wp, dy],
                                preferred_element_type=jnp.float32)
                    acc = d if acc is None else acc + d
                pooled = acc if pooled is None else jnp.maximum(pooled, acc)
        # bias is identical for both pool partners, ReLU commutes with max.
        return jnp.maximum(pooled + bias_ref[...], 0.0)

    # conv1 (3->8) + ReLU + pool1  ->  H-padded conv2 input scratch.
    p1 = conv_relu_pool(x_ref, 32, bw1_ref, b1_ref)            # (tb*16, 128)
    zrow = jnp.zeros((tb, 1, 128), jnp.float32)
    # Border rows re-zeroed every step (cheap) so the kernel stays correct
    # even when the grid is split across TensorCores (per-core scratch).
    pad2_ref[:, 0:1, :] = zrow
    pad2_ref[:, 17:18, :] = zrow
    pad2_ref[:, 1:17, :] = p1.reshape(tb, 16, 128)

    # conv2 (8->16) + ReLU + pool2
    p2 = conv_relu_pool(pad2_ref, 16, bw2_ref, b2_ref)         # (tb*8, 128)

    # Flatten (h, w, c) -> 1024 features via 8 lane-aligned 128-wide stores.
    p2 = p2.reshape(tb, 8, 128)
    for ph in range(8):
        flat_ref[:, ph * 128:(ph + 1) * 128] = p2[:, ph, :]

    # fc1 (1024->64) as ONE K=1024 matmul, then fc2, fc3.
    z = jnp.dot(flat_ref[...], fc1w_ref[...], preferred_element_type=jnp.float32)
    z = jnp.maximum(z + fc1b_ref[...], 0.0)
    z = jnp.dot(z, fc2w_ref[...], preferred_element_type=jnp.float32)
    z = jnp.maximum(z + fc2b_ref[...], 0.0)
    logits = jnp.dot(z, fc3w_ref[...],
                     preferred_element_type=jnp.float32) + fc3b_ref[...]

    # stable log_softmax
    m = jnp.max(logits, axis=-1, keepdims=True)
    s = logits - m
    o_ref[...] = s - jnp.log(jnp.sum(jnp.exp(s), axis=-1, keepdims=True))


# ---------------------------------------------------------------------------
# Wrapper: one-time layout plumbing + the single pallas_call
# ---------------------------------------------------------------------------

def cnn_forward(x_nchw, params, *, block_b=128):
    assert x_nchw.shape[1:] == (3, 32, 32)
    B = x_nchw.shape[0]
    # Clamp the batch tile to the padded batch; keep it a multiple of 8.
    block_b = int(min(block_b, max(8, -(-B // 8) * 8)))
    G = -(-B // block_b)
    Bp = G * block_b

    # NCHW -> lane-dense (B, H, W*C), zero-padded in H only (rows 0 and 33).
    x = jnp.transpose(x_nchw, (0, 2, 3, 1)).astype(jnp.float32).reshape(B, 32, 96)
    x = jnp.pad(x, ((0, Bp - B), (1, 1), (0, 0)))              # (Bp, 34, 96)

    # One-off weight re-layout (trace time).
    bw1 = _banded_conv_weights(params["conv1_w"].astype(jnp.float32), 32)   # (2,3,96,128)
    b1t = jnp.tile(params["conv1_b"].astype(jnp.float32), 16).reshape(1, 128)
    bw2 = _banded_conv_weights(params["conv2_w"].astype(jnp.float32), 16)   # (2,3,128,128)
    b2t = jnp.tile(params["conv2_b"].astype(jnp.float32), 8).reshape(1, 128)
    # PyTorch flattens NCHW: col j = c*64 + h*8 + w.  Our flat layout is
    # f = h*128 + w*16 + c, so permute fc1 columns to (h, w, c).
    fc1w = jnp.transpose(params["fc1_w"].reshape(64, 16, 8, 8),
                         (2, 3, 1, 0)).reshape(1024, 64)
    fc1b = params["fc1_b"].reshape(1, 64)
    fc2w = params["fc2_w"].T
    fc2b = params["fc2_b"].reshape(1, 32)
    fc3w = params["fc3_w"].T
    fc3b = params["fc3_b"].reshape(1, 10)

    flops_per_sample = 2 * (32 * 32 * 9 * 3 * 8 + 16 * 16 * 9 * 8 * 16
                            + 1024 * 64 + 64 * 32 + 32 * 10)
    weight_bytes = 4 * (2 * 3 * 96 * 128 + 128 + 2 * 3 * 128 * 128 + 128
                        + 1024 * 64 + 64 + 64 * 32 + 32 + 32 * 10 + 10)
    cost = pl.CostEstimate(
        flops=flops_per_sample * Bp,
        transcendentals=11 * Bp,
        bytes_accessed=Bp * 34 * 96 * 4 + weight_bytes + Bp * 10 * 4,
    )

    out = pl.pallas_call(
        _cnn_kernel,
        out_shape=jax.ShapeDtypeStruct((Bp, 10), jnp.float32),
        grid_spec=pltpu.PrefetchScalarGridSpec(
            num_scalar_prefetch=0,
            grid=(G,),
            in_specs=[
                pl.BlockSpec((block_b, 34, 96), lambda i: (i, 0, 0)),
                # weights: constant index maps -> VMEM-resident across steps
                pl.BlockSpec((2, 3, 96, 128), lambda i: (0, 0, 0, 0)),
                pl.BlockSpec((1, 128), lambda i: (0, 0)),
                pl.BlockSpec((2, 3, 128, 128), lambda i: (0, 0, 0, 0)),
                pl.BlockSpec((1, 128), lambda i: (0, 0)),
                pl.BlockSpec((1024, 64), lambda i: (0, 0)),
                pl.BlockSpec((1, 64), lambda i: (0, 0)),
                pl.BlockSpec((64, 32), lambda i: (0, 0)),
                pl.BlockSpec((1, 32), lambda i: (0, 0)),
                pl.BlockSpec((32, 10), lambda i: (0, 0)),
                pl.BlockSpec((1, 10), lambda i: (0, 0)),
            ],
            out_specs=pl.BlockSpec((block_b, 10), lambda i: (i, 0)),
            scratch_shapes=[
                pltpu.VMEM((block_b, 18, 128), jnp.float32),   # H-padded pool1 (conv2 in)
                pltpu.VMEM((block_b, 1024), jnp.float32),      # flattened pool2 (fc1 in)
            ],
        ),
        compiler_params=pltpu.CompilerParams(
            dimension_semantics=("parallel",),
            vmem_limit_bytes=48 * 1024 * 1024,   # well within v7x's 64 MiB/TC
        ),
        cost_estimate=cost,
    )(x, bw1, b1t, bw2, b2t, fc1w, fc1b, fc2w, fc2b, fc3w, fc3b)

    return out[:B]


# ---------------------------------------------------------------------------
# Pure-JAX reference of the PyTorch module (numerical self-check)
# ---------------------------------------------------------------------------

def cnn_reference(x, params):
    with jax.default_matmul_precision("highest"):
        dn = ("NCHW", "OIHW", "NCHW")
        y = lax.conv_general_dilated(x, params["conv1_w"], (1, 1), "SAME",
                                     dimension_numbers=dn)
        y = jnp.maximum(y + params["conv1_b"][None, :, None, None], 0.0)
        B, C, H, W = y.shape
        y = y.reshape(B, C, H // 2, 2, W // 2, 2).max(axis=(3, 5))
        y = lax.conv_general_dilated(y, params["conv2_w"], (1, 1), "SAME",
                                     dimension_numbers=dn)
        y = jnp.maximum(y + params["conv2_b"][None, :, None, None], 0.0)
        B, C, H, W = y.shape
        y = y.reshape(B, C, H // 2, 2, W // 2, 2).max(axis=(3, 5))
        y = y.reshape(B, -1)                                   # NCHW flatten, as in torch
        y = jnp.maximum(y @ params["fc1_w"].T + params["fc1_b"], 0.0)
        y = jnp.maximum(y @ params["fc2_w"].T + params["fc2_b"], 0.0)
        y = y @ params["fc3_w"].T + params["fc3_b"]
        return jax.nn.log_softmax(y, axis=-1)


# ---------------------------------------------------------------------------
# Deterministic parameter init (shapes from CNN.__init__)
# ---------------------------------------------------------------------------

def init_params(key):
    ks = jax.random.split(key, 10)

    def n(k, shape, scale=0.05):
        return (scale * jax.random.normal(k, shape)).astype(jnp.float32)

    return {
        "conv1_w": n(ks[0], (8, 3, 3, 3)),      # Conv2d(3, 8, 3, padding=1)
        "conv1_b": n(ks[1], (8,)),
        "conv2_w": n(ks[2], (16, 8, 3, 3)),     # Conv2d(8, 16, 3, padding=1)
        "conv2_b": n(ks[3], (16,)),
        "fc1_w":   n(ks[4], (64, 1024)),        # Linear(8*8*16, 64)
        "fc1_b":   n(ks[5], (64,)),
        "fc2_w":   n(ks[6], (32, 64)),          # Linear(64, 32)
        "fc2_b":   n(ks[7], (32,)),
        "fc3_w":   n(ks[8], (10, 32)),          # Linear(32, 10)
        "fc3_b":   n(ks[9], (10,)),
    }


if __name__ == "__main__":
    key = jax.random.PRNGKey(0)
    k_x, k_p = jax.random.split(key)
    params = init_params(k_p)

    # fc1 expects 8*8*16 features after two 2x2 pools => input must be 32x32x3.
    # 1) Small-shape check (batch tile auto-clamps to 8).
    B = 8
    x = jax.random.normal(k_x, (B, 3, 32, 32), dtype=jnp.float32)
    out = jax.block_until_ready(jax.jit(cnn_forward)(x, params))
    assert out.shape == (B, 10)
    assert jnp.allclose(jnp.sum(jnp.exp(out), axis=-1), 1.0, atol=1e-4)
    ref = cnn_reference(x, params)
    assert jnp.allclose(out, ref, atol=2e-3, rtol=2e-3), \
        float(jnp.max(jnp.abs(out - ref)))

    # 2) Realistic batch exercising the full 128-sample tile and a 2-step grid.
    B2 = 256
    x2 = jax.random.normal(k_x, (B2, 3, 32, 32), dtype=jnp.float32)
    out2 = jax.block_until_ready(jax.jit(cnn_forward)(x2, params))
    assert out2.shape == (B2, 10)
    ref2 = cnn_reference(x2, params)
    assert jnp.allclose(out2, ref2, atol=2e-3, rtol=2e-3), \
        float(jnp.max(jnp.abs(out2 - ref2)))

    print("KERNEL_OK")
</pallas_src>

<mosaic_0001>
module attributes {stable_mosaic.version = 11 : i64} {
  func.func @_cnn_kernel(%arg0: i32, %arg1: memref<8x34x96xf32, #tpu.memory_space<vmem>>, %arg2: memref<2x3x96x128xf32, #tpu.memory_space<vmem>>, %arg3: memref<1x128xf32, #tpu.memory_space<vmem>>, %arg4: memref<2x3x128x128xf32, #tpu.memory_space<vmem>>, %arg5: memref<1x128xf32, #tpu.memory_space<vmem>>, %arg6: memref<1024x64xf32, #tpu.memory_space<vmem>>, %arg7: memref<1x64xf32, #tpu.memory_space<vmem>>, %arg8: memref<64x32xf32, #tpu.memory_space<vmem>>, %arg9: memref<1x32xf32, #tpu.memory_space<vmem>>, %arg10: memref<32x10xf32, #tpu.memory_space<vmem>>, %arg11: memref<1x10xf32, #tpu.memory_space<vmem>>, %arg12: memref<8x10xf32, #tpu.memory_space<vmem>>, %arg13: memref<8x18x128xf32, #tpu.memory_space<vmem>>, %arg14: memref<8x1024xf32, #tpu.memory_space<vmem>>) attributes {dimension_semantics = [#tpu.dimension_semantics<parallel>], iteration_bounds = array<i64: 1>, scalar_prefetch = 0 : i64, scratch_operands = 2 : i64, tpu.core_type = #tpu.core_type<tc>, window_params = [{transform_indices = @transform_0, window_bounds = array<i64: 8, 34, 96>}, {pipeline_mode = #tpu.pipeline_mode<synchronous>, transform_indices = @transform_1, window_bounds = array<i64: 2, 3, 96, 128>}, {pipeline_mode = #tpu.pipeline_mode<synchronous>, transform_indices = @transform_2, window_bounds = array<i64: 1, 128>}, {pipeline_mode = #tpu.pipeline_mode<synchronous>, transform_indices = @transform_3, window_bounds = array<i64: 2, 3, 128, 128>}, {pipeline_mode = #tpu.pipeline_mode<synchronous>, transform_indices = @transform_4, window_bounds = array<i64: 1, 128>}, {pipeline_mode = #tpu.pipeline_mode<synchronous>, transform_indices = @transform_5, window_bounds = array<i64: 1024, 64>}, {pipeline_mode = #tpu.pipeline_mode<synchronous>, transform_indices = @transform_6, window_bounds = array<i64: 1, 64>}, {pipeline_mode = #tpu.pipeline_mode<synchronous>, transform_indices = @transform_7, window_bounds = array<i64: 64, 32>}, {pipeline_mode = #tpu.pipeline_mode<synchronous>, transform_indices = @transform_8, window_bounds = array<i64: 1, 32>}, {pipeline_mode = #tpu.pipeline_mode<synchronous>, transform_indices = @transform_9, window_bounds = array<i64: 32, 10>}, {pipeline_mode = #tpu.pipeline_mode<synchronous>, transform_indices = @transform_10, window_bounds = array<i64: 1, 10>}, {transform_indices = @transform_11, window_bounds = array<i64: 8, 10>}]} {
    %c0 = arith.constant 0 : index
    %c0_0 = arith.constant 0 : index
    %c0_1 = arith.constant 0 : index
    %0 = tpu.strided_load %arg1[%c0, %c0_0, %c0_1] {strides = array<i32: 1, 2, 1>} : memref<8x34x96xf32, #tpu.memory_space<vmem>>, vector<8x16x96xf32>
    %1 = vector.shape_cast %0 : vector<8x16x96xf32> to vector<128x96xf32>
    %c0_2 = arith.constant 0 : index
    %c0_3 = arith.constant 0 : index
    %c0_4 = arith.constant 0 : index
    %c0_5 = arith.constant 0 : index
    %2 = vector.load %arg2[%c0_2, %c0_3, %c0_4, %c0_5] : memref<2x3x96x128xf32, #tpu.memory_space<vmem>>, vector<1x1x96x128xf32>
    %3 = vector.shape_cast %2 : vector<1x1x96x128xf32> to vector<96x128xf32>
    %cst = arith.constant dense<0.000000e+00> : vector<128x128xf32>
    %4 = tpu.matmul %1, %3, %cst {dimension_numbers = #tpu.dot_dimension_numbers<[1], [0], [0], [1], [0, 0, 1, 1], [], []>} : vector<128x96xf32>, vector<96x128xf32>, vector<128x128xf32> -> vector<128x128xf32>
    %c0_6 = arith.constant 0 : index
    %c1 = arith.constant 1 : index
    %c0_7 = arith.constant 0 : index
    %5 = tpu.strided_load %arg1[%c0_6, %c1, %c0_7] {strides = array<i32: 1, 2, 1>} : memref<8x34x96xf32, #tpu.memory_space<vmem>>, vector<8x16x96xf32>
    %6 = vector.shape_cast %5 : vector<8x16x96xf32> to vector<128x96xf32>
    %c0_8 = arith.constant 0 : index
    %c1_9 = arith.constant 1 : index
    %c0_10 = arith.constant 0 : index
    %c0_11 = arith.constant 0 : index
    %7 = vector.load %arg2[%c0_8, %c1_9, %c0_10, %c0_11] : memref<2x3x96x128xf32, #tpu.memory_space<vmem>>, vector<1x1x96x128xf32>
    %8 = vector.shape_cast %7 : vector<1x1x96x128xf32> to vector<96x128xf32>
    %cst_12 = arith.constant dense<0.000000e+00> : vector<128x128xf32>
    %9 = tpu.matmul %6, %8, %cst_12 {dimension_numbers = #tpu.dot_dimension_numbers<[1], [0], [0], [1], [0, 0, 1, 1], [], []>} : vector<128x96xf32>, vector<96x128xf32>, vector<128x128xf32> -> vector<128x128xf32>
    %10 = arith.addf %4, %9 : vector<128x128xf32>
    %c0_13 = arith.constant 0 : index
    %c2 = arith.constant 2 : index
    %c0_14 = arith.constant 0 : index
    %11 = tpu.strided_load %arg1[%c0_13, %c2, %c0_14] {strides = array<i32: 1, 2, 1>} : memref<8x34x96xf32, #tpu.memory_space<vmem>>, vector<8x16x96xf32>
    %12 = vector.shape_cast %11 : vector<8x16x96xf32> to vector<128x96xf32>
    %c0_15 = arith.constant 0 : index
    %c2_16 = arith.constant 2 : index
    %c0_17 = arith.constant 0 : index
    %c0_18 = arith.constant 0 : index
    %13 = vector.load %arg2[%c0_15, %c2_16, %c0_17, %c0_18] : memref<2x3x96x128xf32, #tpu.memory_space<vmem>>, vector<1x1x96x128xf32>
    %14 = vector.shape_cast %13 : vector<1x1x96x128xf32> to vector<96x128xf32>
    %cst_19 = arith.constant dense<0.000000e+00> : vector<128x128xf32>
    %15 = tpu.matmul %12, %14, %cst_19 {dimension_numbers = #tpu.dot_dimension_numbers<[1], [0], [0], [1], [0, 0, 1, 1], [], []>} : vector<128x96xf32>, vector<96x128xf32>, vector<128x128xf32> -> vector<128x128xf32>
    %16 = arith.addf %10, %15 : vector<128x128xf32>
    %c0_20 = arith.constant 0 : index
    %c0_21 = arith.constant 0 : index
    %c0_22 = arith.constant 0 : index
    %17 = tpu.strided_load %arg1[%c0_20, %c0_21, %c0_22] {strides = array<i32: 1, 2, 1>} : memref<8x34x96xf32, #tpu.memory_space<vmem>>, vector<8x16x96xf32>
    %18 = vector.shape_cast %17 : vector<8x16x96xf32> to vector<128x96xf32>
    %c1_23 = arith.constant 1 : index
    %c0_24 = arith.constant 0 : index
    %c0_25 = arith.constant 0 : index
    %c0_26 = arith.constant 0 : index
    %19 = vector.load %arg2[%c1_23, %c0_24, %c0_25, %c0_26] : memref<2x3x96x128xf32, #tpu.memory_space<vmem>>, vector<1x1x96x128xf32>
    %20 = vector.shape_cast %19 : vector<1x1x96x128xf32> to vector<96x128xf32>
    %cst_27 = arith.constant dense<0.000000e+00> : vector<128x128xf32>
    %21 = tpu.matmul %18, %20, %cst_27 {dimension_numbers = #tpu.dot_dimension_numbers<[1], [0], [0], [1], [0, 0, 1, 1], [], []>} : vector<128x96xf32>, vector<96x128xf32>, vector<128x128xf32> -> vector<128x128xf32>
    %c0_28 = arith.constant 0 : index
    %c1_29 = arith.constant 1 : index
    %c0_30 = arith.constant 0 : index
    %22 = tpu.strided_load %arg1[%c0_28, %c1_29, %c0_30] {strides = array<i32: 1, 2, 1>} : memref<8x34x96xf32, #tpu.memory_space<vmem>>, vector<8x16x96xf32>
    %23 = vector.shape_cast %22 : vector<8x16x96xf32> to vector<128x96xf32>
    %c1_31 = arith.constant 1 : index
    %c1_32 = arith.constant 1 : index
    %c0_33 = arith.constant 0 : index
    %c0_34 = arith.constant 0 : index
    %24 = vector.load %arg2[%c1_31, %c1_32, %c0_33, %c0_34] : memref<2x3x96x128xf32, #tpu.memory_space<vmem>>, vector<1x1x96x128xf32>
    %25 = vector.shape_cast %24 : vector<1x1x96x128xf32> to vector<96x128xf32>
    %cst_35 = arith.constant dense<0.000000e+00> : vector<128x128xf32>
    %26 = tpu.matmul %23, %25, %cst_35 {dimension_numbers = #tpu.dot_dimension_numbers<[1], [0], [0], [1], [0, 0, 1, 1], [], []>} : vector<128x96xf32>, vector<96x128xf32>, vector<128x128xf32> -> vector<128x128xf32>
    %27 = arith.addf %21, %26 : vector<128x128xf32>
    %c0_36 = arith.constant 0 : index
    %c2_37 = arith.constant 2 : index
    %c0_38 = arith.constant 0 : index
    %28 = tpu.strided_load %arg1[%c0_36, %c2_37, %c0_38] {strides = array<i32: 1, 2, 1>} : memref<8x34x96xf32, #tpu.memory_space<vmem>>, vector<8x16x96xf32>
    %29 = vector.shape_cast %28 : vector<8x16x96xf32> to vector<128x96xf32>
    %c1_39 = arith.constant 1 : index
    %c2_40 = arith.constant 2 : index
    %c0_41 = arith.constant 0 : index
    %c0_42 = arith.constant 0 : index
    %30 = vector.load %arg2[%c1_39, %c2_40, %c0_41, %c0_42] : memref<2x3x96x128xf32, #tpu.memory_space<vmem>>, vector<1x1x96x128xf32>
    %31 = vector.shape_cast %30 : vector<1x1x96x128xf32> to vector<96x128xf32>
    %cst_43 = arith.constant dense<0.000000e+00> : vector<128x128xf32>
    %32 = tpu.matmul %29, %31, %cst_43 {dimension_numbers = #tpu.dot_dimension_numbers<[1], [0], [0], [1], [0, 0, 1, 1], [], []>} : vector<128x96xf32>, vector<96x128xf32>, vector<128x128xf32> -> vector<128x128xf32>
    %33 = arith.addf %27, %32 : vector<128x128xf32>
    %34 = arith.maximumf %16, %33 : vector<128x128xf32>
    %c0_44 = arith.constant 0 : index
    %c1_45 = arith.constant 1 : index
    %c0_46 = arith.constant 0 : index
    %35 = tpu.strided_load %arg1[%c0_44, %c1_45, %c0_46] {strides = array<i32: 1, 2, 1>} : memref<8x34x96xf32, #tpu.memory_space<vmem>>, vector<8x16x96xf32>
    %36 = vector.shape_cast %35 : vector<8x16x96xf32> to vector<128x96xf32>
    %c0_47 = arith.constant 0 : index
    %c0_48 = arith.constant 0 : index
    %c0_49 = arith.constant 0 : index
    %c0_50 = arith.constant 0 : index
    %37 = vector.load %arg2[%c0_47, %c0_48, %c0_49, %c0_50] : memref<2x3x96x128xf32, #tpu.memory_space<vmem>>, vector<1x1x96x128xf32>
    %38 = vector.shape_cast %37 : vector<1x1x96x128xf32> to vector<96x128xf32>
    %cst_51 = arith.constant dense<0.000000e+00> : vector<128x128xf32>
    %39 = tpu.matmul %36, %38, %cst_51 {dimension_numbers = #tpu.dot_dimension_numbers<[1], [0], [0], [1], [0, 0, 1, 1], [], []>} : vector<128x96xf32>, vector<96x128xf32>, vector<128x128xf32> -> vector<128x128xf32>
    %c0_52 = arith.constant 0 : index
    %c2_53 = arith.constant 2 : index
    %c0_54 = arith.constant 0 : index
    %40 = tpu.strided_load %arg1[%c0_52, %c2_53, %c0_54] {strides = array<i32: 1, 2, 1>} : memref<8x34x96xf32, #tpu.memory_space<vmem>>, vector<8x16x96xf32>
    %41 = vector.shape_cast %40 : vector<8x16x96xf32> to vector<128x96xf32>
    %c0_55 = arith.constant 0 : index
    %c1_56 = arith.constant 1 : index
    %c0_57 = arith.constant 0 : index
    %c0_58 = arith.constant 0 : index
    %42 = vector.load %arg2[%c0_55, %c1_56, %c0_57, %c0_58] : memref<2x3x96x128xf32, #tpu.memory_space<vmem>>, vector<1x1x96x128xf32>
    %43 = vector.shape_cast %42 : vector<1x1x96x128xf32> to vector<96x128xf32>
    %cst_59 = arith.constant dense<0.000000e+00> : vector<128x128xf32>
    %44 = tpu.matmul %41, %43, %cst_59 {dimension_numbers = #tpu.dot_dimension_numbers<[1], [0], [0], [1], [0, 0, 1, 1], [], []>} : vector<128x96xf32>, vector<96x128xf32>, vector<128x128xf32> -> vector<128x128xf32>
    %45 = arith.addf %39, %44 : vector<128x128xf32>
    %c0_60 = arith.constant 0 : index
    %c3 = arith.constant 3 : index
    %c0_61 = arith.constant 0 : index
    %46 = tpu.strided_load %arg1[%c0_60, %c3, %c0_61] {strides = array<i32: 1, 2, 1>} : memref<8x34x96xf32, #tpu.memory_space<vmem>>, vector<8x16x96xf32>
    %47 = vector.shape_cast %46 : vector<8x16x96xf32> to vector<128x96xf32>
    %c0_62 = arith.constant 0 : index
    %c2_63 = arith.constant 2 : index
    %c0_64 = arith.constant 0 : index
    %c0_65 = arith.constant 0 : index
    %48 = vector.load %arg2[%c0_62, %c2_63, %c0_64, %c0_65] : memref<2x3x96x128xf32, #tpu.memory_space<vmem>>, vector<1x1x96x128xf32>
    %49 = vector.shape_cast %48 : vector<1x1x96x128xf32> to vector<96x128xf32>
    %cst_66 = arith.constant dense<0.000000e+00> : vector<128x128xf32>
    %50 = tpu.matmul %47, %49, %cst_66 {dimension_numbers = #tpu.dot_dimension_numbers<[1], [0], [0], [1], [0, 0, 1, 1], [], []>} : vector<128x96xf32>, vector<96x128xf32>, vector<128x128xf32> -> vector<128x128xf32>
    %51 = arith.addf %45, %50 : vector<128x128xf32>
    %52 = arith.maximumf %34, %51 : vector<128x128xf32>
    %c0_67 = arith.constant 0 : index
    %c1_68 = arith.constant 1 : index
    %c0_69 = arith.constant 0 : index
    %53 = tpu.strided_load %arg1[%c0_67, %c1_68, %c0_69] {strides = array<i32: 1, 2, 1>} : memref<8x34x96xf32, #tpu.memory_space<vmem>>, vector<8x16x96xf32>
    %54 = vector.shape_cast %53 : vector<8x16x96xf32> to vector<128x96xf32>
    %c1_70 = arith.constant 1 : index
    %c0_71 = arith.constant 0 : index
    %c0_72 = arith.constant 0 : index
    %c0_73 = arith.constant 0 : index
    %55 = vector.load %arg2[%c1_70, %c0_71, %c0_72, %c0_73] : memref<2x3x96x128xf32, #tpu.memory_space<vmem>>, vector<1x1x96x128xf32>
    %56 = vector.shape_cast %55 : vector<1x1x96x128xf32> to vector<96x128xf32>
    %cst_74 = arith.constant dense<0.000000e+00> : vector<128x128xf32>
    %57 = tpu.matmul %54, %56, %cst_74 {dimension_numbers = #tpu.dot_dimension_numbers<[1], [0], [0], [1], [0, 0, 1, 1], [], []>} : vector<128x96xf32>, vector<96x128xf32>, vector<128x128xf32> -> vector<128x128xf32>
    %c0_75 = arith.constant 0 : index
    %c2_76 = arith.constant 2 : index
    %c0_77 = arith.constant 0 : index
    %58 = tpu.strided_load %arg1[%c0_75, %c2_76, %c0_77] {strides = array<i32: 1, 2, 1>} : memref<8x34x96xf32, #tpu.memory_space<vmem>>, vector<8x16x96xf32>
    %59 = vector.shape_cast %58 : vector<8x16x96xf32> to vector<128x96xf32>
    %c1_78 = arith.constant 1 : index
    %c1_79 = arith.constant 1 : index
    %c0_80 = arith.constant 0 : index
    %c0_81 = arith.constant 0 : index
    %60 = vector.load %arg2[%c1_78, %c1_79, %c0_80, %c0_81] : memref<2x3x96x128xf32, #tpu.memory_space<vmem>>, vector<1x1x96x128xf32>
    %61 = vector.shape_cast %60 : vector<1x1x96x128xf32> to vector<96x128xf32>
    %cst_82 = arith.constant dense<0.000000e+00> : vector<128x128xf32>
    %62 = tpu.matmul %59, %61, %cst_82 {dimension_numbers = #tpu.dot_dimension_numbers<[1], [0], [0], [1], [0, 0, 1, 1], [], []>} : vector<128x96xf32>, vector<96x128xf32>, vector<128x128xf32> -> vector<128x128xf32>
    %63 = arith.addf %57, %62 : vector<128x128xf32>
    %c0_83 = arith.constant 0 : index
    %c3_84 = arith.constant 3 : index
    %c0_85 = arith.constant 0 : index
    %64 = tpu.strided_load %arg1[%c0_83, %c3_84, %c0_85] {strides = array<i32: 1, 2, 1>} : memref<8x34x96xf32, #tpu.memory_space<vmem>>, vector<8x16x96xf32>
    %65 = vector.shape_cast %64 : vector<8x16x96xf32> to vector<128x96xf32>
    %c1_86 = arith.constant 1 : index
    %c2_87 = arith.constant 2 : index
    %c0_88 = arith.constant 0 : index
    %c0_89 = arith.constant 0 : index
    %66 = vector.load %arg2[%c1_86, %c2_87, %c0_88, %c0_89] : memref<2x3x96x128xf32, #tpu.memory_space<vmem>>, vector<1x1x96x128xf32>
    %67 = vector.shape_cast %66 : vector<1x1x96x128xf32> to vector<96x128xf32>
    %cst_90 = arith.constant dense<0.000000e+00> : vector<128x128xf32>
    %68 = tpu.matmul %65, %67, %cst_90 {dimension_numbers = #tpu.dot_dimension_numbers<[1], [0], [0], [1], [0, 0, 1, 1], [], []>} : vector<128x96xf32>, vector<96x128xf32>, vector<128x128xf32> -> vector<128x128xf32>
    %69 = arith.addf %63, %68 : vector<128x128xf32>
    %70 = arith.maximumf %52, %69 : vector<128x128xf32>
    %c0_91 = arith.constant 0 : index
    %c0_92 = arith.constant 0 : index
    %71 = vector.load %arg3[%c0_91, %c0_92] : memref<1x128xf32, #tpu.memory_space<vmem>>, vector<1x128xf32>
    %72 = vector.broadcast %71 : vector<1x128xf32> to vector<128x128xf32>
    %73 = arith.addf %70, %72 : vector<128x128xf32>
    %cst_93 = arith.constant 0.000000e+00 : f32
    %74 = vector.broadcast %cst_93 : f32 to vector<128x128xf32>
    %75 = arith.maximumf %73, %74 : vector<128x128xf32>
    %cst_94 = arith.constant 0.000000e+00 : f32
    %76 = vector.broadcast %cst_94 : f32 to vector<8x1x128xf32>
    %c0_95 = arith.constant 0 : index
    %c0_96 = arith.constant 0 : index
    %c0_97 = arith.constant 0 : index
    %77 = vector.load %arg13[%c0_95, %c0_96, %c0_97] : memref<8x18x128xf32, #tpu.memory_space<vmem>>, vector<8x1x128xf32>
    tpu.vector_store %arg13[%c0_95, %c0_96, %c0_97], %76 {strides = array<i32>} : memref<8x18x128xf32, #tpu.memory_space<vmem>>, vector<8x1x128xf32>,
    %c0_98 = arith.constant 0 : index
    %c17 = arith.constant 17 : index
    %c0_99 = arith.constant 0 : index
    %78 = vector.load %arg13[%c0_98, %c17, %c0_99] : memref<8x18x128xf32, #tpu.memory_space<vmem>>, vector<8x1x128xf32>
    tpu.vector_store %arg13[%c0_98, %c17, %c0_99], %76 {strides = array<i32>} : memref<8x18x128xf32, #tpu.memory_space<vmem>>, vector<8x1x128xf32>,
    %79 = vector.shape_cast %75 : vector<128x128xf32> to vector<8x16x128xf32>
    %c0_100 = arith.constant 0 : index
    %c1_101 = arith.constant 1 : index
    %c0_102 = arith.constant 0 : index
    %80 = vector.load %arg13[%c0_100, %c1_101, %c0_102] : memref<8x18x128xf32, #tpu.memory_space<vmem>>, vector<8x16x128xf32>
    tpu.vector_store %arg13[%c0_100, %c1_101, %c0_102], %79 {strides = array<i32>} : memref<8x18x128xf32, #tpu.memory_space<vmem>>, vector<8x16x128xf32>,
    %c0_103 = arith.constant 0 : index
    %c0_104 = arith.constant 0 : index
    %c0_105 = arith.constant 0 : index
    %81 = tpu.strided_load %arg13[%c0_103, %c0_104, %c0_105] {strides = array<i32: 1, 2, 1>} : memref<8x18x128xf32, #tpu.memory_space<vmem>>, vector<8x8x128xf32>
    %82 = vector.shape_cast %81 : vector<8x8x128xf32> to vector<64x128xf32>
    %c0_106 = arith.constant 0 : index
    %c0_107 = arith.constant 0 : index
    %c0_108 = arith.constant 0 : index
    %c0_109 = arith.constant 0 : index
    %83 = vector.load %arg4[%c0_106, %c0_107, %c0_108, %c0_109] : memref<2x3x128x128xf32, #tpu.memory_space<vmem>>, vector<1x1x128x128xf32>
    %84 = vector.shape_cast %83 : vector<1x1x128x128xf32> to vector<128x128xf32>
    %cst_110 = arith.constant dense<0.000000e+00> : vector<64x128xf32>
    %85 = tpu.matmul %82, %84, %cst_110 {dimension_numbers = #tpu.dot_dimension_numbers<[1], [0], [0], [1], [0, 0, 1, 1], [], []>} : vector<64x128xf32>, vector<128x128xf32>, vector<64x128xf32> -> vector<64x128xf32>
    %c0_111 = arith.constant 0 : index
    %c1_112 = arith.constant 1 : index
    %c0_113 = arith.constant 0 : index
    %86 = tpu.strided_load %arg13[%c0_111, %c1_112, %c0_113] {strides = array<i32: 1, 2, 1>} : memref<8x18x128xf32, #tpu.memory_space<vmem>>, vector<8x8x128xf32>
    %87 = vector.shape_cast %86 : vector<8x8x128xf32> to vector<64x128xf32>
    %c0_114 = arith.constant 0 : index
    %c1_115 = arith.constant 1 : index
    %c0_116 = arith.constant 0 : index
    %c0_117 = arith.constant 0 : index
    %88 = vector.load %arg4[%c0_114, %c1_115, %c0_116, %c0_117] : memref<2x3x128x128xf32, #tpu.memory_space<vmem>>, vector<1x1x128x128xf32>
    %89 = vector.shape_cast %88 : vector<1x1x128x128xf32> to vector<128x128xf32>
    %cst_118 = arith.constant dense<0.000000e+00> : vector<64x128xf32>
    %90 = tpu.matmul %87, %89, %cst_118 {dimension_numbers = #tpu.dot_dimension_numbers<[1], [0], [0], [1], [0, 0, 1, 1], [], []>} : vector<64x128xf32>, vector<128x128xf32>, vector<64x128xf32> -> vector<64x128xf32>
    %91 = arith.addf %85, %90 : vector<64x128xf32>
    %c0_119 = arith.constant 0 : index
    %c2_120 = arith.constant 2 : index
    %c0_121 = arith.constant 0 : index
    %92 = tpu.strided_load %arg13[%c0_119, %c2_120, %c0_121] {strides = array<i32: 1, 2, 1>} : memref<8x18x128xf32, #tpu.memory_space<vmem>>, vector<8x8x128xf32>
    %93 = vector.shape_cast %92 : vector<8x8x128xf32> to vector<64x128xf32>
    %c0_122 = arith.constant 0 : index
    %c2_123 = arith.constant 2 : index
    %c0_124 = arith.constant 0 : index
    %c0_125 = arith.constant 0 : index
    %94 = vector.load %arg4[%c0_122, %c2_123, %c0_124, %c0_125] : memref<2x3x128x128xf32, #tpu.memory_space<vmem>>, vector<1x1x128x128xf32>
    %95 = vector.shape_cast %94 : vector<1x1x128x128xf32> to vector<128x128xf32>
    %cst_126 = arith.constant dense<0.000000e+00> : vector<64x128xf32>
    %96 = tpu.matmul %93, %95, %cst_126 {dimension_numbers = #tpu.dot_dimension_numbers<[1], [0], [0], [1], [0, 0, 1, 1], [], []>} : vector<64x128xf32>, vector<128x128xf32>, vector<64x128xf32> -> vector<64x128xf32>
    %97 = arith.addf %91, %96 : vector<64x128xf32>
    %c0_127 = arith.constant 0 : index
    %c0_128 = arith.constant 0 : index
    %c0_129 = arith.constant 0 : index
    %98 = tpu.strided_load %arg13[%c0_127, %c0_128, %c0_129] {strides = array<i32: 1, 2, 1>} : memref<8x18x128xf32, #tpu.memory_space<vmem>>, vector<8x8x128xf32>
    %99 = vector.shape_cast %98 : vector<8x8x128xf32> to vector<64x128xf32>
    %c1_130 = arith.constant 1 : index
    %c0_131 = arith.constant 0 : index
    %c0_132 = arith.constant 0 : index
    %c0_133 = arith.constant 0 : index
    %100 = vector.load %arg4[%c1_130, %c0_131, %c0_132, %c0_133] : memref<2x3x128x128xf32, #tpu.memory_space<vmem>>, vector<1x1x128x128xf32>
    %101 = vector.shape_cast %100 : vector<1x1x128x128xf32> to vector<128x128xf32>
    %cst_134 = arith.constant dense<0.000000e+00> : vector<64x128xf32>
    %102 = tpu.matmul %99, %101, %cst_134 {dimension_numbers = #tpu.dot_dimension_numbers<[1], [0], [0], [1], [0, 0, 1, 1], [], []>} : vector<64x128xf32>, vector<128x128xf32>, vector<64x128xf32> -> vector<64x128xf32>
    %c0_135 = arith.constant 0 : index
    %c1_136 = arith.constant 1 : index
    %c0_137 = arith.constant 0 : index
    %103 = tpu.strided_load %arg13[%c0_135, %c1_136, %c0_137] {strides = array<i32: 1, 2, 1>} : memref<8x18x128xf32, #tpu.memory_space<vmem>>, vector<8x8x128xf32>
    %104 = vector.shape_cast %103 : vector<8x8x128xf32> to vector<64x128xf32>
    %c1_138 = arith.constant 1 : index
    %c1_139 = arith.constant 1 : index
    %c0_140 = arith.constant 0 : index
    %c0_141 = arith.constant 0 : index
    %105 = vector.load %arg4[%c1_138, %c1_139, %c0_140, %c0_141] : memref<2x3x128x128xf32, #tpu.memory_space<vmem>>, vector<1x1x128x128xf32>
    %106 = vector.shape_cast %105 : vector<1x1x128x128xf32> to vector<128x128xf32>
    %cst_142 = arith.constant dense<0.000000e+00> : vector<64x128xf32>
    %107 = tpu.matmul %104, %106, %cst_142 {dimension_numbers = #tpu.dot_dimension_numbers<[1], [0], [0], [1], [0, 0, 1, 1], [], []>} : vector<64x128xf32>, vector<128x128xf32>, vector<64x128xf32> -> vector<64x128xf32>
    %108 = arith.addf %102, %107 : vector<64x128xf32>
    %c0_143 = arith.constant 0 : index
    %c2_144 = arith.constant 2 : index
    %c0_145 = arith.constant 0 : index
    %109 = tpu.strided_load %arg13[%c0_143, %c2_144, %c0_145] {strides = array<i32: 1, 2, 1>} : memref<8x18x128xf32, #tpu.memory_space<vmem>>, vector<8x8x128xf32>
    %110 = vector.shape_cast %109 : vector<8x8x128xf32> to vector<64x128xf32>
    %c1_146 = arith.constant 1 : index
    %c2_147 = arith.constant 2 : index
    %c0_148 = arith.constant 0 : index
    %c0_149 = arith.constant 0 : index
    %111 = vector.load %arg4[%c1_146, %c2_147, %c0_148, %c0_149] : memref<2x3x128x128xf32, #tpu.memory_space<vmem>>, vector<1x1x128x128xf32>
    %112 = vector.shape_cast %111 : vector<1x1x128x128xf32> to vector<128x128xf32>
    %cst_150 = arith.constant dense<0.000000e+00> : vector<64x128xf32>
    %113 = tpu.matmul %110, %112, %cst_150 {dimension_numbers = #tpu.dot_dimension_numbers<[1], [0], [0], [1], [0, 0, 1, 1], [], []>} : vector<64x128xf32>, vector<128x128xf32>, vector<64x128xf32> -> vector<64x128xf32>
    %114 = arith.addf %108, %113 : vector<64x128xf32>
    %115 = arith.maximumf %97, %114 : vector<64x128xf32>
    %c0_151 = arith.constant 0 : index
    %c1_152 = arith.constant 1 : index
    %c0_153 = arith.constant 0 : index
    %116 = tpu.strided_load %arg13[%c0_151, %c1_152, %c0_153] {strides = array<i32: 1, 2, 1>} : memref<8x18x128xf32, #tpu.memory_space<vmem>>, vector<8x8x128xf32>
    %117 = vector.shape_cast %116 : vector<8x8x128xf32> to vector<64x128xf32>
    %c0_154 = arith.constant 0 : index
    %c0_155 = arith.constant 0 : index
    %c0_156 = arith.constant 0 : index
    %c0_157 = arith.constant 0 : index
    %118 = vector.load %arg4[%c0_154, %c0_155, %c0_156, %c0_157] : memref<2x3x128x128xf32, #tpu.memory_space<vmem>>, vector<1x1x128x128xf32>
    %119 = vector.shape_cast %118 : vector<1x1x128x128xf32> to vector<128x128xf32>
    %cst_158 = arith.constant dense<0.000000e+00> : vector<64x128xf32>
    %120 = tpu.matmul %117, %119, %cst_158 {dimension_numbers = #tpu.dot_dimension_numbers<[1], [0], [0], [1], [0, 0, 1, 1], [], []>} : vector<64x128xf32>, vector<128x128xf32>, vector<64x128xf32> -> vector<64x128xf32>
    %c0_159 = arith.constant 0 : index
    %c2_160 = arith.constant 2 : index
    %c0_161 = arith.constant 0 : index
    %121 = tpu.strided_load %arg13[%c0_159, %c2_160, %c0_161] {strides = array<i32: 1, 2, 1>} : memref<8x18x128xf32, #tpu.memory_space<vmem>>, vector<8x8x128xf32>
    %122 = vector.shape_cast %121 : vector<8x8x128xf32> to vector<64x128xf32>
    %c0_162 = arith.constant 0 : index
    %c1_163 = arith.constant 1 : index
    %c0_164 = arith.constant 0 : index
    %c0_165 = arith.constant 0 : index
    %123 = vector.load %arg4[%c0_162, %c1_163, %c0_164, %c0_165] : memref<2x3x128x128xf32, #tpu.memory_space<vmem>>, vector<1x1x128x128xf32>
    %124 = vector.shape_cast %123 : vector<1x1x128x128xf32> to vector<128x128xf32>
    %cst_166 = arith.constant dense<0.000000e+00> : vector<64x128xf32>
    %125 = tpu.matmul %122, %124, %cst_166 {dimension_numbers = #tpu.dot_dimension_numbers<[1], [0], [0], [1], [0, 0, 1, 1], [], []>} : vector<64x128xf32>, vector<128x128xf32>, vector<64x128xf32> -> vector<64x128xf32>
    %126 = arith.addf %120, %125 : vector<64x128xf32>
    %c0_167 = arith.constant 0 : index
    %c3_168 = arith.constant 3 : index
    %c0_169 = arith.constant 0 : index
    %127 = tpu.strided_load %arg13[%c0_167, %c3_168, %c0_169] {strides = array<i32: 1, 2, 1>} : memref<8x18x128xf32, #tpu.memory_space<vmem>>, vector<8x8x128xf32>
    %128 = vector.shape_cast %127 : vector<8x8x128xf32> to vector<64x128xf32>
    %c0_170 = arith.constant 0 : index
    %c2_171 = arith.constant 2 : index
    %c0_172 = arith.constant 0 : index
    %c0_173 = arith.constant 0 : index
    %129 = vector.load %arg4[%c0_170, %c2_171, %c0_172, %c0_173] : memref<2x3x128x128xf32, #tpu.memory_space<vmem>>, vector<1x1x128x128xf32>
    %130 = vector.shape_cast %129 : vector<1x1x128x128xf32> to vector<128x128xf32>
    %cst_174 = arith.constant dense<0.000000e+00> : vector<64x128xf32>
    %131 = tpu.matmul %128, %130, %cst_174 {dimension_numbers = #tpu.dot_dimension_numbers<[1], [0], [0], [1], [0, 0, 1, 1], [], []>} : vector<64x128xf32>, vector<128x128xf32>, vector<64x128xf32> -> vector<64x128xf32>
    %132 = arith.addf %126, %131 : vector<64x128xf32>
    %133 = arith.maximumf %115, %132 : vector<64x128xf32>
    %c0_175 = arith.constant 0 : index
    %c1_176 = arith.constant 1 : index
    %c0_177 = arith.constant 0 : index
    %134 = tpu.strided_load %arg13[%c0_175, %c1_176, %c0_177] {strides = array<i32: 1, 2, 1>} : memref<8x18x128xf32, #tpu.memory_space<vmem>>, vector<8x8x128xf32>
    %135 = vector.shape_cast %134 : vector<8x8x128xf32> to vector<64x128xf32>
    %c1_178 = arith.constant 1 : index
    %c0_179 = arith.constant 0 : index
    %c0_180 = arith.constant 0 : index
    %c0_181 = arith.constant 0 : index
    %136 = vector.load %arg4[%c1_178, %c0_179, %c0_180, %c0_181] : memref<2x3x128x128xf32, #tpu.memory_space<vmem>>, vector<1x1x128x128xf32>
    %137 = vector.shape_cast %136 : vector<1x1x128x128xf32> to vector<128x128xf32>
    %cst_182 = arith.constant dense<0.000000e+00> : vector<64x128xf32>
    %138 = tpu.matmul %135, %137, %cst_182 {dimension_numbers = #tpu.dot_dimension_numbers<[1], [0], [0], [1], [0, 0, 1, 1], [], []>} : vector<64x128xf32>, vector<128x128xf32>, vector<64x128xf32> -> vector<64x128xf32>
    %c0_183 = arith.constant 0 : index
    %c2_184 = arith.constant 2 : index
    %c0_185 = arith.constant 0 : index
    %139 = tpu.strided_load %arg13[%c0_183, %c2_184, %c0_185] {strides = array<i32: 1, 2, 1>} : memref<8x18x128xf32, #tpu.memory_space<vmem>>, vector<8x8x128xf32>
    %140 = vector.shape_cast %139 : vector<8x8x128xf32> to vector<64x128xf32>
    %c1_186 = arith.constant 1 : index
    %c1_187 = arith.constant 1 : index
    %c0_188 = arith.constant 0 : index
    %c0_189 = arith.constant 0 : index
    %141 = vector.load %arg4[%c1_186, %c1_187, %c0_188, %c0_189] : memref<2x3x128x128xf32, #tpu.memory_space<vmem>>, vector<1x1x128x128xf32>
    %142 = vector.shape_cast %141 : vector<1x1x128x128xf32> to vector<128x128xf32>
    %cst_190 = arith.constant dense<0.000000e+00> : vector<64x128xf32>
    %143 = tpu.matmul %140, %142, %cst_190 {dimension_numbers = #tpu.dot_dimension_numbers<[1], [0], [0], [1], [0, 0, 1, 1], [], []>} : vector<64x128xf32>, vector<128x128xf32>, vector<64x128xf32> -> vector<64x128xf32>
    %144 = arith.addf %138, %143 : vector<64x128xf32>
    %c0_191 = arith.constant 0 : index
    %c3_192 = arith.constant 3 : index
    %c0_193 = arith.constant 0 : index
    %145 = tpu.strided_load %arg13[%c0_191, %c3_192, %c0_193] {strides = array<i32: 1, 2, 1>} : memref<8x18x128xf32, #tpu.memory_space<vmem>>, vector<8x8x128xf32>
    %146 = vector.shape_cast %145 : vector<8x8x128xf32> to vector<64x128xf32>
    %c1_194 = arith.constant 1 : index
    %c2_195 = arith.constant 2 : index
    %c0_196 = arith.constant 0 : index
    %c0_197 = arith.constant 0 : index
    %147 = vector.load %arg4[%c1_194, %c2_195, %c0_196, %c0_197] : memref<2x3x128x128xf32, #tpu.memory_space<vmem>>, vector<1x1x128x128xf32>
    %148 = vector.shape_cast %147 : vector<1x1x128x128xf32> to vector<128x128xf32>
    %cst_198 = arith.constant dense<0.000000e+00> : vector<64x128xf32>
    %149 = tpu.matmul %146, %148, %cst_198 {dimension_numbers = #tpu.dot_dimension_numbers<[1], [0], [0], [1], [0, 0, 1, 1], [], []>} : vector<64x128xf32>, vector<128x128xf32>, vector<64x128xf32> -> vector<64x128xf32>
    %150 = arith.addf %144, %149 : vector<64x128xf32>
    %151 = arith.maximumf %133, %150 : vector<64x128xf32>
    %c0_199 = arith.constant 0 : index
    %c0_200 = arith.constant 0 : index
    %152 = vector.load %arg5[%c0_199, %c0_200] : memref<1x128xf32, #tpu.memory_space<vmem>>, vector<1x128xf32>
    %153 = vector.broadcast %152 : vector<1x128xf32> to vector<64x128xf32>
    %154 = arith.addf %151, %153 : vector<64x128xf32>
    %cst_201 = arith.constant 0.000000e+00 : f32
    %155 = vector.broadcast %cst_201 : f32 to vector<64x128xf32>
    %156 = arith.maximumf %154, %155 : vector<64x128xf32>
    %157 = vector.shape_cast %156 : vector<64x128xf32> to vector<8x8x128xf32>
    %158 = vector.extract_strided_slice %157 {offsets = [0, 0, 0], sizes = [8, 1, 128], strides = [1, 1, 1]} : vector<8x8x128xf32> to vector<8x1x128xf32>
    %159 = vector.shape_cast %158 : vector<8x1x128xf32> to vector<8x128xf32>
    %c0_202 = arith.constant 0 : index
    %c0_203 = arith.constant 0 : index
    %160 = vector.load %arg14[%c0_202, %c0_203] : memref<8x1024xf32, #tpu.memory_space<vmem>>, vector<8x128xf32>
    tpu.vector_store %arg14[%c0_202, %c0_203], %159 {strides = array<i32>} : memref<8x1024xf32, #tpu.memory_space<vmem>>, vector<8x128xf32>,
    %161 = vector.extract_strided_slice %157 {offsets = [0, 1, 0], sizes = [8, 1, 128], strides = [1, 1, 1]} : vector<8x8x128xf32> to vector<8x1x128xf32>
    %162 = vector.shape_cast %161 : vector<8x1x128xf32> to vector<8x128xf32>
    %c0_204 = arith.constant 0 : index
    %c128 = arith.constant 128 : index
    %163 = vector.load %arg14[%c0_204, %c128] : memref<8x1024xf32, #tpu.memory_space<vmem>>, vector<8x128xf32>
    tpu.vector_store %arg14[%c0_204, %c128], %162 {strides = array<i32>} : memref<8x1024xf32, #tpu.memory_space<vmem>>, vector<8x128xf32>,
    %164 = vector.extract_strided_slice %157 {offsets = [0, 2, 0], sizes = [8, 1, 128], strides = [1, 1, 1]} : vector<8x8x128xf32> to vector<8x1x128xf32>
    %165 = vector.shape_cast %164 : vector<8x1x128xf32> to vector<8x128xf32>
    %c0_205 = arith.constant 0 : index
    %c256 = arith.constant 256 : index
    %166 = vector.load %arg14[%c0_205, %c256] : memref<8x1024xf32, #tpu.memory_space<vmem>>, vector<8x128xf32>
    tpu.vector_store %arg14[%c0_205, %c256], %165 {strides = array<i32>} : memref<8x1024xf32, #tpu.memory_space<vmem>>, vector<8x128xf32>,
    %167 = vector.extract_strided_slice %157 {offsets = [0, 3, 0], sizes = [8, 1, 128], strides = [1, 1, 1]} : vector<8x8x128xf32> to vector<8x1x128xf32>
    %168 = vector.shape_cast %167 : vector<8x1x128xf32> to vector<8x128xf32>
    %c0_206 = arith.constant 0 : index
    %c384 = arith.constant 384 : index
    %169 = vector.load %arg14[%c0_206, %c384] : memref<8x1024xf32, #tpu.memory_space<vmem>>, vector<8x128xf32>
    tpu.vector_store %arg14[%c0_206, %c384], %168 {strides = array<i32>} : memref<8x1024xf32, #tpu.memory_space<vmem>>, vector<8x128xf32>,
    %170 = vector.extract_strided_slice %157 {offsets = [0, 4, 0], sizes = [8, 1, 128], strides = [1, 1, 1]} : vector<8x8x128xf32> to vector<8x1x128xf32>
    %171 = vector.shape_cast %170 : vector<8x1x128xf32> to vector<8x128xf32>
    %c0_207 = arith.constant 0 : index
    %c512 = arith.constant 512 : index
    %172 = vector.load %arg14[%c0_207, %c512] : memref<8x1024xf32, #tpu.memory_space<vmem>>, vector<8x128xf32>
    tpu.vector_store %arg14[%c0_207, %c512], %171 {strides = array<i32>} : memref<8x1024xf32, #tpu.memory_space<vmem>>, vector<8x128xf32>,
    %173 = vector.extract_strided_slice %157 {offsets = [0, 5, 0], sizes = [8, 1, 128], strides = [1, 1, 1]} : vector<8x8x128xf32> to vector<8x1x128xf32>
    %174 = vector.shape_cast %173 : vector<8x1x128xf32> to vector<8x128xf32>
    %c0_208 = arith.constant 0 : index
    %c640 = arith.constant 640 : index
    %175 = vector.load %arg14[%c0_208, %c640] : memref<8x1024xf32, #tpu.memory_space<vmem>>, vector<8x128xf32>
    tpu.vector_store %arg14[%c0_208, %c640], %174 {strides = array<i32>} : memref<8x1024xf32, #tpu.memory_space<vmem>>, vector<8x128xf32>,
    %176 = vector.extract_strided_slice %157 {offsets = [0, 6, 0], sizes = [8, 1, 128], strides = [1, 1, 1]} : vector<8x8x128xf32> to vector<8x1x128xf32>
    %177 = vector.shape_cast %176 : vector<8x1x128xf32> to vector<8x128xf32>
    %c0_209 = arith.constant 0 : index
    %c768 = arith.constant 768 : index
    %178 = vector.load %arg14[%c0_209, %c768] : memref<8x1024xf32, #tpu.memory_space<vmem>>, vector<8x128xf32>
    tpu.vector_store %arg14[%c0_209, %c768], %177 {strides = array<i32>} : memref<8x1024xf32, #tpu.memory_space<vmem>>, vector<8x128xf32>,
    %179 = vector.extract_strided_slice %157 {offsets = [0, 7, 0], sizes = [8, 1, 128], strides = [1, 1, 1]} : vector<8x8x128xf32> to vector<8x1x128xf32>
    %180 = vector.shape_cast %179 : vector<8x1x128xf32> to vector<8x128xf32>
    %c0_210 = arith.constant 0 : index
    %c896 = arith.constant 896 : index
    %181 = vector.load %arg14[%c0_210, %c896] : memref<8x1024xf32, #tpu.memory_space<vmem>>, vector<8x128xf32>
    tpu.vector_store %arg14[%c0_210, %c896], %180 {strides = array<i32>} : memref<8x1024xf32, #tpu.memory_space<vmem>>, vector<8x128xf32>,
    %c0_211 = arith.constant 0 : index
    %c0_212 = arith.constant 0 : index
    %182 = vector.load %arg14[%c0_211, %c0_212] : memref<8x1024xf32, #tpu.memory_space<vmem>>, vector<8x1024xf32>
    %c0_213 = arith.constant 0 : index
    %c0_214 = arith.constant 0 : index
    %183 = vector.load %arg6[%c0_213, %c0_214] : memref<1024x64xf32, #tpu.memory_space<vmem>>, vector<1024x64xf32>
    %cst_215 = arith.constant dense<0.000000e+00> : vector<8x64xf32>
    %184 = tpu.matmul %182, %183, %cst_215 {dimension_numbers = #tpu.dot_dimension_numbers<[1], [0], [0], [1], [0, 0, 1, 1], [], []>} : vector<8x1024xf32>, vector<1024x64xf32>, vector<8x64xf32> -> vector<8x64xf32>
    %c0_216 = arith.constant 0 : index
    %c0_217 = arith.constant 0 : index
    %185 = vector.load %arg7[%c0_216, %c0_217] : memref<1x64xf32, #tpu.memory_space<vmem>>, vector<1x64xf32>
    %186 = vector.broadcast %185 : vector<1x64xf32> to vector<8x64xf32>
    %187 = arith.addf %184, %186 : vector<8x64xf32>
    %cst_218 = arith.constant 0.000000e+00 : f32
    %188 = vector.broadcast %cst_218 : f32 to vector<8x64xf32>
    %189 = arith.maximumf %187, %188 : vector<8x64xf32>
    %c0_219 = arith.constant 0 : index
    %c0_220 = arith.constant 0 : index
    %190 = vector.load %arg8[%c0_219, %c0_220] : memref<64x32xf32, #tpu.memory_space<vmem>>, vector<64x32xf32>
    %cst_221 = arith.constant dense<0.000000e+00> : vector<8x32xf32>
    %191 = tpu.matmul %189, %190, %cst_221 {dimension_numbers = #tpu.dot_dimension_numbers<[1], [0], [0], [1], [0, 0, 1, 1], [], []>} : vector<8x64xf32>, vector<64x32xf32>, vector<8x32xf32> -> vector<8x32xf32>
    %c0_222 = arith.constant 0 : index
    %c0_223 = arith.constant 0 : index
    %192 = vector.load %arg9[%c0_222, %c0_223] : memref<1x32xf32, #tpu.memory_space<vmem>>, vector<1x32xf32>
    %193 = vector.broadcast %192 : vector<1x32xf32> to vector<8x32xf32>
    %194 = arith.addf %191, %193 : vector<8x32xf32>
    %cst_224 = arith.constant 0.000000e+00 : f32
    %195 = vector.broadcast %cst_224 : f32 to vector<8x32xf32>
    %196 = arith.maximumf %194, %195 : vector<8x32xf32>
    %c0_225 = arith.constant 0 : index
    %c0_226 = arith.constant 0 : index
    %197 = vector.load %arg10[%c0_225, %c0_226] : memref<32x10xf32, #tpu.memory_space<vmem>>, vector<32x10xf32>
    %cst_227 = arith.constant dense<0.000000e+00> : vector<8x10xf32>
    %198 = tpu.matmul %196, %197, %cst_227 {dimension_numbers = #tpu.dot_dimension_numbers<[1], [0], [0], [1], [0, 0, 1, 1], [], []>} : vector<8x32xf32>, vector<32x10xf32>, vector<8x10xf32> -> vector<8x10xf32>
    %c0_228 = arith.constant 0 : index
    %c0_229 = arith.constant 0 : index
    %199 = vector.load %arg11[%c0_228, %c0_229] : memref<1x10xf32, #tpu.memory_space<vmem>>, vector<1x10xf32>
    %200 = vector.broadcast %199 : vector<1x10xf32> to vector<8x10xf32>
    %201 = arith.addf %198, %200 : vector<8x10xf32>
    %cst_230 = arith.constant dense<0xFF800000> : vector<8xf32>
    %202 = vector.multi_reduction <maximumf>, %201, %cst_230 [1] : vector<8x10xf32> to vector<8xf32>
    %203 = vector.shape_cast %202 : vector<8xf32> to vector<8x1xf32>
    %204 = vector.broadcast %203 : vector<8x1xf32> to vector<8x10xf32>
    %205 = arith.subf %201, %204 : vector<8x10xf32>
    %206 = math.exp %205 : vector<8x10xf32>
    %cst_231 = arith.constant dense<0.000000e+00> : vector<8xf32>
    %207 = vector.multi_reduction <add>, %206, %cst_231 [1] : vector<8x10xf32> to vector<8xf32>
    %208 = vector.shape_cast %207 : vector<8xf32> to vector<8x1xf32>
    %209 = math.log %208 : vector<8x1xf32>
    %210 = vector.broadcast %209 : vector<8x1xf32> to vector<8x10xf32>
    %211 = arith.subf %205, %210 : vector<8x10xf32>
    %c0_232 = arith.constant 0 : index
    %c0_233 = arith.constant 0 : index
    %212 = vector.load %arg12[%c0_232, %c0_233] : memref<8x10xf32, #tpu.memory_space<vmem>>, vector<8x10xf32>
    tpu.vector_store %arg12[%c0_232, %c0_233], %211 {strides = array<i32>} : memref<8x10xf32, #tpu.memory_space<vmem>>, vector<8x10xf32>,
    return
  }
  func.func @transform_0(%arg0: i32) -> (i32, i32, i32) {
    %c0_i32 = arith.constant 0 : i32
    %c0_i32_0 = arith.constant 0 : i32
    %c0_i32_1 = arith.constant 0 : i32
    return %arg0, %c0_i32, %c0_i32_0 : i32, i32, i32
  }
  func.func @transform_1(%arg0: i32) -> (i32, i32, i32, i32) {
    %c0_i32 = arith.constant 0 : i32
    %c0_i32_0 = arith.constant 0 : i32
    %c0_i32_1 = arith.constant 0 : i32
    %c0_i32_2 = arith.constant 0 : i32
    %c0_i32_3 = arith.constant 0 : i32
    return %c0_i32, %c0_i32_0, %c0_i32_1, %c0_i32_2 : i32, i32, i32, i32
  }
  func.func @transform_2(%arg0: i32) -> (i32, i32) {
    %c0_i32 = arith.constant 0 : i32
    %c0_i32_0 = arith.constant 0 : i32
    %c0_i32_1 = arith.constant 0 : i32
    return %c0_i32, %c0_i32_0 : i32, i32
  }
  func.func @transform_3(%arg0: i32) -> (i32, i32, i32, i32) {
    %c0_i32 = arith.constant 0 : i32
    %c0_i32_0 = arith.constant 0 : i32
    %c0_i32_1 = arith.constant 0 : i32
    %c0_i32_2 = arith.constant 0 : i32
    %c0_i32_3 = arith.constant 0 : i32
    return %c0_i32, %c0_i32_0, %c0_i32_1, %c0_i32_2 : i32, i32, i32, i32
  }
  func.func @transform_4(%arg0: i32) -> (i32, i32) {
    %c0_i32 = arith.constant 0 : i32
    %c0_i32_0 = arith.constant 0 : i32
    %c0_i32_1 = arith.constant 0 : i32
    return %c0_i32, %c0_i32_0 : i32, i32
  }
  func.func @transform_5(%arg0: i32) -> (i32, i32) {
    %c0_i32 = arith.constant 0 : i32
    %c0_i32_0 = arith.constant 0 : i32
    %c0_i32_1 = arith.constant 0 : i32
    return %c0_i32, %c0_i32_0 : i32, i32
  }
  func.func @transform_6(%arg0: i32) -> (i32, i32) {
    %c0_i32 = arith.constant 0 : i32
    %c0_i32_0 = arith.constant 0 : i32
    %c0_i32_1 = arith.constant 0 : i32
    return %c0_i32, %c0_i32_0 : i32, i32
  }
  func.func @transform_7(%arg0: i32) -> (i32, i32) {
    %c0_i32 = arith.constant 0 : i32
    %c0_i32_0 = arith.constant 0 : i32
    %c0_i32_1 = arith.constant 0 : i32
    return %c0_i32, %c0_i32_0 : i32, i32
  }
  func.func @transform_8(%arg0: i32) -> (i32, i32) {
    %c0_i32 = arith.constant 0 : i32
    %c0_i32_0 = arith.constant 0 : i32
    %c0_i32_1 = arith.constant 0 : i32
    return %c0_i32, %c0_i32_0 : i32, i32
  }
  func.func @transform_9(%arg0: i32) -> (i32, i32) {
    %c0_i32 = arith.constant 0 : i32
    %c0_i32_0 = arith.constant 0 : i32
    %c0_i32_1 = arith.constant 0 : i32
    return %c0_i32, %c0_i32_0 : i32, i32
  }
  func.func @transform_10(%arg0: i32) -> (i32, i32) {
    %c0_i32 = arith.constant 0 : i32
    %c0_i32_0 = arith.constant 0 : i32
    %c0_i32_1 = arith.constant 0 : i32
    return %c0_i32, %c0_i32_0 : i32, i32
  }
  func.func @transform_11(%arg0: i32) -> (i32, i32) {
    %c0_i32 = arith.constant 0 : i32
    %c0_i32_0 = arith.constant 0 : i32
    return %arg0, %c0_i32 : i32, i32
  }
}

</mosaic_0001>

<bundles_post_ra>
// kernel: tile.13
= control target key start
LH: loop header
LB: loop body
LE: loop exit
PB: predicated region body
PF: predicated region fallthrough
CT: control target
= control target key end

     0   :  { %s28_s0 = inlined_call_operand.vmem [shape: f32[8], index: 0, kind: input, shape index: {}]   ;;  %s29_s1 = inlined_call_operand.vmem [shape: f32[16,8], index: 1, kind: output, shape index: {}]  }
   0x1   :  { %v4_v0 = vld [vmem:[%s28_s0] ss:$0 sm:$0xff] }
   0x2   :  { %5 = vst [vmem:[%s29_s1] sm:$0xff] %v4_v0  ;;  %8 = vst [vmem:[%s29_s1 + $0x8] sm:$0xff] %v4_v0 }

// kernel: tile.14
= control target key start
LH: loop header
LB: loop body
LE: loop exit
PB: predicated region body
PF: predicated region fallthrough
CT: control target
= control target key end

     0   :  { %s131_s10 = smov 120   ;;  %s132_s11 = smov 104   ;;  %vm3_vm0 = vcmask 64512   ;;  %vm9_vm1 = vcmask 1048512   ;;  %vm15_vm2 = vcmask 982912   ;;  %vm21_vm3 = vcmask 917312   ;;  %s207_s0 = inlined_call_operand.vmem [shape: f32[16,8], index: 0, kind: input, shape index: {}]   ;;  %s208_s1 = inlined_call_operand.vmem [shape: f32[1,128], index: 1, kind: output, shape index: {}]  }
   0x1   :  { %v101_v0 = vld [vmem:[%s207_s0 + $0xf] sm:$0x1]   ;;  %v103_v1 = vld [vmem:[%s207_s0 + $0xd] sm:$0x1]   ;;  %v102_v2 = vld [vmem:[%s207_s0 + $0xe] sm:$0x1]  }
   0x2   :  { %7 = vrot.lane.b32.xlu0 %v101_v0, %s131_s10  ;;  %19 = vrot.lane.b32.xlu1 %v103_v1, %s132_s11  ;;  %v104_v3 = vld [vmem:[%s207_s0 + $0xc] sm:$0x1]   ;;  %s133_s16 = smov 112   ;;  %s134_s17 = smov 96   ;;  %v105_v4 = vld [vmem:[%s207_s0 + $0xb] sm:$0x1]  }
   0x3   :  { %v106_v5 = vld [vmem:[%s207_s0 + $0xa] sm:$0x1]   ;;  %v2_v6 = vld [vmem:[%s207_s0] sm:$0x1]   ;;  %s135_s24 = smov 88   ;;  %s136_s25 = smov 80  }
   0x4   :  { %4 = vst.msk [vmem:[#allocation0] sm:$0x1] %vm3_vm0, %v2_v6   ;;  %v107_v7 = vld [vmem:[%s207_s0 + $0x9] sm:$0x1]   ;;  %v108_v8 = vld [vmem:[%s207_s0 + $0x8] sm:$0x1]  }
   0x5   :  { %s137_s30 = smov 72   ;;  %s138_s2 = smov 64   ;;  %v109_v9 = vld [vmem:[%s207_s0 + $0x7] sm:$0x1]   ;;  %v110_v10 = vld [vmem:[%s207_s0 + $0x6] sm:$0x1]  }
   0x6   :  { %13 = vrot.lane.b32.xlu0 %v102_v2, %s133_s16  ;;  %25 = vrot.lane.b32.xlu1 %v104_v3, %s134_s17  ;;  %s139_s7 = smov 56   ;;  %s140_s8 = smov 48   ;;  %v111_v11 = vld [vmem:[%s207_s0 + $0x5] sm:$0x1]   ;;  %v112_v12 = vld [vmem:[%s207_s0 + $0x4] sm:$0x1]  }
   0x7   :  { %s141_s13 = smov 40   ;;  %s142_s14 = smov 32   ;;  %v113_v13 = vld [vmem:[%s207_s0 + $0x3] sm:$0x1]   ;;  %v114_v14 = vld [vmem:[%s207_s0 + $0x2] sm:$0x1]  }
   0x8   :  { %s143_s19 = smov 24   ;;  %s144_s20 = smov 16   ;;  %v115_v15 = vld [vmem:[%s207_s0 + $0x1] sm:$0x1]   ;;  %vm27_vm4 = vcmask 851712   ;;  %vm33_vm5 = vcmask 786112  }
   0x9   :  { %s145_s0 = smov 8   ;;  %vm39_vm6 = vcmask 720512   ;;  %vm45_vm7 = vcmask 654912   ;;  %vm51_vm8 = vcmask 589312   ;;  %vm57_vm9 = vcmask 523712  }
   0xa   :  { %31 = vrot.lane.b32.xlu0 %v105_v4, %s135_s24  ;;  %37 = vrot.lane.b32.xlu1 %v106_v5, %s136_s25  ;;  %vm63_vm10 = vcmask 458112   ;;  %vm69_vm11 = vcmask 392512   ;;  %vm75_vm12 = vcmask 326912   ;;  %vm81_vm13 = vcmask 261312  }
   0xb   :  { %vm87_vm14 = vcmask 195712   ;;  %vm93_vm15 = vcmask 130112  }
   0xe   :  { %43 = vrot.lane.b32.xlu0 %v107_v7, %s137_s30  ;;  %49 = vrot.lane.b32.xlu1 %v108_v8, %s138_s2 }
  0x12   :  { %55 = vrot.lane.b32.xlu0 %v109_v9, %s139_s7  ;;  %61 = vrot.lane.b32.xlu1 %v110_v10, %s140_s8 }
  0x16   :  { %67 = vrot.lane.b32.xlu0 %v111_v11, %s141_s13  ;;  %73 = vrot.lane.b32.xlu1 %v112_v12, %s142_s14 }
  0x1a   :  { %79 = vrot.lane.b32.xlu0 %v113_v13, %s143_s19  ;;  %85 = vrot.lane.b32.xlu1 %v114_v14, %s144_s20 }
  0x1e   :  { %91 = vrot.lane.b32.xlu0 %v115_v15, %s145_s0 }
  0x74   :  { %v8_v16 = vpop.permute.xlu0 %7   ;;  %v20_v17 = vpop.permute.xlu1 %19  }
  0x75   :  { %10 = vst.msk [vmem:[#allocation0] sm:$0x1] %vm9_vm1, %v8_v16  }
  0x78   :  { %v14_v18 = vpop.permute.xlu0 %13   ;;  %v26_v19 = vpop.permute.xlu1 %25  }
  0x79   :  { %16 = vst.msk [vmem:[#allocation0] sm:$0x1] %vm15_vm2, %v14_v18  }
  0x7a   :  { %22 = vst.msk [vmem:[#allocation0] sm:$0x1] %vm21_vm3, %v20_v17  }
  0x7b   :  { %28 = vst.msk [vmem:[#allocation0] sm:$0x1] %vm27_vm4, %v26_v19  }
  0x7c   :  { %v32_v20 = vpop.permute.xlu0 %31   ;;  %v38_v21 = vpop.permute.xlu1 %37  }
  0x7d   :  { %34 = vst.msk [vmem:[#allocation0] sm:$0x1] %vm33_vm5, %v32_v20  }
  0x7e   :  { %40 = vst.msk [vmem:[#allocation0] sm:$0x1] %vm39_vm6, %v38_v21  }
  0x80   :  { %v44_v22 = vpop.permute.xlu0 %43   ;;  %v50_v23 = vpop.permute.xlu1 %49  }
  0x81   :  { %46 = vst.msk [vmem:[#allocation0] sm:$0x1] %vm45_vm7, %v44_v22  }
  0x82   :  { %52 = vst.msk [vmem:[#allocation0] sm:$0x1] %vm51_vm8, %v50_v23  }
  0x84   :  { %v56_v24 = vpop.permute.xlu0 %55   ;;  %v62_v25 = vpop.permute.xlu1 %61  }
  0x85   :  { %58 = vst.msk [vmem:[#allocation0] sm:$0x1] %vm57_vm9, %v56_v24  }
  0x86   :  { %64 = vst.msk [vmem:[#allocation0] sm:$0x1] %vm63_vm10, %v62_v25  }
  0x88   :  { %v68_v26 = vpop.permute.xlu0 %67   ;;  %v74_v27 = vpop.permute.xlu1 %73  }
  0x89   :  { %70 = vst.msk [vmem:[#allocation0] sm:$0x1] %vm69_vm11, %v68_v26  }
  0x8a   :  { %76 = vst.msk [vmem:[#allocation0] sm:$0x1] %vm75_vm12, %v74_v27  }
  0x8c   :  { %v80_v28 = vpop.permute.xlu0 %79   ;;  %v86_v29 = vpop.permute.xlu1 %85  }
  0x8d   :  { %82 = vst.msk [vmem:[#allocation0] sm:$0x1] %vm81_vm13, %v80_v28  }
  0x8e   :  { %88 = vst.msk [vmem:[#allocation0] sm:$0x1] %vm87_vm14, %v86_v29  }
  0x90   :  { %v92_v30 = vpop.permute.xlu0 %91  }
  0x91   :  { %94 = vst.msk [vmem:[#allocation0] sm:$0x1] %vm93_vm15, %v92_v30  }
  0x98   :  { %v98_v31 = vld [vmem:[#allocation0] sm:$0x1] }
  0x99   :  { %100 = vst [vmem:[%s208_s1] sm:$0x1] %v98_v31 }

// kernel: tile.18
= control target key start
LH: loop header
LB: loop body
LE: loop exit
PB: predicated region body
PF: predicated region fallthrough
CT: control target
= control target key end

     0   :  { %s22_s0 = inlined_call_operand.vmem [shape: f32[16], index: 0, kind: input, shape index: {}]   ;;  %s23_s1 = inlined_call_operand.vmem [shape: f32[8,16], index: 1, kind: output, shape index: {}]  }
   0x1   :  { %v4_v0 = vld [vmem:[%s22_s0] ss:$0 sm:$0xff] }
   0x2   :  { %5 = vst [vmem:[%s23_s1] sm:$0xff] %v4_v0 }

// kernel: tile.19
= control target key start
LH: loop header
LB: loop body
LE: loop exit
PB: predicated region body
PF: predicated region fallthrough
CT: control target
= control target key end

     0   :  { %s67_s10 = smov 112   ;;  %s68_s11 = smov 80   ;;  %vm3_vm0 = vcmask 130048   ;;  %vm9_vm1 = vcmask 1048448   ;;  %vm15_vm2 = vcmask 917248   ;;  %vm21_vm3 = vcmask 786048   ;;  %s111_s0 = inlined_call_operand.vmem [shape: f32[8,16], index: 0, kind: input, shape index: {}]   ;;  %s112_s1 = inlined_call_operand.vmem [shape: f32[1,128], index: 1, kind: output, shape index: {}]  }
   0x1   :  { %v53_v0 = vld [vmem:[%s111_s0 + $0x7] sm:$0x1]   ;;  %v55_v1 = vld [vmem:[%s111_s0 + $0x5] sm:$0x1]   ;;  %v54_v2 = vld [vmem:[%s111_s0 + $0x6] sm:$0x1]  }
   0x2   :  { %7 = vrot.lane.b32.xlu0 %v53_v0, %s67_s10  ;;  %19 = vrot.lane.b32.xlu1 %v55_v1, %s68_s11  ;;  %v56_v3 = vld [vmem:[%s111_s0 + $0x4] sm:$0x1]   ;;  %v2_v4 = vld [vmem:[%s111_s0] sm:$0x1]   ;;  %s69_s18 = smov 96   ;;  %s70_s19 = smov 64  }
   0x3   :  { %4 = vst.msk [vmem:[#allocation0] sm:$0x1] %vm3_vm0, %v2_v4   ;;  %v57_v5 = vld [vmem:[%s111_s0 + $0x3] sm:$0x1]   ;;  %v58_v6 = vld [vmem:[%s111_s0 + $0x2] sm:$0x1]  }
   0x4   :  { %s71_s24 = smov 48   ;;  %s72_s25 = smov 32   ;;  %v59_v7 = vld [vmem:[%s111_s0 + $0x1] sm:$0x1]   ;;  %vm27_vm4 = vcmask 654848   ;;  %vm33_vm5 = vcmask 523648  }
   0x5   :  { %s73_s0 = smov 16   ;;  %vm39_vm6 = vcmask 392448   ;;  %vm45_vm7 = vcmask 261248  }
   0x6   :  { %13 = vrot.lane.b32.xlu0 %v54_v2, %s69_s18  ;;  %25 = vrot.lane.b32.xlu1 %v56_v3, %s70_s19 }
   0xa   :  { %31 = vrot.lane.b32.xlu0 %v57_v5, %s71_s24  ;;  %37 = vrot.lane.b32.xlu1 %v58_v6, %s72_s25 }
   0xe   :  { %43 = vrot.lane.b32.xlu0 %v59_v7, %s73_s0 }
  0x74   :  { %v8_v8 = vpop.permute.xlu0 %7   ;;  %v20_v9 = vpop.permute.xlu1 %19  }
  0x75   :  { %10 = vst.msk [vmem:[#allocation0] sm:$0x1] %vm9_vm1, %v8_v8  }
  0x78   :  { %v14_v10 = vpop.permute.xlu0 %13   ;;  %v26_v11 = vpop.permute.xlu1 %25  }
  0x79   :  { %16 = vst.msk [vmem:[#allocation0] sm:$0x1] %vm15_vm2, %v14_v10  }
  0x7a   :  { %22 = vst.msk [vmem:[#allocation0] sm:$0x1] %vm21_vm3, %v20_v9  }
  0x7b   :  { %28 = vst.msk [vmem:[#allocation0] sm:$0x1] %vm27_vm4, %v26_v11  }
  0x7c   :  { %v32_v12 = vpop.permute.xlu0 %31   ;;  %v38_v13 = vpop.permute.xlu1 %37  }
  0x7d   :  { %34 = vst.msk [vmem:[#allocation0] sm:$0x1] %vm33_vm5, %v32_v12  }
  0x7e   :  { %40 = vst.msk [vmem:[#allocation0] sm:$0x1] %vm39_vm6, %v38_v13  }
  0x80   :  { %v44_v14 = vpop.permute.xlu0 %43  }
  0x81   :  { %46 = vst.msk [vmem:[#allocation0] sm:$0x1] %vm45_vm7, %v44_v14  }
  0x88   :  { %v50_v15 = vld [vmem:[#allocation0] sm:$0x1] }
  0x89   :  { %52 = vst [vmem:[%s112_s1] sm:$0x1] %v50_v15 }

// kernel: cnn_forward.1
= control target key start
LH: loop header
LB: loop body
LE: loop exit
PB: predicated region body
PF: predicated region fallthrough
CT: control target
= control target key end

     0   :  { %vm127_vm0 = vcmask 785408   ;;  %s10568_s0 = inlined_call_operand.vmem [shape: f32[8,34,96], index: 0, kind: input, shape index: {}]   ;;  %s10569_s1 = inlined_call_operand.vmem [shape: f32[2,3,96,128], index: 1, kind: input, shape index: {}]   ;;  %s10570_s2 = inlined_call_operand.vmem [shape: f32[1,128], index: 2, kind: input, shape index: {}]   ;;  %s10571_s3 = inlined_call_operand.vmem [shape: f32[2,3,128,128], index: 3, kind: input, shape index: {}]   ;;  %s10572_s4 = inlined_call_operand.vmem [shape: f32[1,128], index: 4, kind: input, shape index: {}]   ;;  %s10573_s5 = inlined_call_operand.vmem [shape: f32[1024,64], index: 5, kind: input, shape index: {}]   ;;  %s10574_s6 = inlined_call_operand.vmem [shape: f32[1,64], index: 6, kind: input, shape index: {}]   ;;  %s10575_s7 = inlined_call_operand.vmem [shape: f32[64,32], index: 7, kind: input, shape index: {}]   ;;  %s10576_s8 = inlined_call_operand.vmem [shape: f32[1,32], index: 8, kind: input, shape index: {}]   ;;  %s10577_s9 = inlined_call_operand.vmem [shape: f32[32,10], index: 9, kind: input, shape index: {}]   ;;  %s10578_s10 = inlined_call_operand.vmem [shape: f32[1,10], index: 10, kind: input, shape index: {}]   ;;  %s10579_s11 = inlined_call_operand.hbm [shape: f32[8,10], index: 11, kind: output, shape index: {}]  }
   0x1   :  { %v4663_v0 = vld [vmem:[%s10569_s1 + $0x60] sm:$0xff]  ;;  %v4664_v1 = vld [vmem:[%s10569_s1 + $0x68] sm:$0xff]  ;;  %v4665_v5 = vld [vmem:[%s10569_s1 + $0x70] sm:$0xff] }
   0x2   :  { %v4763_v2 = vld [vmem:[%s10569_s1 + $0x180] sm:$0xff]  ;;  %v8061_v3 = vpack.c.bf16 %v4664_v1, %v4663_v0  ;;  %v4764_v4 = vld [vmem:[%s10569_s1 + $0x188] sm:$0xff]  ;;  %v4666_v6 = vld [vmem:[%s10569_s1 + $0x78] sm:$0xff] }
   0x3   :  { %v8072_v7 = vpack.c.bf16 %v4764_v4, %v4763_v2  ;;  %v8074_v8 = vpack.c.bf16 %v4666_v6, %v4665_v5  ;;  %v4765_v9 = vld [vmem:[%s10569_s1 + $0x190] sm:$0xff]  ;;  %v4766_v10 = vld [vmem:[%s10569_s1 + $0x198] sm:$0xff]  ;;  %v4667_v11 = vld [vmem:[%s10569_s1 + $0x80] sm:$0xff] }
   0x4   :  { %6947 = vmatprep.subr.bf16.mxu0 %v8061_v3  ;;  %v8086_v12 = vpack.c.bf16 %v4766_v10, %v4765_v9  ;;  %v4668_v13 = vld [vmem:[%s10569_s1 + $0x88] sm:$0xff]  ;;  %v4767_v14 = vld [vmem:[%s10569_s1 + $0x1a0] sm:$0xff]  ;;  %v4669_v18 = vld [vmem:[%s10569_s1 + $0x90] sm:$0xff] }
   0x5   :  { %v4768_v15 = vld [vmem:[%s10569_s1 + $0x1a8] sm:$0xff]  ;;  %7019 = vmatprep.subr.bf16.mxu1 %v8072_v7  ;;  %6949 = vmatpush3.bf16.msra.mxu0 %v8061_v3  ;;  %v8101_v16 = vpack.c.bf16 %v4668_v13, %v4667_v11  ;;  %v4670_v19 = vld [vmem:[%s10569_s1 + $0x98] sm:$0xff]  ;;  %v4769_v20 = vld [vmem:[%s10569_s1 + $0x1b0] sm:$0xff] }
   0x6   :  { %7021 = vmatpush3.bf16.msra.mxu1 %v8072_v7  ;;  %6951 = vmatprep.subr.bf16.mxu0 %v8074_v8  ;;  %v8104_v17 = vpack.c.bf16 %v4768_v15, %v4767_v14  ;;  %v4770_v21 = vld [vmem:[%s10569_s1 + $0x1b8] sm:$0xff]  ;;  %v8122_v22 = vld [vmem:[%s10568_s0 + $0x1] ss:$2 sm:$0xff]  ;;  %v8126_v23 = vpack.c.bf16 %v4670_v19, %v4669_v18  ;;  %v4673_v31 = vld [vmem:[%s10569_s1 + $0xb0] sm:$0xff] }
   0x7   :  { %7023 = vmatprep.subr.bf16.mxu1 %v8086_v12  ;;  %v8129_v24 = vpack.c.bf16 %v4770_v21, %v4769_v20  ;;  %v4671_v25 = vld [vmem:[%s10569_s1 + $0xa0] sm:$0xff]  ;;  %v4672_v26 = vld [vmem:[%s10569_s1 + $0xa8] sm:$0xff]  ;;  %5836 = vmatprep.mubr.msk.f32.mxu0 %vm127_vm0, %v8122_v22  ;;  %v4674_v32 = vld [vmem:[%s10569_s1 + $0xb8] sm:$0xff] }
   0x8   :  { %v4771_v27 = vld [vmem:[%s10569_s1 + $0x1c0] sm:$0xff]  ;;  %v4772_v28 = vld [vmem:[%s10569_s1 + $0x1c8] sm:$0xff]  ;;  %5980 = vmatprep.mubr.msk.f32.mxu1 %vm127_vm0, %v8122_v22  ;;  %v8150_v29 = vpack.c.bf16 %v4672_v26, %v4671_v25  ;;  %v4773_v33 = vld [vmem:[%s10569_s1 + $0x1d0] sm:$0xff]  ;;  %v8170_v35 = vpack.c.bf16 %v4674_v32, %v4673_v31 }
   0x9   :  { %6953 = vmatpush3.bf16.msra.mxu0 %v8074_v8  ;;  %v8153_v30 = vpack.c.bf16 %v4772_v28, %v4771_v27  ;;  %v4774_v34 = vld [vmem:[%s10569_s1 + $0x1d8] sm:$0xff]  ;;  %v70_v37 = vld [vmem:[%s10569_s1] sm:$0xff]  ;;  %v71_v38 = vld [vmem:[%s10569_s1 + $0x8] sm:$0xff] }
   0xa   :  { %7025 = vmatpush3.bf16.msra.mxu1 %v8086_v12  ;;  %6955 = vmatprep.subr.bf16.mxu0 %v8101_v16  ;;  %v8173_v36 = vpack.c.bf16 %v4774_v34, %v4773_v33  ;;  %v4751_v39 = vld [vmem:[%s10569_s1 + $0x120] sm:$0xff]  ;;  %v4752_v40 = vld [vmem:[%s10569_s1 + $0x128] sm:$0xff]  ;;  %v8190_v41 = vpack.c.bf16 %v71_v38, %v70_v37  ;;  %v72_v43 = vld [vmem:[%s10569_s1 + $0x10] sm:$0xff] }
   0xb   :  { %7027 = vmatprep.subr.bf16.mxu1 %v8104_v17  ;;  %v8193_v42 = vpack.c.bf16 %v4752_v40, %v4751_v39  ;;  %v73_v44 = vld [vmem:[%s10569_s1 + $0x18] sm:$0xff]  ;;  %v4753_v46 = vld [vmem:[%s10569_s1 + $0x130] sm:$0xff]  ;;  %v74_v51 = vld [vmem:[%s10569_s1 + $0x20] sm:$0xff] }
   0xc   :  { %v8205_v45 = vld [vmem:[%s10568_s0 + $0x11] ss:$2 sm:$0xff]  ;;  %v8221_v49 = vpack.c.bf16 %v73_v44, %v72_v43  ;;  %v75_v52 = vld [vmem:[%s10569_s1 + $0x28] sm:$0xff]  ;;  %v4755_v54 = vld [vmem:[%s10569_s1 + $0x140] sm:$0xff] }
   0xd   :  { %6957 = vmatpush3.bf16.msra.mxu0 %v8101_v16  ;;  %v4754_v47 = vld [vmem:[%s10569_s1 + $0x138] sm:$0xff]  ;;  %v8219_v48 = vld [vmem:[%s10568_s0 + $0x29] ss:$2 sm:$0xff]  ;;  %v8258_v57 = vpack.c.bf16 %v75_v52, %v74_v51  ;;  %v78_v4 = vld [vmem:[%s10569_s1 + $0x40] sm:$0xff] }
   0xe   :  { %7029 = vmatpush3.bf16.msra.mxu1 %v8104_v17  ;;  %6959 = vmatprep.subr.bf16.mxu0 %v8126_v23  ;;  %v8225_v50 = vpack.c.bf16 %v4754_v47, %v4753_v46  ;;  %v8239_v53 = vld [vmem:[%s10568_s0 + $0x39] ss:$2 sm:$0xff]  ;;  %v4756_v55 = vld [vmem:[%s10569_s1 + $0x148] sm:$0xff]  ;;  %v76_v59 = vld [vmem:[%s10569_s1 + $0x30] sm:$0xff] }
   0xf   :  { %7031 = vmatprep.subr.bf16.mxu1 %v8129_v24  ;;  %v8254_v56 = vld [vmem:[%s10568_s0 + $0x51] ss:$2 sm:$0xff]  ;;  %v8263_v58 = vpack.c.bf16 %v4756_v55, %v4755_v54  ;;  %v8278_v61 = vld [vmem:[%s10568_s0 + $0x61] ss:$2 sm:$0xff] }
  0x10   :  { %v77_v60 = vld [vmem:[%s10569_s1 + $0x38] sm:$0xff]  ;;  %v4757_v62 = vld [vmem:[%s10569_s1 + $0x150] sm:$0xff]  ;;  %v79_v5 = vld [vmem:[%s10569_s1 + $0x48] sm:$0xff] }
  0x11   :  { %6961 = vmatpush3.bf16.msra.mxu0 %v8126_v23  ;;  %v4758_v63 = vld [vmem:[%s10569_s1 + $0x158] sm:$0xff]  ;;  %v8296_v1 = vpack.c.bf16 %v77_v60, %v76_v59  ;;  %v8316_v6 = vld [vmem:[%s10568_s0 + $0x89] ss:$2 sm:$0xff]  ;;  %v4759_v9 = vld [vmem:[%s10569_s1 + $0x160] sm:$0xff]  ;;  %v8334_v13 = vpack.c.bf16 %v79_v5, %v78_v4 }
  0x12   :  { %7033 = vmatpush3.bf16.msra.mxu1 %v8129_v24  ;;  %6963 = vmatprep.subr.bf16.mxu0 %v8150_v29  ;;  %v8292_v0 = vld [vmem:[%s10568_s0 + $0x79] ss:$2 sm:$0xff]  ;;  %v8301_v2 = vpack.c.bf16 %v4758_v63, %v4757_v62  ;;  %v4760_v10 = vld [vmem:[%s10569_s1 + $0x168] sm:$0xff]  ;;  %v80_v18 = vld [vmem:[%s10569_s1 + $0x50] sm:$0xff] }
  0x13   :  { %7035 = vmatprep.subr.bf16.mxu1 %v8153_v30  ;;  %v8330_v11 = vld [vmem:[%s10568_s0 + $0xa1] ss:$2 sm:$0xff]  ;;  %v8341_v14 = vld [vmem:[%s10568_s0 + $0xb1] ss:$2 sm:$0xff]  ;;  %v8344_v15 = vpack.c.bf16 %v4760_v10, %v4759_v9 }
  0x14   :  { %v81_v19 = vld [vmem:[%s10569_s1 + $0x58] sm:$0xff]  ;;  %v4761_v20 = vld [vmem:[%s10569_s1 + $0x170] sm:$0xff] }
  0x15   :  { %6965 = vmatpush3.bf16.msra.mxu0 %v8150_v29  ;;  %v4762_v21 = vld [vmem:[%s10569_s1 + $0x178] sm:$0xff] }
  0x16   :  { %7037 = vmatpush3.bf16.msra.mxu1 %v8153_v30  ;;  %6967 = vmatprep.subr.bf16.mxu0 %v8170_v35 }
  0x17   :  { %7039 = vmatprep.subr.bf16.mxu1 %v8173_v36 }
  0x19   :  { %6969 = vmatpush3.bf16.msra.mxu0 %v8170_v35 }
  0x1a   :  { %7041 = vmatpush3.bf16.msra.mxu1 %v8173_v36  ;;  %6971 = vmatprep.subr.bf16.mxu0 %v8190_v41 }
  0x1b   :  { %7043 = vmatprep.subr.bf16.mxu1 %v8193_v42 }
  0x1c   :  { %5837 = vmatmul.mubr.msk.f32.vlgmr.msra.gmra.mrb[0].mxu0 %vm127_vm0, %v8205_v45 }
  0x1d   :  { %5981 = vmatmul.mubr.msk.f32.vlgmr.msra.gmra.mrb[0].mxu1 %vm127_vm0, %v8205_v45  ;;  %6973 = vmatpush3.bf16.msra.mxu0 %v8190_v41 }
  0x1e   :  { %5839 = vmatprep.mubr.msk.f32.mxu0 %vm127_vm0, %v8219_v48  ;;  %5983 = vmatprep.mubr.msk.f32.mxu1 %vm127_vm0, %v8219_v48 }
  0x1f   :  { %7045 = vmatpush3.bf16.msra.mxu1 %v8193_v42  ;;  %6975 = vmatprep.subr.bf16.mxu0 %v8221_v49 }
  0x20   :  { %5840 = vmatmul.mubr.msk.f32.gmra.mrb[2].mxu0 %vm127_vm0, %v8239_v53  ;;  %7047 = vmatprep.subr.bf16.mxu1 %v8225_v50 }
  0x21   :  { %5984 = vmatmul.mubr.msk.f32.gmra.mrb[2].mxu1 %vm127_vm0, %v8239_v53  ;;  %5842 = vmatprep.mubr.msk.f32.mxu0 %vm127_vm0, %v8254_v56 }
  0x22   :  { %6977 = vmatpush3.bf16.msra.mxu0 %v8221_v49  ;;  %5986 = vmatprep.mubr.msk.f32.mxu1 %vm127_vm0, %v8254_v56 }
  0x23   :  { %7049 = vmatpush3.bf16.msra.mxu1 %v8225_v50  ;;  %6979 = vmatprep.subr.bf16.mxu0 %v8258_v57 }
  0x24   :  { %5843 = vmatmul.mubr.msk.f32.gmra.mrb[4].mxu0 %vm127_vm0, %v8278_v61  ;;  %7051 = vmatprep.subr.bf16.mxu1 %v8263_v58 }
  0x25   :  { %5987 = vmatmul.mubr.msk.f32.gmra.mrb[4].mxu1 %vm127_vm0, %v8278_v61  ;;  %5845 = vmatprep.mubr.msk.f32.mxu0 %vm127_vm0, %v8292_v0 }
  0x26   :  { %5989 = vmatprep.mubr.msk.f32.mxu1 %vm127_vm0, %v8292_v0  ;;  %6981 = vmatpush3.bf16.msra.mxu0 %v8258_v57 }
  0x27   :  { %7053 = vmatpush3.bf16.msra.mxu1 %v8263_v58  ;;  %6983 = vmatprep.subr.bf16.mxu0 %v8296_v1 }
  0x28   :  { %5846 = vmatmul.mubr.msk.f32.gmra.mrb[6].mxu0 %vm127_vm0, %v8316_v6  ;;  %7055 = vmatprep.subr.bf16.mxu1 %v8301_v2 }
  0x29   :  { %5990 = vmatmul.mubr.msk.f32.gmra.mrb[6].mxu1 %vm127_vm0, %v8316_v6  ;;  %5848 = vmatprep.mubr.msk.f32.mxu0 %vm127_vm0, %v8330_v11 }
  0x2a   :  { %16 = vsyncpa [#allocation5], 0  ;;  %5992 = vmatprep.mubr.msk.f32.mxu1 %vm127_vm0, %v8330_v11  ;;  %6985 = vmatpush3.bf16.msra.mxu0 %v8296_v1  ;;  %v8368_v25 = vld [vmem:[%s10568_s0 + $0xc9] ss:$2 sm:$0xff]  ;;  %v8372_v26 = vpack.c.bf16 %v81_v19, %v80_v18  ;;  %v8377_v27 = vpack.c.bf16 %v4762_v21, %v4761_v20  ;;  %v4723_v28 = vld [vmem:[%s10569_s1 + $0xc0] sm:$0xff]  ;;  %vm3871_vm1 = vcmask 1041409  }
  0x2b   :  { %7057 = vmatpush3.bf16.msra.mxu1 %v8301_v2  ;;  %6987 = vmatprep.subr.bf16.mxu0 %v8334_v13  ;;  %v4724_v31 = vld [vmem:[%s10569_s1 + $0xc8] sm:$0xff]  ;;  %v8392_v32 = vld [vmem:[%s10568_s0 + $0xd9] ss:$2 sm:$0xff]  ;;  %v4725_v47 = vld [vmem:[%s10569_s1 + $0xd0] sm:$0xff]  ;;  %vm3874_vm2 = vcmask 1042434   ;;  %vm3877_vm3 = vcmask 1043459  }
  0x2c   :  { %5849 = vmatmul.mubr.msk.f32.gmra.mrb[8].mxu0 %vm127_vm0, %v8341_v14  ;;  %7059 = vmatprep.subr.bf16.mxu1 %v8344_v15  ;;  %v4807_v33 = vld [vmem:[%s10569_s1 + $0x1e0] sm:$0xff]  ;;  %v4808_v34 = vld [vmem:[%s10569_s1 + $0x1e8] sm:$0xff]  ;;  %v8405_v37 = vld [vmem:[%s10568_s0 + $0xf1] ss:$2 sm:$0xff]  ;;  %v8410_v38 = vpack.c.bf16 %v4724_v31, %v4723_v28  ;;  %vm3880_vm4 = vcmask 1044484   ;;  %vm3883_vm5 = vcmask 1045509  }
  0x2d   :  { %5993 = vmatmul.mubr.msk.f32.gmra.mrb[8].mxu1 %vm127_vm0, %v8341_v14  ;;  %5851 = vmatprep.mubr.msk.f32.mxu0 %vm127_vm0, %v8368_v25  ;;  %v8415_v39 = vpack.c.bf16 %v4808_v34, %v4807_v33  ;;  %v8424_v40 = vld [vmem:[%s10568_s0 + $0x101] ss:$2 sm:$0xff]  ;;  %v39_v46 = vld [vmem:[%s10568_s0] ss:$2 sm:$0xff]  ;;  %v4726_v51 = vld [vmem:[%s10569_s1 + $0xd8] sm:$0xff]  ;;  %vm3886_vm6 = vcmask 1046534  }
  0x2e   :  { %5995 = vmatprep.mubr.msk.f32.mxu1 %vm127_vm0, %v8368_v25  ;;  %6989 = vmatpush3.bf16.msra.mxu0 %v8334_v13  ;;  %v8431_v43 = vld [vmem:[%s10568_s0 + $0x119] ss:$2 sm:$0xff]  ;;  %v8446_v44 = vld [vmem:[%s10568_s0 + $0x129] ss:$2 sm:$0xff]  ;;  %v4632_v52 = vld [vmem:[%s10568_s0 + $0x10] ss:$2 sm:$0xff]  ;;  %v8477_v60 = vpack.c.bf16 %v4726_v51, %v4725_v47 }
  0x2f   :  { %7061 = vmatpush3.bf16.msra.mxu1 %v8344_v15  ;;  %6991 = vmatprep.subr.bf16.mxu0 %v8372_v26  ;;  %v4809_v54 = vld [vmem:[%s10569_s1 + $0x1f0] sm:$0xff]  ;;  %v4810_v55 = vld [vmem:[%s10569_s1 + $0x1f8] sm:$0xff]  ;;  %v4727_v63 = vld [vmem:[%s10569_s1 + $0xe0] sm:$0xff]  ;;  %vm3889_vm7 = vcmask 1047559   ;;  %vm7990_vm8 = vmmov 0   ;;  %vm4444_vm9 = vcmask 523264  }
  0x30   :  { %5852 = vmatmul.mubr.msk.f32.gmra.mrb[10].mxu0 %vm127_vm0, %v8392_v32  ;;  %7063 = vmatprep.subr.bf16.mxu1 %v8377_v27  ;;  %v4633_v59 = vld [vmem:[%s10568_s0 + $0x28] ss:$2 sm:$0xff]  ;;  %v8480_v62 = vpack.c.bf16 %v4810_v55, %v4809_v54  ;;  %v4634_v5 = vld [vmem:[%s10568_s0 + $0x38] ss:$2 sm:$0xff]  ;;  %vm4530_vm10 = vcmask 261120   ;;  %vm4604_vm11 = vcmask 80896  }
  0x31   :  { %5996 = vmatmul.mubr.msk.f32.gmra.mrb[10].mxu1 %vm127_vm0, %v8392_v32  ;;  %5854 = vmatprep.mubr.msk.f32.mxu0 %vm127_vm0, %v8405_v37  ;;  %v4728_v4 = vld [vmem:[%s10569_s1 + $0xe8] sm:$0xff]  ;;  %v4811_v9 = vld [vmem:[%s10569_s1 + $0x200] sm:$0xff]  ;;  %v4635_v18 = vld [vmem:[%s10568_s0 + $0x50] ss:$2 sm:$0xff] }
  0x32   :  { %5998 = vmatprep.mubr.msk.f32.mxu1 %vm127_vm0, %v8405_v37  ;;  %6993 = vmatpush3.bf16.msra.mxu0 %v8372_v26  ;;  %v4812_v10 = vld [vmem:[%s10569_s1 + $0x208] sm:$0xff]  ;;  %v8506_v19 = vpack.c.bf16 %v4728_v4, %v4727_v63  ;;  %v4729_v21 = vld [vmem:[%s10569_s1 + $0xf0] sm:$0xff]  ;;  %v4730_v28 = vld [vmem:[%s10569_s1 + $0xf8] sm:$0xff] }
  0x33   :  { %7065 = vmatpush3.bf16.msra.mxu1 %v8377_v27  ;;  %6995 = vmatprep.subr.bf16.mxu0 %v8410_v38  ;;  %v8510_v20 = vpack.c.bf16 %v4812_v10, %v4811_v9  ;;  %v4636_v31 = vld [vmem:[%s10568_s0 + $0x60] ss:$2 sm:$0xff]  ;;  %v4813_v33 = vld [vmem:[%s10569_s1 + $0x210] sm:$0xff]  ;;  %v4814_v34 = vld [vmem:[%s10569_s1 + $0x218] sm:$0xff]  ;;  %v8536_v47 = vpack.c.bf16 %v4730_v28, %v4729_v21 }
  0x34   :  { %5855 = vmatmul.mubr.msk.f32.gmra.mrb[12].mxu0 %vm127_vm0, %v8424_v40  ;;  %7067 = vmatprep.subr.bf16.mxu1 %v8415_v39  ;;  %v8540_v51 = vpack.c.bf16 %v4814_v34, %v4813_v33  ;;  %v4732_v54 = vld [vmem:[%s10569_s1 + $0x108] sm:$0xff]  ;;  %v4733_v10 = vld [vmem:[%s10569_s1 + $0x110] sm:$0xff] }
  0x35   :  { %5999 = vmatmul.mubr.msk.f32.gmra.mrb[12].mxu1 %vm127_vm0, %v8424_v40  ;;  %5857 = vmatprep.mubr.msk.f32.mxu0 %vm127_vm0, %v8431_v43  ;;  %v4638_v55 = vld [vmem:[%s10568_s0 + $0x88] ss:$2 sm:$0xff] }
  0x36   :  { %6001 = vmatprep.mubr.msk.f32.mxu1 %vm127_vm0, %v8431_v43  ;;  %v4816_v63 = vld [vmem:[%s10569_s1 + $0x228] sm:$0xff]  ;;  %v4640_v21 = vld [vmem:[%s10568_s0 + $0xb0] ss:$2 sm:$0xff] }
  0x37   :  { %v4639_v4 = vld [vmem:[%s10568_s0 + $0xa0] ss:$2 sm:$0xff]  ;;  %v4817_v28 = vld [vmem:[%s10569_s1 + $0x230] sm:$0xff] }
  0x38   :  { %5858 = vmatmul.mubr.msk.f32.gmra.mrb[14].mxu0 %vm127_vm0, %v8446_v44  ;;  %v4641_v33 = vld [vmem:[%s10568_s0 + $0xc8] ss:$2 sm:$0xff] }
  0x39   :  { %6002 = vmatmul.mubr.msk.f32.gmra.mrb[14].mxu1 %vm127_vm0, %v8446_v44  ;;  %5884 = vmatprep.mubr.msk.f32.mxu0 %vm127_vm0, %v39_v46 }
  0x3a   :  { %6028 = vmatprep.mubr.msk.f32.mxu1 %vm127_vm0, %v39_v46  ;;  %v4637_v46 = vld [vmem:[%s10568_s0 + $0x78] ss:$2 sm:$0xff] }
  0x3c   :  { %5885 = vmatmul.mubr.msk.f32.vlgmr.msra.gmra.mrb[0].mxu0 %vm127_vm0, %v4632_v52 }
  0x3d   :  { %6029 = vmatmul.mubr.msk.f32.vlgmr.msra.gmra.mrb[0].mxu1 %vm127_vm0, %v4632_v52  ;;  %6997 = vmatpush3.bf16.msra.mxu0 %v8410_v38  ;;  %v4731_v52 = vld [vmem:[%s10569_s1 + $0x100] sm:$0xff] }
  0x3e   :  { %5887 = vmatprep.mubr.msk.f32.mxu0 %vm127_vm0, %v4633_v59  ;;  %6031 = vmatprep.mubr.msk.f32.mxu1 %vm127_vm0, %v4633_v59  ;;  %v4815_v59 = vld [vmem:[%s10569_s1 + $0x220] sm:$0xff] }
  0x3f   :  { %7069 = vmatpush3.bf16.msra.mxu1 %v8415_v39  ;;  %6999 = vmatprep.subr.bf16.mxu0 %v8477_v60  ;;  %v8570_v9 = vpack.c.bf16 %v4816_v63, %v4815_v59  ;;  %v4645_v59 = vld [vmem:[%s10568_s0 + $0x118] ss:$2 sm:$0xff]  ;;  %v4646_v63 = vld [vmem:[%s10568_s0 + $0x128] ss:$2 sm:$0xff] }
  0x40   :  { %5888 = vmatmul.mubr.msk.f32.gmra.mrb[2].mxu0 %vm127_vm0, %v4634_v5  ;;  %7071 = vmatprep.subr.bf16.mxu1 %v8480_v62 }
  0x41   :  { %6032 = vmatmul.mubr.msk.f32.gmra.mrb[2].mxu1 %vm127_vm0, %v4634_v5  ;;  %5890 = vmatprep.mubr.msk.f32.mxu0 %vm127_vm0, %v4635_v18  ;;  %v8566_v5 = vpack.c.bf16 %v4732_v54, %v4731_v52  ;;  %v4642_v52 = vld [vmem:[%s10568_s0 + $0xd8] ss:$2 sm:$0xff] }
  0x42   :  { %7001 = vmatpush3.bf16.msra.mxu0 %v8477_v60  ;;  %6034 = vmatprep.mubr.msk.f32.mxu1 %vm127_vm0, %v4635_v18  ;;  %v4734_v18 = vld [vmem:[%s10569_s1 + $0x118] sm:$0xff] }
  0x43   :  { %7073 = vmatpush3.bf16.msra.mxu1 %v8480_v62  ;;  %7003 = vmatprep.subr.bf16.mxu0 %v8506_v19  ;;  %v8596_v34 = vpack.c.bf16 %v4734_v18, %v4733_v10  ;;  %v4643_v54 = vld [vmem:[%s10568_s0 + $0xf0] ss:$2 sm:$0xff] }
  0x44   :  { %5891 = vmatmul.mubr.msk.f32.gmra.mrb[4].mxu0 %vm127_vm0, %v4636_v31  ;;  %7075 = vmatprep.subr.bf16.mxu1 %v8510_v20  ;;  %v8648_v10 = vld [vmem:[%s10568_s0 + $0x12] ss:$2 sm:$0xff] }
  0x45   :  { %6035 = vmatmul.mubr.msk.f32.gmra.mrb[4].mxu1 %vm127_vm0, %v4636_v31  ;;  %5893 = vmatprep.mubr.msk.f32.mxu0 %vm127_vm0, %v4637_v46  ;;  %v4818_v31 = vld [vmem:[%s10569_s1 + $0x238] sm:$0xff] }
  0x46   :  { %6037 = vmatprep.mubr.msk.f32.mxu1 %vm127_vm0, %v4637_v46  ;;  %7005 = vmatpush3.bf16.msra.mxu0 %v8506_v19  ;;  %v8600_v46 = vpack.c.bf16 %v4818_v31, %v4817_v28  ;;  %v8655_v18 = vld [vmem:[%s10568_s0 + $0x2a] ss:$2 sm:$0xff] }
  0x47   :  { %7077 = vmatpush3.bf16.msra.mxu1 %v8510_v20  ;;  %7007 = vmatprep.subr.bf16.mxu0 %v8536_v47  ;;  %v8674_v28 = vld [vmem:[%s10568_s0 + $0x52] ss:$2 sm:$0xff]  ;;  %v8776_v31 = vld [vmem:[%s10568_s0 + $0x102] ss:$2 sm:$0xff] }
  0x48   :  { %5894 = vmatmul.mubr.msk.f32.gmra.mrb[6].mxu0 %vm127_vm0, %v4638_v55  ;;  %7079 = vmatprep.subr.bf16.mxu1 %v8540_v51 }
  0x49   :  { %6038 = vmatmul.mubr.msk.f32.gmra.mrb[6].mxu1 %vm127_vm0, %v4638_v55  ;;  %5896 = vmatprep.mubr.msk.f32.mxu0 %vm127_vm0, %v4639_v4  ;;  %v4644_v55 = vld [vmem:[%s10568_s0 + $0x100] ss:$2 sm:$0xff] }
  0x4a   :  { %6040 = vmatprep.mubr.msk.f32.mxu1 %vm127_vm0, %v4639_v4  ;;  %7009 = vmatpush3.bf16.msra.mxu0 %v8536_v47  ;;  %v8639_v4 = vld [vmem:[%s10568_s0 + $0x2] ss:$2 sm:$0xff] }
  0x4b   :  { %7081 = vmatpush3.bf16.msra.mxu1 %v8540_v51  ;;  %7011 = vmatprep.subr.bf16.mxu0 %v8566_v5 }
  0x4c   :  { %5897 = vmatmul.mubr.msk.f32.gmra.mrb[8].mxu0 %vm127_vm0, %v4640_v21  ;;  %7083 = vmatprep.subr.bf16.mxu1 %v8570_v9 }
  0x4d   :  { %6041 = vmatmul.mubr.msk.f32.gmra.mrb[8].mxu1 %vm127_vm0, %v4640_v21  ;;  %5899 = vmatprep.mubr.msk.f32.mxu0 %vm127_vm0, %v4641_v33  ;;  %v8665_v21 = vld [vmem:[%s10568_s0 + $0x3a] ss:$2 sm:$0xff] }
  0x4e   :  { %6043 = vmatprep.mubr.msk.f32.mxu1 %vm127_vm0, %v4641_v33  ;;  %7013 = vmatpush3.bf16.msra.mxu0 %v8566_v5  ;;  %v4956_v33 = vld [vmem:[%s10571_s3 + $0xc0] sm:$0xff] }
  0x4f   :  { %7085 = vmatpush3.bf16.msra.mxu1 %v8570_v9  ;;  %7015 = vmatprep.subr.bf16.mxu0 %v8596_v34 }
  0x50   :  { %5900 = vmatmul.mubr.msk.f32.gmra.mrb[10].mxu0 %vm127_vm0, %v4642_v52  ;;  %7087 = vmatprep.subr.bf16.mxu1 %v8600_v46 }
  0x51   :  { %6044 = vmatmul.mubr.msk.f32.gmra.mrb[10].mxu1 %vm127_vm0, %v4642_v52  ;;  %5902 = vmatprep.mubr.msk.f32.mxu0 %vm127_vm0, %v4643_v54  ;;  %v5004_v52 = vld [vmem:[%s10571_s3 + $0x240] sm:$0xff] }
  0x52   :  { %6046 = vmatprep.mubr.msk.f32.mxu1 %vm127_vm0, %v4643_v54  ;;  %7017 = vmatpush3.bf16.msra.mxu0 %v8596_v34  ;;  %v5005_v54 = vld [vmem:[%s10571_s3 + $0x248] sm:$0xff] }
  0x53   :  { %7089 = vmatpush3.bf16.msra.mxu1 %v8600_v46  ;;  %7091 = vmatprep.subr.bf16.mxu0 %v8061_v3 }
  0x54   :  { %5903 = vmatmul.mubr.msk.f32.gmra.mrb[12].mxu0 %vm127_vm0, %v4644_v55  ;;  %7163 = vmatprep.subr.bf16.mxu1 %v8072_v7 }
  0x55   :  { %6047 = vmatmul.mubr.msk.f32.gmra.mrb[12].mxu1 %vm127_vm0, %v4644_v55  ;;  %5905 = vmatprep.mubr.msk.f32.mxu0 %vm127_vm0, %v4645_v59  ;;  %v9148_v55 = vpack.c.bf16 %v5005_v54, %v5004_v52 }
  0x56   :  { %6049 = vmatprep.mubr.msk.f32.mxu1 %vm127_vm0, %v4645_v59  ;;  %v4958_v59 = vld [vmem:[%s10571_s3 + $0xd0] sm:$0xff] }
  0x58   :  { %5906 = vmatmul.mubr.msk.f32.gmra.mrb[14].mxu0 %vm127_vm0, %v4646_v63 }
  0x59   :  { %6050 = vmatmul.mubr.msk.f32.gmra.mrb[14].mxu1 %vm127_vm0, %v4646_v63  ;;  %5932 = vmatprep.mubr.msk.f32.mxu0 %vm127_vm0, %v8639_v4  ;;  %v4959_v63 = vld [vmem:[%s10571_s3 + $0xd8] sm:$0xff] }
  0x5a   :  { %6076 = vmatprep.mubr.msk.f32.mxu1 %vm127_vm0, %v8639_v4 }
  0x5c   :  { %5933 = vmatmul.mubr.msk.f32.vlgmr.msra.gmra.mrb[0].mxu0 %vm127_vm0, %v8648_v10 }
  0x5d   :  { %6077 = vmatmul.mubr.msk.f32.vlgmr.msra.gmra.mrb[0].mxu1 %vm127_vm0, %v8648_v10  ;;  %7093 = vmatpush3.bf16.msra.mxu0 %v8061_v3  ;;  %v8688_v3 = vld [vmem:[%s10568_s0 + $0x62] ss:$2 sm:$0xff] }
  0x5e   :  { %5935 = vmatprep.mubr.msk.f32.mxu0 %vm127_vm0, %v8655_v18  ;;  %6079 = vmatprep.mubr.msk.f32.mxu1 %vm127_vm0, %v8655_v18 }
  0x5f   :  { %7165 = vmatpush3.bf16.msra.mxu1 %v8072_v7  ;;  %7095 = vmatprep.subr.bf16.mxu0 %v8074_v8  ;;  %v8696_v7 = vld [vmem:[%s10568_s0 + $0x7a] ss:$2 sm:$0xff] }
  0x60   :  { %5936 = vmatmul.mubr.msk.f32.gmra.mrb[2].mxu0 %vm127_vm0, %v8665_v21  ;;  %7167 = vmatprep.subr.bf16.mxu1 %v8086_v12 }
  0x61   :  { %6080 = vmatmul.mubr.msk.f32.gmra.mrb[2].mxu1 %vm127_vm0, %v8665_v21  ;;  %5938 = vmatprep.mubr.msk.f32.mxu0 %vm127_vm0, %v8674_v28 }
  0x62   :  { %6082 = vmatprep.mubr.msk.f32.mxu1 %vm127_vm0, %v8674_v28  ;;  %7097 = vmatpush3.bf16.msra.mxu0 %v8074_v8  ;;  %v8710_v8 = vld [vmem:[%s10568_s0 + $0x8a] ss:$2 sm:$0xff] }
  0x63   :  { %7169 = vmatpush3.bf16.msra.mxu1 %v8086_v12  ;;  %7099 = vmatprep.subr.bf16.mxu0 %v8101_v16  ;;  %v8718_v12 = vld [vmem:[%s10568_s0 + $0xa2] ss:$2 sm:$0xff] }
  0x64   :  { %5939 = vmatmul.mubr.msk.f32.gmra.mrb[4].mxu0 %vm127_vm0, %v8688_v3  ;;  %7171 = vmatprep.subr.bf16.mxu1 %v8104_v17 }
  0x65   :  { %6083 = vmatmul.mubr.msk.f32.gmra.mrb[4].mxu1 %vm127_vm0, %v8688_v3  ;;  %5941 = vmatprep.mubr.msk.f32.mxu0 %vm127_vm0, %v8696_v7 }
  0x66   :  { %6085 = vmatprep.mubr.msk.f32.mxu1 %vm127_vm0, %v8696_v7  ;;  %7101 = vmatpush3.bf16.msra.mxu0 %v8101_v16  ;;  %v8732_v16 = vld [vmem:[%s10568_s0 + $0xb2] ss:$2 sm:$0xff] }
  0x67   :  { %7173 = vmatpush3.bf16.msra.mxu1 %v8104_v17  ;;  %7103 = vmatprep.subr.bf16.mxu0 %v8126_v23  ;;  %v8740_v17 = vld [vmem:[%s10568_s0 + $0xca] ss:$2 sm:$0xff] }
  0x68   :  { %5942 = vmatmul.mubr.msk.f32.gmra.mrb[6].mxu0 %vm127_vm0, %v8710_v8  ;;  %7175 = vmatprep.subr.bf16.mxu1 %v8129_v24 }
  0x69   :  { %6086 = vmatmul.mubr.msk.f32.gmra.mrb[6].mxu1 %vm127_vm0, %v8710_v8  ;;  %5944 = vmatprep.mubr.msk.f32.mxu0 %vm127_vm0, %v8718_v12 }
  0x6a   :  { %6088 = vmatprep.mubr.msk.f32.mxu1 %vm127_vm0, %v8718_v12  ;;  %7105 = vmatpush3.bf16.msra.mxu0 %v8126_v23  ;;  %v8754_v23 = vld [vmem:[%s10568_s0 + $0xda] ss:$2 sm:$0xff] }
  0x6b   :  { %7177 = vmatpush3.bf16.msra.mxu1 %v8129_v24  ;;  %7107 = vmatprep.subr.bf16.mxu0 %v8150_v29  ;;  %v8761_v24 = vld [vmem:[%s10568_s0 + $0xf2] ss:$2 sm:$0xff] }
  0x6c   :  { %5945 = vmatmul.mubr.msk.f32.gmra.mrb[8].mxu0 %vm127_vm0, %v8732_v16  ;;  %7179 = vmatprep.subr.bf16.mxu1 %v8153_v30 }
  0x6d   :  { %6089 = vmatmul.mubr.msk.f32.gmra.mrb[8].mxu1 %vm127_vm0, %v8732_v16  ;;  %5947 = vmatprep.mubr.msk.f32.mxu0 %vm127_vm0, %v8740_v17 }
  0x6e   :  { %6091 = vmatprep.mubr.msk.f32.mxu1 %vm127_vm0, %v8740_v17  ;;  %7109 = vmatpush3.bf16.msra.mxu0 %v8150_v29  ;;  %v8783_v29 = vld [vmem:[%s10568_s0 + $0x11a] ss:$2 sm:$0xff] }
  0x6f   :  { %7181 = vmatpush3.bf16.msra.mxu1 %v8153_v30  ;;  %7111 = vmatprep.subr.bf16.mxu0 %v8170_v35  ;;  %v4722_v30 = vld [vmem:[%s10568_s0 + $0x12a] ss:$2 sm:$0xff] }
  0x70   :  { %5948 = vmatmul.mubr.msk.f32.gmra.mrb[10].mxu0 %vm127_vm0, %v8754_v23  ;;  %7183 = vmatprep.subr.bf16.mxu1 %v8173_v36 }
  0x71   :  { %6092 = vmatmul.mubr.msk.f32.gmra.mrb[10].mxu1 %vm127_vm0, %v8754_v23  ;;  %5950 = vmatprep.mubr.msk.f32.mxu0 %vm127_vm0, %v8761_v24 }
  0x72   :  { %6094 = vmatprep.mubr.msk.f32.mxu1 %vm127_vm0, %v8761_v24  ;;  %7113 = vmatpush3.bf16.msra.mxu0 %v8170_v35  ;;  %v4868_v35 = vld [vmem:[%s10568_s0 + $0x13] ss:$2 sm:$0xff] }
  0x73   :  { %7185 = vmatpush3.bf16.msra.mxu1 %v8173_v36  ;;  %7115 = vmatprep.subr.bf16.mxu0 %v8190_v41  ;;  %v4869_v36 = vld [vmem:[%s10568_s0 + $0x2b] ss:$2 sm:$0xff] }
  0x74   :  { %5951 = vmatmul.mubr.msk.f32.gmra.mrb[12].mxu0 %vm127_vm0, %v8776_v31  ;;  %7187 = vmatprep.subr.bf16.mxu1 %v8193_v42 }
  0x75   :  { %6095 = vmatmul.mubr.msk.f32.gmra.mrb[12].mxu1 %vm127_vm0, %v8776_v31  ;;  %5953 = vmatprep.mubr.msk.f32.mxu0 %vm127_vm0, %v8783_v29 }
  0x76   :  { %6097 = vmatprep.mubr.msk.f32.mxu1 %vm127_vm0, %v8783_v29 }
  0x78   :  { %5954 = vmatmul.mubr.msk.f32.gmra.mrb[14].mxu0 %vm127_vm0, %v4722_v30 }
  0x79   :  { %6098 = vmatmul.mubr.msk.f32.gmra.mrb[14].mxu1 %vm127_vm0, %v4722_v30  ;;  %6124 = vmatprep.mubr.msk.f32.mxu0 %vm127_vm0, %v8639_v4 }
  0x7a   :  { %6268 = vmatprep.mubr.msk.f32.mxu1 %vm127_vm0, %v8639_v4  ;;  %v5006_v4 = vld [vmem:[%s10571_s3 + $0x250] sm:$0xff] }
  0x7c   :  { %6125 = vmatmul.mubr.msk.f32.vlgmr.msra.gmra.mrb[16].mxu0 %vm127_vm0, %v8648_v10 }
  0x7d   :  { %6269 = vmatmul.mubr.msk.f32.vlgmr.msra.gmra.mrb[16].mxu1 %vm127_vm0, %v8648_v10  ;;  %7117 = vmatpush3.bf16.msra.mxu0 %v8190_v41  ;;  %v4870_v41 = vld [vmem:[%s10568_s0 + $0x3b] ss:$2 sm:$0xff]  ;;  %v9163_v10 = vpack.c.bf16 %v4959_v63, %v4958_v59 }
  0x7e   :  { %6127 = vmatprep.mubr.msk.f32.mxu0 %vm127_vm0, %v8655_v18  ;;  %6271 = vmatprep.mubr.msk.f32.mxu1 %vm127_vm0, %v8655_v18  ;;  %v5007_v18 = vld [vmem:[%s10571_s3 + $0x258] sm:$0xff] }
  0x7f   :  { %7189 = vmatpush3.bf16.msra.mxu1 %v8193_v42  ;;  %7119 = vmatprep.subr.bf16.mxu0 %v8221_v49  ;;  %v4871_v42 = vld [vmem:[%s10568_s0 + $0x53] ss:$2 sm:$0xff] }
  0x80   :  { %6128 = vmatmul.mubr.msk.f32.gmra.mrb[18].mxu0 %vm127_vm0, %v8665_v21  ;;  %7191 = vmatprep.subr.bf16.mxu1 %v8225_v50 }
  0x81   :  { %6272 = vmatmul.mubr.msk.f32.gmra.mrb[18].mxu1 %vm127_vm0, %v8665_v21  ;;  %6130 = vmatprep.mubr.msk.f32.mxu0 %vm127_vm0, %v8674_v28  ;;  %v9168_v21 = vpack.c.bf16 %v5007_v18, %v5006_v4 }
  0x82   :  { %7121 = vmatpush3.bf16.msra.mxu0 %v8221_v49  ;;  %6274 = vmatprep.mubr.msk.f32.mxu1 %vm127_vm0, %v8674_v28  ;;  %v4874_v49 = vld [vmem:[%s10568_s0 + $0x8b] ss:$2 sm:$0xff]  ;;  %v4960_v28 = vld [vmem:[%s10571_s3 + $0xe0] sm:$0xff] }
  0x83   :  { %7193 = vmatpush3.bf16.msra.mxu1 %v8225_v50  ;;  %7123 = vmatprep.subr.bf16.mxu0 %v8258_v57  ;;  %v4875_v50 = vld [vmem:[%s10568_s0 + $0xa3] ss:$2 sm:$0xff] }
  0x84   :  { %6131 = vmatmul.mubr.msk.f32.gmra.mrb[20].mxu0 %vm127_vm0, %v8688_v3  ;;  %7195 = vmatprep.subr.bf16.mxu1 %v8263_v58 }
  0x85   :  { %6275 = vmatmul.mubr.msk.f32.gmra.mrb[20].mxu1 %vm127_vm0, %v8688_v3  ;;  %6133 = vmatprep.mubr.msk.f32.mxu0 %vm127_vm0, %v8696_v7  ;;  %v4961_v3 = vld [vmem:[%s10571_s3 + $0xe8] sm:$0xff] }
  0x86   :  { %6277 = vmatprep.mubr.msk.f32.mxu1 %vm127_vm0, %v8696_v7  ;;  %7125 = vmatpush3.bf16.msra.mxu0 %v8258_v57  ;;  %v4878_v57 = vld [vmem:[%s10568_s0 + $0xdb] ss:$2 sm:$0xff] }
  0x87   :  { %7197 = vmatpush3.bf16.msra.mxu1 %v8263_v58  ;;  %7127 = vmatprep.subr.bf16.mxu0 %v8296_v1  ;;  %v4879_v58 = vld [vmem:[%s10568_s0 + $0xf3] ss:$2 sm:$0xff] }
  0x88   :  { %6134 = vmatmul.mubr.msk.f32.gmra.mrb[22].mxu0 %vm127_vm0, %v8710_v8  ;;  %7199 = vmatprep.subr.bf16.mxu1 %v8301_v2  ;;  %v5008_v7 = vld [vmem:[%s10571_s3 + $0x260] sm:$0xff] }
  0x89   :  { %6278 = vmatmul.mubr.msk.f32.gmra.mrb[22].mxu1 %vm127_vm0, %v8710_v8  ;;  %6136 = vmatprep.mubr.msk.f32.mxu0 %vm127_vm0, %v8718_v12  ;;  %v10580_v8 = vmov 0.0  }
  0x8a   :  { %6280 = vmatprep.mubr.msk.f32.mxu1 %vm127_vm0, %v8718_v12  ;;  %7129 = vmatpush3.bf16.msra.mxu0 %v8296_v1  ;;  %v4996_v1 = vld [vmem:[%s10571_s3 + $0x200] sm:$0xff]  ;;  %2327 = vst [vmem:[#allocation2] sm:$0x1] %v10580_v8  ;;  %2328 = vst [vmem:[#allocation2 + $0x18] sm:$0x1] %v10580_v8  ;;  %v9199_v12 = vpack.c.bf16 %v4961_v3, %v4960_v28 }
  0x8b   :  { %7201 = vmatpush3.bf16.msra.mxu1 %v8301_v2  ;;  %7131 = vmatprep.subr.bf16.mxu0 %v8334_v13  ;;  %2329 = vst [vmem:[#allocation2 + $0x30] sm:$0x1] %v10580_v8  ;;  %2330 = vst [vmem:[#allocation2 + $0x48] sm:$0x1] %v10580_v8 }
  0x8c   :  { %6137 = vmatmul.mubr.msk.f32.gmra.mrb[24].mxu0 %vm127_vm0, %v8732_v16  ;;  %7203 = vmatprep.subr.bf16.mxu1 %v8344_v15  ;;  %2331 = vst [vmem:[#allocation2 + $0x60] sm:$0x1] %v10580_v8  ;;  %2332 = vst [vmem:[#allocation2 + $0x78] sm:$0x1] %v10580_v8 }
  0x8d   :  { %6281 = vmatmul.mubr.msk.f32.gmra.mrb[24].mxu1 %vm127_vm0, %v8732_v16  ;;  %6139 = vmatprep.mubr.msk.f32.mxu0 %vm127_vm0, %v8740_v17  ;;  %2333 = vst [vmem:[#allocation2 + $0x90] sm:$0x1] %v10580_v8  ;;  %2334 = vst [vmem:[#allocation2 + $0xa8] sm:$0x1] %v10580_v8  ;;  %v5009_v16 = vld [vmem:[%s10571_s3 + $0x268] sm:$0xff] }
  0x8e   :  { %6283 = vmatprep.mubr.msk.f32.mxu1 %vm127_vm0, %v8740_v17  ;;  %7133 = vmatpush3.bf16.msra.mxu0 %v8334_v13  ;;  %v4951_v13 = vld [vmem:[%s10571_s3 + $0x98] sm:$0xff]  ;;  %2335 = vst [vmem:[#allocation2 + $0x11] sm:$0x1] %v10580_v8  ;;  %2336 = vst [vmem:[#allocation2 + $0x29] sm:$0x1] %v10580_v8  ;;  %v9204_v17 = vpack.c.bf16 %v5009_v16, %v5008_v7 }
  0x8f   :  { %7205 = vmatpush3.bf16.msra.mxu1 %v8344_v15  ;;  %7135 = vmatprep.subr.bf16.mxu0 %v8372_v26  ;;  %v4998_v15 = vld [vmem:[%s10571_s3 + $0x210] sm:$0xff]  ;;  %2337 = vst [vmem:[#allocation2 + $0x41] sm:$0x1] %v10580_v8  ;;  %2338 = vst [vmem:[#allocation2 + $0x59] sm:$0x1] %v10580_v8 }
  0x90   :  { %6140 = vmatmul.mubr.msk.f32.gmra.mrb[26].mxu0 %vm127_vm0, %v8754_v23  ;;  %7207 = vmatprep.subr.bf16.mxu1 %v8377_v27  ;;  %2339 = vst [vmem:[#allocation2 + $0x71] sm:$0x1] %v10580_v8  ;;  %2340 = vst [vmem:[#allocation2 + $0x89] sm:$0x1] %v10580_v8 }
  0x91   :  { %6284 = vmatmul.mubr.msk.f32.gmra.mrb[26].mxu1 %vm127_vm0, %v8754_v23  ;;  %6142 = vmatprep.mubr.msk.f32.mxu0 %vm127_vm0, %v8761_v24  ;;  %2341 = vst [vmem:[#allocation2 + $0xa1] sm:$0x1] %v10580_v8  ;;  %2342 = vst [vmem:[#allocation2 + $0xb9] sm:$0x1] %v10580_v8  ;;  %v4962_v23 = vld [vmem:[%s10571_s3 + $0xf0] sm:$0xff] }
  0x92   :  { %6286 = vmatprep.mubr.msk.f32.mxu1 %vm127_vm0, %v8761_v24  ;;  %7137 = vmatpush3.bf16.msra.mxu0 %v8372_v26  ;;  %v4880_v26 = vld [vmem:[%s10568_s0 + $0x103] ss:$2 sm:$0xff]  ;;  %v4963_v24 = vld [vmem:[%s10571_s3 + $0xf8] sm:$0xff] }
  0x93   :  { %7209 = vmatpush3.bf16.msra.mxu1 %v8377_v27  ;;  %7139 = vmatprep.subr.bf16.mxu0 %v8410_v38  ;;  %v4881_v27 = vld [vmem:[%s10568_s0 + $0x11b] ss:$2 sm:$0xff] }
  0x94   :  { %6143 = vmatmul.mubr.msk.f32.gmra.mrb[28].mxu0 %vm127_vm0, %v8776_v31  ;;  %7211 = vmatprep.subr.bf16.mxu1 %v8415_v39 }
  0x95   :  { %6287 = vmatmul.mubr.msk.f32.gmra.mrb[28].mxu1 %vm127_vm0, %v8776_v31  ;;  %6145 = vmatprep.mubr.msk.f32.mxu0 %vm127_vm0, %v8783_v29  ;;  %v5010_v31 = vld [vmem:[%s10571_s3 + $0x270] sm:$0xff] }
  0x96   :  { %6289 = vmatprep.mubr.msk.f32.mxu1 %vm127_vm0, %v8783_v29  ;;  %v9219_v29 = vpack.c.bf16 %v4963_v24, %v4962_v23 }
  0x98   :  { %6146 = vmatmul.mubr.msk.f32.gmra.mrb[30].mxu0 %vm127_vm0, %v4722_v30 }
  0x99   :  { %6290 = vmatmul.mubr.msk.f32.gmra.mrb[30].mxu1 %vm127_vm0, %v4722_v30  ;;  %6172 = vmatprep.mubr.msk.f32.mxu0 %vm127_vm0, %v8122_v22  ;;  %v5011_v30 = vld [vmem:[%s10571_s3 + $0x278] sm:$0xff] }
  0x9a   :  { %6316 = vmatprep.mubr.msk.f32.mxu1 %vm127_vm0, %v8122_v22  ;;  %v4867_v22 = vld [vmem:[%s10568_s0 + $0x3] ss:$2 sm:$0xff] }
  0x9c   :  { %6173 = vmatmul.mubr.msk.f32.vlgmr.msra.gmra.mrb[16].mxu0 %vm127_vm0, %v8205_v45 }
  0x9d   :  { %6317 = vmatmul.mubr.msk.f32.vlgmr.msra.gmra.mrb[16].mxu1 %vm127_vm0, %v8205_v45  ;;  %7141 = vmatpush3.bf16.msra.mxu0 %v8410_v38  ;;  %v4872_v45 = vld [vmem:[%s10568_s0 + $0x63] ss:$2 sm:$0xff] }
  0x9e   :  { %6175 = vmatprep.mubr.msk.f32.mxu0 %vm127_vm0, %v8219_v48  ;;  %6319 = vmatprep.mubr.msk.f32.mxu1 %vm127_vm0, %v8219_v48  ;;  %v4873_v48 = vld [vmem:[%s10568_s0 + $0x7b] ss:$2 sm:$0xff] }
  0x9f   :  { %7213 = vmatpush3.bf16.msra.mxu1 %v8415_v39  ;;  %7143 = vmatprep.subr.bf16.mxu0 %v8477_v60  ;;  %v4953_v38 = vld [vmem:[%s10571_s3 + $0xa8] sm:$0xff] }
  0xa0   :  { %6176 = vmatmul.mubr.msk.f32.gmra.mrb[18].mxu0 %vm127_vm0, %v8239_v53  ;;  %7215 = vmatprep.subr.bf16.mxu1 %v8480_v62 }
  0xa1   :  { %6320 = vmatmul.mubr.msk.f32.gmra.mrb[18].mxu1 %vm127_vm0, %v8239_v53  ;;  %6178 = vmatprep.mubr.msk.f32.mxu0 %vm127_vm0, %v8254_v56  ;;  %v4876_v53 = vld [vmem:[%s10568_s0 + $0xb3] ss:$2 sm:$0xff] }
  0xa2   :  { %7145 = vmatpush3.bf16.msra.mxu0 %v8477_v60  ;;  %6322 = vmatprep.mubr.msk.f32.mxu1 %vm127_vm0, %v8254_v56  ;;  %v4877_v56 = vld [vmem:[%s10568_s0 + $0xcb] ss:$2 sm:$0xff] }
  0xa3   :  { %7217 = vmatpush3.bf16.msra.mxu1 %v8480_v62  ;;  %7147 = vmatprep.subr.bf16.mxu0 %v8506_v19 }
  0xa4   :  { %6179 = vmatmul.mubr.msk.f32.gmra.mrb[20].mxu0 %vm127_vm0, %v8278_v61  ;;  %7219 = vmatprep.subr.bf16.mxu1 %v8510_v20 }
  0xa5   :  { %6323 = vmatmul.mubr.msk.f32.gmra.mrb[20].mxu1 %vm127_vm0, %v8278_v61  ;;  %6181 = vmatprep.mubr.msk.f32.mxu0 %vm127_vm0, %v8292_v0  ;;  %v4948_v61 = vld [vmem:[%s10571_s3 + $0x80] sm:$0xff] }
  0xa6   :  { %6325 = vmatprep.mubr.msk.f32.mxu1 %vm127_vm0, %v8292_v0  ;;  %7149 = vmatpush3.bf16.msra.mxu0 %v8506_v19  ;;  %v4949_v0 = vld [vmem:[%s10571_s3 + $0x88] sm:$0xff]  ;;  %v4954_v19 = vld [vmem:[%s10571_s3 + $0xb0] sm:$0xff] }
  0xa7   :  { %7221 = vmatpush3.bf16.msra.mxu1 %v8510_v20  ;;  %7151 = vmatprep.subr.bf16.mxu0 %v8536_v47  ;;  %v9044_v2 = vpack.c.bf16 %v4949_v0, %v4948_v61  ;;  %v4955_v20 = vld [vmem:[%s10571_s3 + $0xb8] sm:$0xff] }
  0xa8   :  { %6182 = vmatmul.mubr.msk.f32.gmra.mrb[22].mxu0 %vm127_vm0, %v8316_v6  ;;  %7223 = vmatprep.subr.bf16.mxu1 %v8540_v51 }
  0xa9   :  { %6326 = vmatmul.mubr.msk.f32.gmra.mrb[22].mxu1 %vm127_vm0, %v8316_v6  ;;  %6184 = vmatprep.mubr.msk.f32.mxu0 %vm127_vm0, %v8330_v11  ;;  %v4997_v6 = vld [vmem:[%s10571_s3 + $0x208] sm:$0xff] }
  0xaa   :  { %6328 = vmatprep.mubr.msk.f32.mxu1 %vm127_vm0, %v8330_v11  ;;  %7153 = vmatpush3.bf16.msra.mxu0 %v8536_v47  ;;  %v4950_v11 = vld [vmem:[%s10571_s3 + $0x90] sm:$0xff] }
  0xab   :  { %7225 = vmatpush3.bf16.msra.mxu1 %v8540_v51  ;;  %7155 = vmatprep.subr.bf16.mxu0 %v8566_v5  ;;  %v5002_v47 = vld [vmem:[%s10571_s3 + $0x230] sm:$0xff]  ;;  %v9123_v51 = vpack.c.bf16 %v4955_v20, %v4954_v19 }
  0xac   :  { %6185 = vmatmul.mubr.msk.f32.gmra.mrb[24].mxu0 %vm127_vm0, %v8341_v14  ;;  %7227 = vmatprep.subr.bf16.mxu1 %v8570_v9 }
  0xad   :  { %6329 = vmatmul.mubr.msk.f32.gmra.mrb[24].mxu1 %vm127_vm0, %v8341_v14  ;;  %6187 = vmatprep.mubr.msk.f32.mxu0 %vm127_vm0, %v8368_v25  ;;  %v9056_v14 = vpack.c.bf16 %v4997_v6, %v4996_v1 }
  0xae   :  { %6331 = vmatprep.mubr.msk.f32.mxu1 %vm127_vm0, %v8368_v25  ;;  %7157 = vmatpush3.bf16.msra.mxu0 %v8566_v5  ;;  %v4999_v25 = vld [vmem:[%s10571_s3 + $0x218] sm:$0xff] }
  0xaf   :  { %7229 = vmatpush3.bf16.msra.mxu1 %v8570_v9  ;;  %7159 = vmatprep.subr.bf16.mxu0 %v8596_v34  ;;  %v9084_v39 = vpack.c.bf16 %v4999_v25, %v4998_v15  ;;  %v5003_v5 = vld [vmem:[%s10571_s3 + $0x238] sm:$0xff] }
  0xb0   :  { %6188 = vmatmul.mubr.msk.f32.gmra.mrb[26].mxu0 %vm127_vm0, %v8392_v32  ;;  %7231 = vmatprep.subr.bf16.mxu1 %v8600_v46  ;;  %v9128_v9 = vpack.c.bf16 %v5003_v5, %v5002_v47 }
  0xb1   :  { %6332 = vmatmul.mubr.msk.f32.gmra.mrb[26].mxu1 %vm127_vm0, %v8392_v32  ;;  %6190 = vmatprep.mubr.msk.f32.mxu0 %vm127_vm0, %v8405_v37  ;;  %v9074_v32 = vpack.c.bf16 %v4951_v13, %v4950_v11 }
  0xb2   :  { %6334 = vmatprep.mubr.msk.f32.mxu1 %vm127_vm0, %v8405_v37  ;;  %7161 = vmatpush3.bf16.msra.mxu0 %v8596_v34  ;;  %v4952_v37 = vld [vmem:[%s10571_s3 + $0xa0] sm:$0xff]  ;;  %v4957_v34 = vld [vmem:[%s10571_s3 + $0xc8] sm:$0xff] }
  0xb3   :  { %7233 = vmatpush3.bf16.msra.mxu1 %v8600_v46  ;;  %7235 = vmatprep.subr.bf16.mxu0 %v9044_v2  ;;  %v9099_v60 = vpack.c.bf16 %v4953_v38, %v4952_v37  ;;  %v9140_v46 = vpack.c.bf16 %v4957_v34, %v4956_v33 }
  0xb4   :  { %6191 = vmatmul.mubr.msk.f32.gmra.mrb[28].mxu0 %vm127_vm0, %v8424_v40  ;;  %7331 = vmatprep.subr.bf16.mxu1 %v9056_v14 }
  0xb5   :  { %6335 = vmatmul.mubr.msk.f32.gmra.mrb[28].mxu1 %vm127_vm0, %v8424_v40  ;;  %6193 = vmatprep.mubr.msk.f32.mxu0 %vm127_vm0, %v8431_v43  ;;  %v5000_v40 = vld [vmem:[%s10571_s3 + $0x220] sm:$0xff] }
  0xb6   :  { %6337 = vmatprep.mubr.msk.f32.mxu1 %vm127_vm0, %v8431_v43  ;;  %v5001_v43 = vld [vmem:[%s10571_s3 + $0x228] sm:$0xff] }
  0xb7   :  { %v9103_v62 = vpack.c.bf16 %v5001_v43, %v5000_v40 }
  0xb8   :  { %6194 = vmatmul.mubr.msk.f32.gmra.mrb[30].mxu0 %vm127_vm0, %v8446_v44 }
  0xb9   :  { %6338 = vmatmul.mubr.msk.f32.gmra.mrb[30].mxu1 %vm127_vm0, %v8446_v44  ;;  %6220 = vmatprep.mubr.msk.f32.mxu0 %vm127_vm0, %v4867_v22  ;;  %v4882_v44 = vld [vmem:[%s10568_s0 + $0x12b] ss:$2 sm:$0xff] }
  0xba   :  { %6364 = vmatprep.mubr.msk.f32.mxu1 %vm127_vm0, %v4867_v22  ;;  %v9224_v22 = vpack.c.bf16 %v5011_v30, %v5010_v31 }
  0xbc   :  { %6221 = vmatmul.mubr.msk.f32.vlgmr.msra.gmra.mrb[16].mxu0 %vm127_vm0, %v4868_v35 }
  0xbd   :  { %6365 = vmatmul.mubr.msk.f32.vlgmr.msra.gmra.mrb[16].mxu1 %vm127_vm0, %v4868_v35  ;;  %6223 = vmatprep.mubr.msk.f32.mxu0 %vm127_vm0, %v4869_v36  ;;  %v2374_v35 = vld [vmem:[%s10571_s3] sm:$0xff] }
  0xbe   :  { %6367 = vmatprep.mubr.msk.f32.mxu1 %vm127_vm0, %v4869_v36  ;;  %7237 = vmatpush3.bf16.msra.mxu0 %v9044_v2  ;;  %v2375_v36 = vld [vmem:[%s10571_s3 + $0x8] sm:$0xff] }
  0xbf   :  { %7333 = vmatpush3.bf16.msra.mxu1 %v9056_v14  ;;  %7239 = vmatprep.subr.bf16.mxu0 %v9074_v32 }
  0xc0   :  { %6224 = vmatmul.mubr.msk.f32.gmra.mrb[18].mxu0 %vm127_vm0, %v4870_v41  ;;  %7335 = vmatprep.subr.bf16.mxu1 %v9084_v39 }
  0xc1   :  { %6368 = vmatmul.mubr.msk.f32.gmra.mrb[18].mxu1 %vm127_vm0, %v4870_v41  ;;  %6226 = vmatprep.mubr.msk.f32.mxu0 %vm127_vm0, %v4871_v42  ;;  %v4980_v41 = vld [vmem:[%s10571_s3 + $0x180] sm:$0xff] }
  0xc2   :  { %6370 = vmatprep.mubr.msk.f32.mxu1 %vm127_vm0, %v4871_v42  ;;  %7241 = vmatpush3.bf16.msra.mxu0 %v9074_v32  ;;  %v9239_v42 = vpack.c.bf16 %v2375_v36, %v2374_v35 }
  0xc3   :  { %7337 = vmatpush3.bf16.msra.mxu1 %v9084_v39  ;;  %7243 = vmatprep.subr.bf16.mxu0 %v9099_v60 }
  0xc4   :  { %6227 = vmatmul.mubr.msk.f32.gmra.mrb[20].mxu0 %vm127_vm0, %v4872_v45  ;;  %7339 = vmatprep.subr.bf16.mxu1 %v9103_v62 }
  0xc5   :  { %6371 = vmatmul.mubr.msk.f32.gmra.mrb[20].mxu1 %vm127_vm0, %v4872_v45  ;;  %6229 = vmatprep.mubr.msk.f32.mxu0 %vm127_vm0, %v4873_v48  ;;  %v4981_v45 = vld [vmem:[%s10571_s3 + $0x188] sm:$0xff] }
  0xc6   :  { %6373 = vmatprep.mubr.msk.f32.mxu1 %vm127_vm0, %v4873_v48  ;;  %7245 = vmatpush3.bf16.msra.mxu0 %v9099_v60  ;;  %v9244_v48 = vpack.c.bf16 %v4981_v45, %v4980_v41 }
  0xc7   :  { %7341 = vmatpush3.bf16.msra.mxu1 %v9103_v62  ;;  %7247 = vmatprep.subr.bf16.mxu0 %v9123_v51 }
  0xc8   :  { %6230 = vmatmul.mubr.msk.f32.gmra.mrb[22].mxu0 %vm127_vm0, %v4874_v49  ;;  %7343 = vmatprep.subr.bf16.mxu1 %v9128_v9 }
  0xc9   :  { %6374 = vmatmul.mubr.msk.f32.gmra.mrb[22].mxu1 %vm127_vm0, %v4874_v49  ;;  %6232 = vmatprep.mubr.msk.f32.mxu0 %vm127_vm0, %v4875_v50 }
  0xca   :  { %6376 = vmatprep.mubr.msk.f32.mxu1 %vm127_vm0, %v4875_v50  ;;  %7249 = vmatpush3.bf16.msra.mxu0 %v9123_v51 }
  0xcb   :  { %7345 = vmatpush3.bf16.msra.mxu1 %v9128_v9  ;;  %7251 = vmatprep.subr.bf16.mxu0 %v9140_v46 }
  0xcc   :  { %6233 = vmatmul.mubr.msk.f32.gmra.mrb[24].mxu0 %vm127_vm0, %v4876_v53  ;;  %7347 = vmatprep.subr.bf16.mxu1 %v9148_v55 }
  0xcd   :  { %6377 = vmatmul.mubr.msk.f32.gmra.mrb[24].mxu1 %vm127_vm0, %v4876_v53  ;;  %6235 = vmatprep.mubr.msk.f32.mxu0 %vm127_vm0, %v4877_v56 }
  0xce   :  { %6379 = vmatprep.mubr.msk.f32.mxu1 %vm127_vm0, %v4877_v56  ;;  %7253 = vmatpush3.bf16.msra.mxu0 %v9140_v46 }
  0xcf   :  { %7349 = vmatpush3.bf16.msra.mxu1 %v9148_v55  ;;  %7255 = vmatprep.subr.bf16.mxu0 %v9163_v10 }
  0xd0   :  { %6236 = vmatmul.mubr.msk.f32.gmra.mrb[26].mxu0 %vm127_vm0, %v4878_v57  ;;  %7351 = vmatprep.subr.bf16.mxu1 %v9168_v21 }
  0xd1   :  { %6380 = vmatmul.mubr.msk.f32.gmra.mrb[26].mxu1 %vm127_vm0, %v4878_v57  ;;  %6238 = vmatprep.mubr.msk.f32.mxu0 %vm127_vm0, %v4879_v58 }
  0xd2   :  { %6382 = vmatprep.mubr.msk.f32.mxu1 %vm127_vm0, %v4879_v58  ;;  %7257 = vmatpush3.bf16.msra.mxu0 %v9163_v10 }
  0xd3   :  { %7353 = vmatpush3.bf16.msra.mxu1 %v9168_v21  ;;  %7259 = vmatprep.subr.bf16.mxu0 %v9199_v12 }
  0xd4   :  { %6239 = vmatmul.mubr.msk.f32.gmra.mrb[28].mxu0 %vm127_vm0, %v4880_v26  ;;  %7355 = vmatprep.subr.bf16.mxu1 %v9204_v17 }
  0xd5   :  { %6383 = vmatmul.mubr.msk.f32.gmra.mrb[28].mxu1 %vm127_vm0, %v4880_v26  ;;  %6241 = vmatprep.mubr.msk.f32.mxu0 %vm127_vm0, %v4881_v27 }
  0xd6   :  { %6385 = vmatprep.mubr.msk.f32.mxu1 %vm127_vm0, %v4881_v27  ;;  %7261 = vmatpush3.bf16.msra.mxu0 %v9199_v12 }
  0xd7   :  { %7357 = vmatpush3.bf16.msra.mxu1 %v9204_v17  ;;  %7263 = vmatprep.subr.bf16.mxu0 %v9219_v29 }
  0xd8   :  { %6242 = vmatmul.mubr.msk.f32.gmra.mrb[30].mxu0 %vm127_vm0, %v4882_v44  ;;  %7359 = vmatprep.subr.bf16.mxu1 %v9224_v22 }
  0xd9   :  { %6386 = vmatmul.mubr.msk.f32.gmra.mrb[30].mxu1 %vm127_vm0, %v4882_v44 }
  0xda   :  { %7265 = vmatpush3.bf16.msra.mxu0 %v9219_v29 }
  0xdb   :  { %7361 = vmatpush3.bf16.msra.mxu1 %v9224_v22  ;;  %7267 = vmatprep.subr.bf16.mxu0 %v9239_v42 }
  0xdc   :  { %7363 = vmatprep.subr.bf16.mxu1 %v9244_v48 }
 0x12f   :  { %v5934_v49 = vpop.f32.mrb[0].mxu0 }
 0x130   :  { %v6078_v50 = vpop.f32.mrb[0].mxu1  ;;  %v673_v53 = vpop.f32.mrb[1].mxu0 }
 0x131   :  { %v1259_v56 = vmax.f32 %v5934_v49, %v6078_v50  ;;  %v1163_v57 = vpop.f32.mrb[1].mxu1 }
 0x132   :  { %v1258_v58 = vmax.f32 %v673_v53, %v1163_v57 }
 0x133   :  { %v5937_v61 = vpop.f32.mrb[2].mxu0 }
 0x134   :  { %v6081_v0 = vpop.f32.mrb[2].mxu1  ;;  %v683_v1 = vpop.f32.mrb[3].mxu0 }
 0x135   :  { %v1261_v6 = vmax.f32 %v5937_v61, %v6081_v0  ;;  %v1173_v11 = vpop.f32.mrb[3].mxu1 }
 0x136   :  { %v1260_v13 = vmax.f32 %v683_v1, %v1173_v11  ;;  %v9314_v11 = vld [vmem:[%s10570_s2] ss:$0 sm:$0xff] }
 0x137   :  { %v5940_v15 = vpop.f32.mrb[4].mxu0 }
 0x138   :  { %v6084_v25 = vpop.f32.mrb[4].mxu1  ;;  %v9248_v26 = vpop.f32.mrb[5].mxu0 }
 0x139   :  { %v1263_v27 = vmax.f32 %v5940_v15, %v6084_v25  ;;  %v1183_v37 = vpop.f32.mrb[5].mxu1 }
 0x13a   :  { %v1262_v38 = vmax.f32 %v9248_v26, %v1183_v37 }
 0x13b   :  { %v9251_v40 = vpop.f32.mrb[6].mxu0 }
 0x13c   :  { %v9253_v43 = vpop.f32.mrb[6].mxu1  ;;  %v9255_v44 = vpop.f32.mrb[7].mxu0 }
 0x13d   :  { %v9259_v20 = vpop.f32.mrb[7].mxu1 }
 0x13f   :  { %v9263_v5 = vpop.f32.mrb[8].mxu0 }
 0x140   :  { %v9265_v33 = vpop.f32.mrb[8].mxu1  ;;  %v9267_v34 = vpop.f32.mrb[9].mxu0 }
 0x141   :  { %v9271_v54 = vpop.f32.mrb[9].mxu1 }
 0x143   :  { %v9275_v63 = vpop.f32.mrb[10].mxu0 }
 0x144   :  { %v9277_v4 = vpop.f32.mrb[10].mxu1  ;;  %v9279_v18 = vpop.f32.mrb[11].mxu0 }
 0x145   :  { %v9283_v3 = vpop.f32.mrb[11].mxu1 }
 0x147   :  { %v9287_v16 = vpop.f32.mrb[12].mxu0 }
 0x148   :  { %v9289_v23 = vpop.f32.mrb[12].mxu1  ;;  %v9291_v24 = vpop.f32.mrb[13].mxu0 }
 0x149   :  { %v9295_v30 = vpop.f32.mrb[13].mxu1 }
 0x14b   :  { %v9299_v36 = vpop.f32.mrb[14].mxu0 }
 0x14c   :  { %v9301_v41 = vpop.f32.mrb[14].mxu1  ;;  %v9303_v45 = vpop.f32.mrb[15].mxu0 }
 0x14d   :  { %v9307_v50 = vpop.f32.mrb[15].mxu1 }
 0x18f   :  { %v6222_v57 = vpop.f32.mrb[16].mxu0 }
 0x190   :  { %v1806_v61 = vmax.f32 %v1259_v56, %v6222_v57  ;;  %v6366_v0 = vpop.f32.mrb[16].mxu1  ;;  %v1710_v1 = vpop.f32.mrb[17].mxu0 }
 0x191   :  { %v1805_v15 = vmax.f32 %v1258_v58, %v1710_v1  ;;  %v2177_v25 = vpop.f32.mrb[17].mxu1 }
 0x192   :  { %v2273_v26 = vmax.f32 %v1806_v61, %v6366_v0 }
 0x193   :  { %v2272_v37 = vmax.f32 %v1805_v15, %v2177_v25  ;;  %v6225_v8 = vpop.f32.mrb[18].mxu0 }
 0x194   :  { %v2296_v49 = vadd.f32 %v9314_v11, %v2273_v26  ;;  %v1808_v35 = vmax.f32 %v1261_v6, %v6225_v8  ;;  %v6369_v31 = vpop.f32.mrb[18].mxu1  ;;  %v1720_v7 = vpop.f32.mrb[19].mxu0 }
 0x195   :  { %v2295_v53 = vadd.f32 %v9314_v11, %v2272_v37  ;;  %v1807_v56 = vmax.f32 %v1260_v13, %v1720_v7  ;;  %v2187_v57 = vpop.f32.mrb[19].mxu1 }
 0x196   :  { %v2312_v28 = vmax.f32 %v2296_v49, 0.0  ;;  %v2275_v59 = vmax.f32 %v1808_v35, %v6369_v31 }
 0x197   :  { %v2311_v52 = vmax.f32 %v2295_v53, 0.0  ;;  %v2274_v47 = vmax.f32 %v1807_v56, %v2187_v57  ;;  %v6228_v19 = vpop.f32.mrb[20].mxu0 }
 0x198   :  { %2344 = vst [vmem:[#allocation2 + $0x9] sm:$0xff] %v2312_v28  ;;  %v2298_v58 = vadd.f32 %v9314_v11, %v2275_v59  ;;  %v1810_v61 = vmax.f32 %v1263_v27, %v6228_v19  ;;  %v6372_v0 = vpop.f32.mrb[20].mxu1  ;;  %v1730_v1 = vpop.f32.mrb[21].mxu0  ;;  %v10582_v28 = vmax.f32 %v9251_v40, %v9253_v43  ;;  %v2376_v40 = vld [vmem:[%s10571_s3 + $0x10] sm:$0xff]  ;;  %v2377_v43 = vld [vmem:[%s10571_s3 + $0x18] sm:$0xff] }
 0x199   :  { %2343 = vst [vmem:[#allocation2 + $0x1] sm:$0xff] %v2311_v52  ;;  %v2297_v8 = vadd.f32 %v9314_v11, %v2274_v47  ;;  %v1809_v6 = vmax.f32 %v1262_v38, %v1730_v1  ;;  %v2197_v15 = vpop.f32.mrb[21].mxu1  ;;  %v10583_v38 = vmax.f32 %v9255_v44, %v9259_v20  ;;  %v10584_v44 = vmax.f32 %v9263_v5, %v9265_v33 }
 0x19a   :  { %v2314_v25 = vmax.f32 %v2298_v58, 0.0  ;;  %v2277_v26 = vmax.f32 %v1810_v61, %v6372_v0 }
 0x19b   :  { %v2313_v13 = vmax.f32 %v2297_v8, 0.0  ;;  %v2276_v7 = vmax.f32 %v1809_v6, %v2197_v15  ;;  %v6231_v49 = vpop.f32.mrb[22].mxu0  ;;  %v4982_v6 = vld [vmem:[%s10571_s3 + $0x190] sm:$0xff]  ;;  %v4983_v15 = vld [vmem:[%s10571_s3 + $0x198] sm:$0xff] }
 0x19c   :  { %2346 = vst [vmem:[#allocation2 + $0x21] sm:$0xff] %v2314_v25  ;;  %v2300_v31 = vadd.f32 %v9314_v11, %v2277_v26  ;;  %v1812_v59 = vmax.f32 %v10582_v28, %v6231_v49  ;;  %v6375_v27 = vpop.f32.mrb[22].mxu1  ;;  %v1740_v19 = vpop.f32.mrb[23].mxu0  ;;  %v10585_v26 = vmax.f32 %v9267_v34, %v9271_v54  ;;  %v2379_v34 = vld [vmem:[%s10571_s3 + $0x28] sm:$0xff] }
 0x19d   :  { %2345 = vst [vmem:[#allocation2 + $0x19] sm:$0xff] %v2313_v13  ;;  %v2299_v52 = vadd.f32 %v9314_v11, %v2276_v7  ;;  %v1811_v47 = vmax.f32 %v10583_v38, %v1740_v19  ;;  %v2207_v35 = vpop.f32.mrb[23].mxu1  ;;  %v2378_v19 = vld [vmem:[%s10571_s3 + $0x20] sm:$0xff] }
 0x19e   :  { %v2316_v53 = vmax.f32 %v2300_v31, 0.0  ;;  %v2279_v37 = vmax.f32 %v1812_v59, %v6375_v27  ;;  %v9352_v59 = vpack.c.bf16 %v2377_v43, %v2376_v40  ;;  %v9354_v27 = vpack.c.bf16 %v4983_v15, %v4982_v6 }
 0x19f   :  { %v2315_v56 = vmax.f32 %v2299_v52, 0.0  ;;  %v2278_v57 = vmax.f32 %v1811_v47, %v2207_v35  ;;  %v6234_v58 = vpop.f32.mrb[24].mxu0  ;;  %v10586_v52 = vmax.f32 %v9275_v63, %v9277_v4  ;;  %v10588_v15 = vmax.f32 %v9287_v16, %v9289_v23 }
 0x1a0   :  { %2348 = vst [vmem:[#allocation2 + $0x39] sm:$0xff] %v2316_v53  ;;  %v2302_v61 = vadd.f32 %v9314_v11, %v2279_v37  ;;  %v1814_v20 = vmax.f32 %v10584_v44, %v6234_v58  ;;  %v6378_v0 = vpop.f32.mrb[24].mxu1  ;;  %v1750_v1 = vpop.f32.mrb[25].mxu0  ;;  %v9338_v8 = vld [vmem:[#allocation2 + $0x1] ss:$2 sm:$0xff]  ;;  %v10587_v58 = vmax.f32 %v9279_v18, %v9283_v3  ;;  %v9384_v18 = vpack.c.bf16 %v2379_v34, %v2378_v19 }
 0x1a1   :  { %2347 = vst [vmem:[#allocation2 + $0x31] sm:$0xff] %v2315_v56  ;;  %v2301_v25 = vadd.f32 %v9314_v11, %v2278_v57  ;;  %v1813_v5 = vmax.f32 %v10585_v26, %v1750_v1  ;;  %v2217_v33 = vpop.f32.mrb[25].mxu1  ;;  %6420 = vmatprep.mubr.f32.mxu0 %v9338_v8  ;;  %6552 = vmatprep.mubr.f32.mxu1 %v9338_v8  ;;  %v4984_v37 = vld [vmem:[%s10571_s3 + $0x1a0] sm:$0xff]  ;;  %v4985_v56 = vld [vmem:[%s10571_s3 + $0x1a8] sm:$0xff]  ;;  %v2381_v1 = vld [vmem:[%s10571_s3 + $0x38] sm:$0xff] }
 0x1a2   :  { %v2318_v13 = vmax.f32 %v2302_v61, 0.0  ;;  %v2281_v7 = vmax.f32 %v1814_v20, %v6378_v0  ;;  %v9386_v3 = vpack.c.bf16 %v4985_v56, %v4984_v37  ;;  %v2380_v0 = vld [vmem:[%s10571_s3 + $0x30] sm:$0xff]  ;;  %v10590_v37 = vmax.f32 %v9299_v36, %v9301_v41 }
 0x1a3   :  { %v2317_v49 = vmax.f32 %v2301_v25, 0.0  ;;  %v2280_v31 = vmax.f32 %v1813_v5, %v2217_v33  ;;  %v6237_v28 = vpop.f32.mrb[26].mxu0 }
 0x1a4   :  { %2350 = vst [vmem:[#allocation2 + $0x51] sm:$0xff] %v2318_v13  ;;  %v2304_v54 = vadd.f32 %v9314_v11, %v2281_v7  ;;  %v1816_v38 = vmax.f32 %v10586_v52, %v6237_v28  ;;  %v6381_v47 = vpop.f32.mrb[26].mxu1  ;;  %v1760_v35 = vpop.f32.mrb[27].mxu0  ;;  %v9366_v53 = vld [vmem:[#allocation2 + $0x19] ss:$2 sm:$0xff]  ;;  %v4986_v13 = vld [vmem:[%s10571_s3 + $0x1b0] sm:$0xff] }
 0x1a5   :  { %2349 = vst [vmem:[#allocation2 + $0x49] sm:$0xff] %v2317_v49  ;;  %v2303_v57 = vadd.f32 %v9314_v11, %v2280_v31  ;;  %v1815_v63 = vmax.f32 %v10587_v58, %v1760_v35  ;;  %v2227_v4 = vpop.f32.mrb[27].mxu1  ;;  %6421 = vmatmul.mubr.f32.vlgmr.msra.gmra.mrb[32].mxu0 %v9366_v53  ;;  %6553 = vmatmul.mubr.f32.vlgmr.msra.gmra.mrb[32].mxu1 %v9366_v53  ;;  %v4987_v7 = vld [vmem:[%s10571_s3 + $0x1b8] sm:$0xff] }
 0x1a6   :  { %v2320_v40 = vmax.f32 %v2304_v54, 0.0  ;;  %v2283_v43 = vmax.f32 %v1816_v38, %v6381_v47  ;;  %7269 = vmatpush3.bf16.msra.mxu0 %v9239_v42  ;;  %7365 = vmatpush3.bf16.msra.mxu1 %v9244_v48  ;;  %v10589_v31 = vmax.f32 %v9291_v24, %v9295_v30  ;;  %v9416_v24 = vpack.c.bf16 %v2381_v1, %v2380_v0  ;;  %v2382_v38 = vld [vmem:[%s10571_s3 + $0x40] sm:$0xff]  ;;  %v2383_v47 = vld [vmem:[%s10571_s3 + $0x48] sm:$0xff] }
 0x1a7   :  { %v2319_v61 = vmax.f32 %v2303_v57, 0.0  ;;  %v2282_v44 = vmax.f32 %v1815_v63, %v2227_v4  ;;  %v6240_v20 = vpop.f32.mrb[28].mxu0  ;;  %7271 = vmatprep.subr.bf16.mxu0 %v9352_v59  ;;  %7367 = vmatprep.subr.bf16.mxu1 %v9354_v27  ;;  %v9418_v30 = vpack.c.bf16 %v4987_v7, %v4986_v13  ;;  %v4988_v4 = vld [vmem:[%s10571_s3 + $0x1c0] sm:$0xff]  ;;  %v4991_v13 = vld [vmem:[%s10571_s3 + $0x1d8] sm:$0xff] }
 0x1a8   :  { %2352 = vst [vmem:[#allocation2 + $0x69] sm:$0xff] %v2320_v40  ;;  %v2306_v6 = vadd.f32 %v9314_v11, %v2283_v43  ;;  %v1818_v25 = vmax.f32 %v10588_v15, %v6240_v20  ;;  %v6384_v26 = vpop.f32.mrb[28].mxu1  ;;  %v1770_v5 = vpop.f32.mrb[29].mxu0  ;;  %v9398_v33 = vld [vmem:[#allocation2 + $0x31] ss:$2 sm:$0xff]  ;;  %v4989_v40 = vld [vmem:[%s10571_s3 + $0x1c8] sm:$0xff] }
 0x1a9   :  { %2351 = vst [vmem:[#allocation2 + $0x61] sm:$0xff] %v2319_v61  ;;  %v2305_v49 = vadd.f32 %v9314_v11, %v2282_v44  ;;  %v1817_v16 = vmax.f32 %v10589_v31, %v1770_v5  ;;  %v2237_v23 = vpop.f32.mrb[29].mxu1  ;;  %6423 = vmatprep.mubr.f32.mxu0 %v9398_v33  ;;  %6555 = vmatprep.mubr.f32.mxu1 %v9398_v33  ;;  %v2385_v15 = vld [vmem:[%s10571_s3 + $0x58] sm:$0xff]  ;;  %v4990_v5 = vld [vmem:[%s10571_s3 + $0x1d0] sm:$0xff] }
 0x1aa   :  { %v2322_v28 = vmax.f32 %v2306_v6, 0.0  ;;  %v2285_v19 = vmax.f32 %v1818_v25, %v6384_v26  ;;  %7273 = vmatpush3.bf16.msra.mxu0 %v9352_v59  ;;  %7369 = vmatpush3.bf16.msra.mxu1 %v9354_v27  ;;  %v10591_v61 = vmax.f32 %v9303_v45, %v9307_v50  ;;  %v9448_v6 = vpack.c.bf16 %v2383_v47, %v2382_v38  ;;  %v2384_v50 = vld [vmem:[%s10571_s3 + $0x50] sm:$0xff] }
 0x1ab   :  { %v2321_v34 = vmax.f32 %v2305_v49, 0.0  ;;  %v2284_v54 = vmax.f32 %v1817_v16, %v2237_v23  ;;  %v6243_v52 = vpop.f32.mrb[30].mxu0  ;;  %7275 = vmatprep.subr.bf16.mxu0 %v9384_v18  ;;  %7371 = vmatprep.subr.bf16.mxu1 %v9386_v3  ;;  %v9450_v45 = vpack.c.bf16 %v4989_v40, %v4988_v4  ;;  %v9474_v16 = vpack.c.bf16 %v2385_v15, %v2384_v50  ;;  %v4965_v4 = vld [vmem:[%s10571_s3 + $0x108] sm:$0xff]  ;;  %v4967_v50 = vld [vmem:[%s10571_s3 + $0x118] sm:$0xff]  ;;  %v5014_v15 = vld [vmem:[%s10571_s3 + $0x290] sm:$0xff] }
 0x1ac   :  { %2354 = vst [vmem:[#allocation2 + $0x81] sm:$0xff] %v2322_v28  ;;  %v2308_v35 = vadd.f32 %v9314_v11, %v2285_v19  ;;  %v1820_v56 = vmax.f32 %v10590_v37, %v6243_v52  ;;  %v6387_v57 = vpop.f32.mrb[30].mxu1  ;;  %v1780_v58 = vpop.f32.mrb[31].mxu0  ;;  %v9430_v63 = vld [vmem:[#allocation2 + $0x49] ss:$2 sm:$0xff]  ;;  %v9476_v23 = vpack.c.bf16 %v4991_v13, %v4990_v5  ;;  %v2389_v37 = vld [vmem:[%s10571_s3 + $0x78] sm:$0xff] }
 0x1ad   :  { %2353 = vst [vmem:[#allocation2 + $0x79] sm:$0xff] %v2321_v34  ;;  %v2307_v43 = vadd.f32 %v9314_v11, %v2284_v54  ;;  %v1819_v36 = vmax.f32 %v10591_v61, %v1780_v58  ;;  %v2247_v41 = vpop.f32.mrb[31].mxu1  ;;  %6424 = vmatmul.mubr.f32.gmra.mrb[34].mxu0 %v9430_v63  ;;  %6556 = vmatmul.mubr.f32.gmra.mrb[34].mxu1 %v9430_v63  ;;  %v2387_v28 = vld [vmem:[%s10571_s3 + $0x68] sm:$0xff]  ;;  %v4992_v34 = vld [vmem:[%s10571_s3 + $0x1e0] sm:$0xff] }
 0x1ae   :  { %v2324_v44 = vmax.f32 %v2308_v35, 0.0  ;;  %v2287_v20 = vmax.f32 %v1820_v56, %v6387_v57  ;;  %7277 = vmatpush3.bf16.msra.mxu0 %v9384_v18  ;;  %7373 = vmatpush3.bf16.msra.mxu1 %v9386_v3  ;;  %v4993_v54 = vld [vmem:[%s10571_s3 + $0x1e8] sm:$0xff]  ;;  %v2388_v35 = vld [vmem:[%s10571_s3 + $0x70] sm:$0xff]  ;;  %v4995_v57 = vld [vmem:[%s10571_s3 + $0x1f8] sm:$0xff] }
 0x1af   :  { %v2323_v0 = vmax.f32 %v2307_v43, 0.0  ;;  %v2286_v1 = vmax.f32 %v1819_v36, %v2247_v41  ;;  %7279 = vmatprep.subr.bf16.mxu0 %v9416_v24  ;;  %7375 = vmatprep.subr.bf16.mxu1 %v9418_v30  ;;  %v9500_v38 = vpack.c.bf16 %v4993_v54, %v4992_v34  ;;  %v4994_v56 = vld [vmem:[%s10571_s3 + $0x1f0] sm:$0xff]  ;;  %v4964_v58 = vld [vmem:[%s10571_s3 + $0x100] sm:$0xff]  ;;  %v9530_v43 = vpack.c.bf16 %v2389_v37, %v2388_v35  ;;  %v5013_v41 = vld [vmem:[%s10571_s3 + $0x288] sm:$0xff] }
 0x1b0   :  { %2356 = vst [vmem:[#allocation2 + $0x99] sm:$0xff] %v2324_v44  ;;  %v2310_v25 = vadd.f32 %v9314_v11, %v2287_v20  ;;  %v9459_v26 = vld [vmem:[#allocation2 + $0x61] ss:$2 sm:$0xff]  ;;  %v9532_v61 = vpack.c.bf16 %v4995_v57, %v4994_v56  ;;  %v2359_v44 = vld [vmem:[#allocation2] ss:$2 sm:$0xff]  ;;  %v9544_v20 = vpack.c.bf16 %v4965_v4, %v4964_v58  ;;  %v4970_v56 = vld [vmem:[%s10571_s3 + $0x130] sm:$0xff] }
 0x1b1   :  { %2355 = vst [vmem:[#allocation2 + $0x91] sm:$0xff] %v2323_v0  ;;  %v2309_v7 = vadd.f32 %v9314_v11, %v2286_v1  ;;  %6426 = vmatprep.mubr.f32.mxu0 %v9459_v26  ;;  %6558 = vmatprep.mubr.f32.mxu1 %v9459_v26  ;;  %v2386_v11 = vld [vmem:[%s10571_s3 + $0x60] sm:$0xff]  ;;  %v4966_v1 = vld [vmem:[%s10571_s3 + $0x110] sm:$0xff]  ;;  %v5017_v34 = vld [vmem:[%s10571_s3 + $0x2a8] sm:$0xff] }
 0x1b2   :  { %v2326_v49 = vmax.f32 %v2310_v25, 0.0  ;;  %7281 = vmatpush3.bf16.msra.mxu0 %v9416_v24  ;;  %7377 = vmatpush3.bf16.msra.mxu1 %v9418_v30  ;;  %v9498_v52 = vpack.c.bf16 %v2387_v28, %v2386_v11  ;;  %v5012_v36 = vld [vmem:[%s10571_s3 + $0x280] sm:$0xff]  ;;  %v5015_v25 = vld [vmem:[%s10571_s3 + $0x298] sm:$0xff]  ;;  %v9566_v13 = vpack.c.bf16 %v4967_v50, %v4966_v1  ;;  %v2365_v54 = vld [vmem:[#allocation2 + $0x48] ss:$2 sm:$0xff] }
 0x1b3   :  { %v2325_v31 = vmax.f32 %v2309_v7, 0.0  ;;  %7283 = vmatprep.subr.bf16.mxu0 %v9448_v6  ;;  %7379 = vmatprep.subr.bf16.mxu1 %v9450_v45  ;;  %v9546_v0 = vpack.c.bf16 %v5013_v41, %v5012_v36  ;;  %v2361_v5 = vld [vmem:[#allocation2 + $0x18] ss:$2 sm:$0xff]  ;;  %v9568_v7 = vpack.c.bf16 %v5015_v25, %v5014_v15  ;;  %v5018_v4 = vld [vmem:[%s10571_s3 + $0x2b0] sm:$0xff]  ;;  %v4973_v15 = vld [vmem:[%s10571_s3 + $0x148] sm:$0xff] }
 0x1b4   :  { %2358 = vst [vmem:[#allocation2 + $0xb1] sm:$0xff] %v2326_v49  ;;  %v9484_v19 = vld [vmem:[#allocation2 + $0x79] ss:$2 sm:$0xff]  ;;  %v2363_v11 = vld [vmem:[#allocation2 + $0x30] ss:$2 sm:$0xff] }
 0x1b5   :  { %2357 = vst [vmem:[#allocation2 + $0xa9] sm:$0xff] %v2325_v31  ;;  %6427 = vmatmul.mubr.f32.gmra.mrb[36].mxu0 %v9484_v19  ;;  %6559 = vmatmul.mubr.f32.gmra.mrb[36].mxu1 %v9484_v19  ;;  %v4968_v49 = vld [vmem:[%s10571_s3 + $0x120] sm:$0xff]  ;;  %v4969_v31 = vld [vmem:[%s10571_s3 + $0x128] sm:$0xff]  ;;  %v4971_v57 = vld [vmem:[%s10571_s3 + $0x138] sm:$0xff] }
 0x1b6   :  { %7285 = vmatpush3.bf16.msra.mxu0 %v9448_v6  ;;  %7381 = vmatpush3.bf16.msra.mxu1 %v9450_v45  ;;  %v5016_v28 = vld [vmem:[%s10571_s3 + $0x2a0] sm:$0xff]  ;;  %v9586_v35 = vpack.c.bf16 %v4969_v31, %v4968_v49  ;;  %v5019_v36 = vld [vmem:[%s10571_s3 + $0x2b8] sm:$0xff]  ;;  %v5021_v49 = vld [vmem:[%s10571_s3 + $0x2c8] sm:$0xff] }
 0x1b7   :  { %7287 = vmatprep.subr.bf16.mxu0 %v9474_v16  ;;  %7383 = vmatprep.subr.bf16.mxu1 %v9476_v23  ;;  %v9588_v37 = vpack.c.bf16 %v5017_v34, %v5016_v28  ;;  %v2367_v58 = vld [vmem:[#allocation2 + $0x60] ss:$2 sm:$0xff]  ;;  %v9608_v1 = vpack.c.bf16 %v5019_v36, %v5018_v4  ;;  %v4974_v34 = vld [vmem:[%s10571_s3 + $0x150] sm:$0xff] }
 0x1b8   :  { %v9502_v47 = vld [vmem:[#allocation2 + $0x91] ss:$2 sm:$0xff]  ;;  %v2369_v41 = vld [vmem:[#allocation2 + $0x78] ss:$2 sm:$0xff] }
 0x1b9   :  { %6429 = vmatprep.mubr.f32.mxu0 %v9502_v47  ;;  %6561 = vmatprep.mubr.f32.mxu1 %v9502_v47  ;;  %v4972_v50 = vld [vmem:[%s10571_s3 + $0x140] sm:$0xff]  ;;  %v2371_v25 = vld [vmem:[#allocation2 + $0x90] ss:$2 sm:$0xff] }
 0x1ba   :  { %7289 = vmatpush3.bf16.msra.mxu0 %v9474_v16  ;;  %7385 = vmatpush3.bf16.msra.mxu1 %v9476_v23 }
 0x1bb   :  { %7291 = vmatprep.subr.bf16.mxu0 %v9498_v52  ;;  %7387 = vmatprep.subr.bf16.mxu1 %v9500_v38 }
 0x1bc   :  { %v9528_v40 = vld [vmem:[#allocation2 + $0xa9] ss:$2 sm:$0xff]  ;;  %v2373_v31 = vld [vmem:[#allocation2 + $0xa8] ss:$2 sm:$0xff] }
 0x1bd   :  { %6430 = vmatmul.mubr.f32.gmra.mrb[38].mxu0 %v9528_v40  ;;  %6562 = vmatmul.mubr.f32.gmra.mrb[38].mxu1 %v9528_v40 }
 0x1be   :  { %7293 = vmatpush3.bf16.msra.mxu0 %v9498_v52  ;;  %7389 = vmatpush3.bf16.msra.mxu1 %v9500_v38 }
 0x1bf   :  { %6464 = vmatprep.mubr.f32.mxu0 %v2359_v44  ;;  %6596 = vmatprep.mubr.f32.mxu1 %v2359_v44  ;;  %v9606_v44 = vpack.c.bf16 %v4971_v57, %v4970_v56  ;;  %v9636_v56 = vld [vmem:[#allocation2 + $0x2] ss:$2 sm:$0xff] }
 0x1c0   :  { %7295 = vmatprep.subr.bf16.mxu0 %v9530_v43  ;;  %7391 = vmatprep.subr.bf16.mxu1 %v9532_v61  ;;  %v5022_v57 = vld [vmem:[%s10571_s3 + $0x2d0] sm:$0xff] }
 0x1c2   :  { %7297 = vmatpush3.bf16.msra.mxu0 %v9530_v43  ;;  %7393 = vmatpush3.bf16.msra.mxu1 %v9532_v61 }
 0x1c3   :  { %7299 = vmatprep.subr.bf16.mxu0 %v9544_v20  ;;  %7395 = vmatprep.subr.bf16.mxu1 %v9546_v0 }
 0x1c5   :  { %6465 = vmatmul.mubr.f32.vlgmr.msra.gmra.mrb[32].mxu0 %v2361_v5  ;;  %6597 = vmatmul.mubr.f32.vlgmr.msra.gmra.mrb[32].mxu1 %v2361_v5  ;;  %v5020_v5 = vld [vmem:[%s10571_s3 + $0x2c0] sm:$0xff] }
 0x1c6   :  { %6467 = vmatprep.mubr.f32.mxu0 %v2363_v11  ;;  %7301 = vmatpush3.bf16.msra.mxu0 %v9544_v20  ;;  %v9628_v28 = vpack.c.bf16 %v5021_v49, %v5020_v5 }
 0x1c7   :  { %6599 = vmatprep.mubr.f32.mxu1 %v2363_v11  ;;  %7397 = vmatpush3.bf16.msra.mxu1 %v9546_v0  ;;  %v9626_v11 = vpack.c.bf16 %v4973_v15, %v4972_v50  ;;  %v4977_v50 = vld [vmem:[%s10571_s3 + $0x168] sm:$0xff]  ;;  %v5024_v15 = vld [vmem:[%s10571_s3 + $0x2e0] sm:$0xff] }
 0x1c8   :  { %7303 = vmatprep.subr.bf16.mxu0 %v9566_v13  ;;  %7399 = vmatprep.subr.bf16.mxu1 %v9568_v7 }
 0x1c9   :  { %6468 = vmatmul.mubr.f32.gmra.mrb[34].mxu0 %v2365_v54  ;;  %6600 = vmatmul.mubr.f32.gmra.mrb[34].mxu1 %v2365_v54  ;;  %v4975_v54 = vld [vmem:[%s10571_s3 + $0x158] sm:$0xff] }
 0x1ca   :  { %6470 = vmatprep.mubr.f32.mxu0 %v2367_v58  ;;  %7305 = vmatpush3.bf16.msra.mxu0 %v9566_v13  ;;  %v9648_v4 = vpack.c.bf16 %v4975_v54, %v4974_v34  ;;  %v4979_v34 = vld [vmem:[%s10571_s3 + $0x178] sm:$0xff]  ;;  %v5026_v54 = vld [vmem:[%s10571_s3 + $0x2f0] sm:$0xff] }
 0x1cb   :  { %6602 = vmatprep.mubr.f32.mxu1 %v2367_v58  ;;  %7401 = vmatpush3.bf16.msra.mxu1 %v9568_v7  ;;  %v5023_v58 = vld [vmem:[%s10571_s3 + $0x2d8] sm:$0xff] }
 0x1cc   :  { %7307 = vmatprep.subr.bf16.mxu0 %v9586_v35  ;;  %7403 = vmatprep.subr.bf16.mxu1 %v9588_v37  ;;  %v9652_v36 = vpack.c.bf16 %v5023_v58, %v5022_v57  ;;  %v5027_v57 = vld [vmem:[%s10571_s3 + $0x2f8] sm:$0xff] }
 0x1cd   :  { %6471 = vmatmul.mubr.f32.gmra.mrb[36].mxu0 %v2369_v41  ;;  %6603 = vmatmul.mubr.f32.gmra.mrb[36].mxu1 %v2369_v41  ;;  %v4976_v41 = vld [vmem:[%s10571_s3 + $0x160] sm:$0xff] }
 0x1ce   :  { %6473 = vmatprep.mubr.f32.mxu0 %v2371_v25  ;;  %7309 = vmatpush3.bf16.msra.mxu0 %v9586_v35  ;;  %v9669_v5 = vpack.c.bf16 %v4977_v50, %v4976_v41  ;;  %v9692_v41 = vpack.c.bf16 %v5027_v57, %v5026_v54  ;;  %v2636_v50 = vld [vmem:[#allocation2 + $0x1a] ss:$2 sm:$0xff]  ;;  %v4051_v54 = vld [vmem:[%s10573_s5 + $0x130] sm:$0xff] }
 0x1cf   :  { %6605 = vmatprep.mubr.f32.mxu1 %v2371_v25  ;;  %7405 = vmatpush3.bf16.msra.mxu1 %v9588_v37  ;;  %v5025_v25 = vld [vmem:[%s10571_s3 + $0x2e8] sm:$0xff]  ;;  %v4052_v57 = vld [vmem:[%s10573_s5 + $0x138] sm:$0xff] }
 0x1d0   :  { %7311 = vmatprep.subr.bf16.mxu0 %v9606_v44  ;;  %7407 = vmatprep.subr.bf16.mxu1 %v9608_v1  ;;  %v9672_v49 = vpack.c.bf16 %v5025_v25, %v5024_v15  ;;  %v2638_v15 = vld [vmem:[#allocation2 + $0x32] ss:$2 sm:$0xff] }
 0x1d1   :  { %6474 = vmatmul.mubr.f32.gmra.mrb[38].mxu0 %v2373_v31  ;;  %6606 = vmatmul.mubr.f32.gmra.mrb[38].mxu1 %v2373_v31  ;;  %v4978_v31 = vld [vmem:[%s10571_s3 + $0x170] sm:$0xff] }
 0x1d2   :  { %7313 = vmatpush3.bf16.msra.mxu0 %v9606_v44  ;;  %6508 = vmatprep.mubr.f32.mxu0 %v9636_v56  ;;  %v9689_v58 = vpack.c.bf16 %v4979_v34, %v4978_v31  ;;  %v2640_v25 = vld [vmem:[#allocation2 + $0x4a] ss:$2 sm:$0xff]  ;;  %v2644_v34 = vld [vmem:[#allocation2 + $0x7a] ss:$2 sm:$0xff] }
 0x1d3   :  { %7409 = vmatpush3.bf16.msra.mxu1 %v9608_v1  ;;  %6640 = vmatprep.mubr.f32.mxu1 %v9636_v56  ;;  %v2642_v31 = vld [vmem:[#allocation2 + $0x62] ss:$2 sm:$0xff] }
 0x1d4   :  { %7315 = vmatprep.subr.bf16.mxu0 %v9626_v11  ;;  %7411 = vmatprep.subr.bf16.mxu1 %v9628_v28 }
 0x1d6   :  { %7317 = vmatpush3.bf16.msra.mxu0 %v9626_v11 }
 0x1d7   :  { %7413 = vmatpush3.bf16.msra.mxu1 %v9628_v28  ;;  %7319 = vmatprep.subr.bf16.mxu0 %v9648_v4 }
 0x1d8   :  { %7415 = vmatprep.subr.bf16.mxu1 %v9652_v36 }
 0x1da   :  { %7321 = vmatpush3.bf16.msra.mxu0 %v9648_v4 }
 0x1db   :  { %7417 = vmatpush3.bf16.msra.mxu1 %v9652_v36  ;;  %7323 = vmatprep.subr.bf16.mxu0 %v9669_v5 }
 0x1dc   :  { %7419 = vmatprep.subr.bf16.mxu1 %v9672_v49 }
 0x1de   :  { %7325 = vmatpush3.bf16.msra.mxu0 %v9669_v5 }
 0x1df   :  { %7421 = vmatpush3.bf16.msra.mxu1 %v9672_v49  ;;  %7327 = vmatprep.subr.bf16.mxu0 %v9689_v58 }
 0x1e0   :  { %7423 = vmatprep.subr.bf16.mxu1 %v9692_v41 }
 0x1e2   :  { %7329 = vmatpush3.bf16.msra.mxu0 %v9689_v58 }
 0x1e3   :  { %7425 = vmatpush3.bf16.msra.mxu1 %v9692_v41  ;;  %7427 = vmatprep.subr.bf16.mxu0 %v9044_v2 }
 0x1e4   :  { %7523 = vmatprep.subr.bf16.mxu1 %v9056_v14 }
 0x1e5   :  { %6509 = vmatmul.mubr.f32.vlgmr.msra.gmra.mrb[32].mxu0 %v2636_v50 }
 0x1e6   :  { %6641 = vmatmul.mubr.f32.vlgmr.msra.gmra.mrb[32].mxu1 %v2636_v50  ;;  %6511 = vmatprep.mubr.f32.mxu0 %v2638_v15 }
 0x1e7   :  { %6643 = vmatprep.mubr.f32.mxu1 %v2638_v15  ;;  %7429 = vmatpush3.bf16.msra.mxu0 %v9044_v2  ;;  %v2646_v2 = vld [vmem:[#allocation2 + $0x92] ss:$2 sm:$0xff] }
 0x1e8   :  { %7525 = vmatpush3.bf16.msra.mxu1 %v9056_v14  ;;  %7431 = vmatprep.subr.bf16.mxu0 %v9074_v32  ;;  %v2648_v14 = vld [vmem:[#allocation2 + $0xaa] ss:$2 sm:$0xff] }
 0x1e9   :  { %6512 = vmatmul.mubr.f32.gmra.mrb[34].mxu0 %v2640_v25  ;;  %7527 = vmatprep.subr.bf16.mxu1 %v9084_v39 }
 0x1ea   :  { %6644 = vmatmul.mubr.f32.gmra.mrb[34].mxu1 %v2640_v25  ;;  %6514 = vmatprep.mubr.f32.mxu0 %v2642_v31 }
 0x1eb   :  { %6646 = vmatprep.mubr.f32.mxu1 %v2642_v31  ;;  %7433 = vmatpush3.bf16.msra.mxu0 %v9074_v32  ;;  %v3372_v32 = vld [vmem:[#allocation2 + $0x3] ss:$2 sm:$0xff] }
 0x1ec   :  { %7529 = vmatpush3.bf16.msra.mxu1 %v9084_v39  ;;  %7435 = vmatprep.subr.bf16.mxu0 %v9099_v60  ;;  %v3374_v39 = vld [vmem:[#allocation2 + $0x1b] ss:$2 sm:$0xff] }
 0x1ed   :  { %6515 = vmatmul.mubr.f32.gmra.mrb[36].mxu0 %v2644_v34  ;;  %7531 = vmatprep.subr.bf16.mxu1 %v9103_v62 }
 0x1ee   :  { %6647 = vmatmul.mubr.f32.gmra.mrb[36].mxu1 %v2644_v34  ;;  %6517 = vmatprep.mubr.f32.mxu0 %v2646_v2 }
 0x1ef   :  { %6649 = vmatprep.mubr.f32.mxu1 %v2646_v2  ;;  %7437 = vmatpush3.bf16.msra.mxu0 %v9099_v60  ;;  %v3376_v60 = vld [vmem:[#allocation2 + $0x33] ss:$2 sm:$0xff] }
 0x1f0   :  { %7533 = vmatpush3.bf16.msra.mxu1 %v9103_v62  ;;  %7439 = vmatprep.subr.bf16.mxu0 %v9123_v51  ;;  %v4029_v62 = vld [vmem:[%s10573_s5 + $0x80] sm:$0xff] }
 0x1f1   :  { %6518 = vmatmul.mubr.f32.gmra.mrb[38].mxu0 %v2648_v14  ;;  %7535 = vmatprep.subr.bf16.mxu1 %v9128_v9 }
 0x1f2   :  { %6650 = vmatmul.mubr.f32.gmra.mrb[38].mxu1 %v2648_v14  ;;  %6684 = vmatprep.mubr.f32.mxu0 %v9636_v56 }
 0x1f3   :  { %7441 = vmatpush3.bf16.msra.mxu0 %v9123_v51  ;;  %6816 = vmatprep.mubr.f32.mxu1 %v9636_v56  ;;  %v4030_v51 = vld [vmem:[%s10573_s5 + $0x88] sm:$0xff]  ;;  %v4068_v56 = vld [vmem:[%s10573_s5 + $0x1b8] sm:$0xff] }
 0x1f4   :  { %7537 = vmatpush3.bf16.msra.mxu1 %v9128_v9  ;;  %7443 = vmatprep.subr.bf16.mxu0 %v9140_v46  ;;  %v4061_v9 = vld [vmem:[%s10573_s5 + $0x180] sm:$0xff] }
 0x1f5   :  { %7539 = vmatprep.subr.bf16.mxu1 %v9148_v55 }
 0x1f7   :  { %7445 = vmatpush3.bf16.msra.mxu0 %v9140_v46  ;;  %v7618_v46 = vpack.c.bf16 %v4030_v51, %v4029_v62  ;;  %v4039_v51 = vld [vmem:[%s10573_s5 + $0xd0] sm:$0xff] }
 0x1f8   :  { %7541 = vmatpush3.bf16.msra.mxu1 %v9148_v55  ;;  %7447 = vmatprep.subr.bf16.mxu0 %v9163_v10  ;;  %v4062_v55 = vld [vmem:[%s10573_s5 + $0x188] sm:$0xff] }
 0x1f9   :  { %7543 = vmatprep.subr.bf16.mxu1 %v9168_v21 }
 0x1fb   :  { %7449 = vmatpush3.bf16.msra.mxu0 %v9163_v10  ;;  %v4013_v10 = vld [vmem:[%s10573_s5] sm:$0xff] }
 0x1fc   :  { %7545 = vmatpush3.bf16.msra.mxu1 %v9168_v21  ;;  %7451 = vmatprep.subr.bf16.mxu0 %v9199_v12  ;;  %v4014_v21 = vld [vmem:[%s10573_s5 + $0x8] sm:$0xff] }
 0x1fd   :  { %7547 = vmatprep.subr.bf16.mxu1 %v9204_v17 }
 0x1ff   :  { %7453 = vmatpush3.bf16.msra.mxu0 %v9199_v12  ;;  %v3378_v12 = vld [vmem:[#allocation2 + $0x4b] ss:$2 sm:$0xff] }
 0x200   :  { %7549 = vmatpush3.bf16.msra.mxu1 %v9204_v17  ;;  %7455 = vmatprep.subr.bf16.mxu0 %v9219_v29  ;;  %v7650_v17 = vpack.c.bf16 %v4062_v55, %v4061_v9  ;;  %v4040_v9 = vld [vmem:[%s10573_s5 + $0xd8] sm:$0xff] }
 0x201   :  { %7551 = vmatprep.subr.bf16.mxu1 %v9224_v22  ;;  %v7638_v55 = vpack.c.bf16 %v4040_v9, %v4039_v51 }
 0x203   :  { %7457 = vmatpush3.bf16.msra.mxu0 %v9219_v29  ;;  %v7620_v29 = vpack.c.bf16 %v4014_v21, %v4013_v10  ;;  %v4072_v10 = vld [vmem:[%s10573_s5 + $0x1d8] sm:$0xff]  ;;  %v4023_v21 = vld [vmem:[%s10573_s5 + $0x50] sm:$0xff] }
 0x204   :  { %7553 = vmatpush3.bf16.msra.mxu1 %v9224_v22  ;;  %7459 = vmatprep.subr.bf16.mxu0 %v9239_v42  ;;  %v4045_v22 = vld [vmem:[%s10573_s5 + $0x100] sm:$0xff] }
 0x205   :  { %7555 = vmatprep.subr.bf16.mxu1 %v9244_v48 }
 0x206   :  { %6685 = vmatmul.mubr.f32.vlgmr.msra.gmra.mrb[40].mxu0 %v2636_v50 }
 0x207   :  { %6817 = vmatmul.mubr.f32.vlgmr.msra.gmra.mrb[40].mxu1 %v2636_v50  ;;  %6687 = vmatprep.mubr.f32.mxu0 %v2638_v15  ;;  %v4038_v50 = vld [vmem:[%s10573_s5 + $0xc8] sm:$0xff] }
 0x208   :  { %7461 = vmatpush3.bf16.msra.mxu0 %v9239_v42  ;;  %6819 = vmatprep.mubr.f32.mxu1 %v2638_v15  ;;  %v4046_v42 = vld [vmem:[%s10573_s5 + $0x108] sm:$0xff]  ;;  %v4069_v15 = vld [vmem:[%s10573_s5 + $0x1c0] sm:$0xff] }
 0x209   :  { %7557 = vmatpush3.bf16.msra.mxu1 %v9244_v48  ;;  %7463 = vmatprep.subr.bf16.mxu0 %v9352_v59  ;;  %v4031_v48 = vld [vmem:[%s10573_s5 + $0x90] sm:$0xff] }
 0x20a   :  { %6688 = vmatmul.mubr.f32.gmra.mrb[42].mxu0 %v2640_v25  ;;  %7559 = vmatprep.subr.bf16.mxu1 %v9354_v27 }
 0x20b   :  { %6820 = vmatmul.mubr.f32.gmra.mrb[42].mxu1 %v2640_v25  ;;  %6690 = vmatprep.mubr.f32.mxu0 %v2642_v31 }
 0x20c   :  { %7465 = vmatpush3.bf16.msra.mxu0 %v9352_v59  ;;  %6822 = vmatprep.mubr.f32.mxu1 %v2642_v31  ;;  %v4032_v59 = vld [vmem:[%s10573_s5 + $0x98] sm:$0xff]  ;;  %v4070_v31 = vld [vmem:[%s10573_s5 + $0x1c8] sm:$0xff] }
 0x20d   :  { %7561 = vmatpush3.bf16.msra.mxu1 %v9354_v27  ;;  %7467 = vmatprep.subr.bf16.mxu0 %v9384_v18  ;;  %v4063_v27 = vld [vmem:[%s10573_s5 + $0x190] sm:$0xff] }
 0x20e   :  { %6691 = vmatmul.mubr.f32.gmra.mrb[44].mxu0 %v2644_v34  ;;  %7563 = vmatprep.subr.bf16.mxu1 %v9386_v3 }
 0x20f   :  { %6823 = vmatmul.mubr.f32.gmra.mrb[44].mxu1 %v2644_v34  ;;  %6693 = vmatprep.mubr.f32.mxu0 %v2646_v2  ;;  %v4021_v34 = vld [vmem:[%s10573_s5 + $0x40] sm:$0xff] }
 0x210   :  { %7469 = vmatpush3.bf16.msra.mxu0 %v9384_v18  ;;  %6825 = vmatprep.mubr.f32.mxu1 %v2646_v2  ;;  %v7622_v18 = vpack.c.bf16 %v4032_v59, %v4031_v48  ;;  %v4022_v2 = vld [vmem:[%s10573_s5 + $0x48] sm:$0xff] }
 0x211   :  { %7565 = vmatpush3.bf16.msra.mxu1 %v9386_v3  ;;  %7471 = vmatprep.subr.bf16.mxu0 %v9416_v24  ;;  %v4042_v59 = vld [vmem:[%s10573_s5 + $0xe8] sm:$0xff] }
 0x212   :  { %6694 = vmatmul.mubr.f32.gmra.mrb[46].mxu0 %v2648_v14  ;;  %7567 = vmatprep.subr.bf16.mxu1 %v9418_v30 }
 0x213   :  { %6826 = vmatmul.mubr.f32.gmra.mrb[46].mxu1 %v2648_v14  ;;  %6728 = vmatprep.mubr.f32.mxu0 %v9338_v8  ;;  %v7666_v14 = vpack.c.bf16 %v4070_v31, %v4069_v15 }
 0x214   :  { %7473 = vmatpush3.bf16.msra.mxu0 %v9416_v24  ;;  %6860 = vmatprep.mubr.f32.mxu1 %v9338_v8  ;;  %v7652_v8 = vpack.c.bf16 %v4046_v42, %v4045_v22  ;;  %v4016_v24 = vld [vmem:[%s10573_s5 + $0x18] sm:$0xff]  ;;  %v4055_v22 = vld [vmem:[%s10573_s5 + $0x150] sm:$0xff] }
 0x215   :  { %7569 = vmatpush3.bf16.msra.mxu1 %v9418_v30  ;;  %7475 = vmatprep.subr.bf16.mxu0 %v9448_v6  ;;  %v4047_v30 = vld [vmem:[%s10573_s5 + $0x110] sm:$0xff]  ;;  %v4056_v42 = vld [vmem:[%s10573_s5 + $0x158] sm:$0xff] }
 0x216   :  { %7571 = vmatprep.subr.bf16.mxu1 %v9450_v45  ;;  %v7672_v48 = vpack.c.bf16 %v4056_v42, %v4055_v22  ;;  %v10086_v22 = vld [vmem:[%s10573_s5 + $0x398] sm:$0xff] }
 0x218   :  { %7477 = vmatpush3.bf16.msra.mxu0 %v9448_v6 }
 0x219   :  { %7573 = vmatpush3.bf16.msra.mxu1 %v9450_v45  ;;  %7479 = vmatprep.subr.bf16.mxu0 %v9474_v16  ;;  %v4048_v45 = vld [vmem:[%s10573_s5 + $0x118] sm:$0xff] }
 0x21a   :  { %7575 = vmatprep.subr.bf16.mxu1 %v9476_v23 }
 0x21c   :  { %7481 = vmatpush3.bf16.msra.mxu0 %v9474_v16  ;;  %v3382_v16 = vld [vmem:[#allocation2 + $0x7b] ss:$2 sm:$0xff] }
 0x21d   :  { %7577 = vmatpush3.bf16.msra.mxu1 %v9476_v23  ;;  %7483 = vmatprep.subr.bf16.mxu0 %v9498_v52  ;;  %v3384_v23 = vld [vmem:[#allocation2 + $0x93] ss:$2 sm:$0xff] }
 0x21e   :  { %7579 = vmatprep.subr.bf16.mxu1 %v9500_v38 }
 0x220   :  { %7485 = vmatpush3.bf16.msra.mxu0 %v9498_v52  ;;  %v4033_v52 = vld [vmem:[%s10573_s5 + $0xa0] sm:$0xff] }
 0x221   :  { %7581 = vmatpush3.bf16.msra.mxu1 %v9500_v38  ;;  %7487 = vmatprep.subr.bf16.mxu0 %v9530_v43  ;;  %v4034_v38 = vld [vmem:[%s10573_s5 + $0xa8] sm:$0xff] }
 0x222   :  { %7583 = vmatprep.subr.bf16.mxu1 %v9532_v61 }
 0x224   :  { %7489 = vmatpush3.bf16.msra.mxu0 %v9530_v43  ;;  %v4066_v43 = vld [vmem:[%s10573_s5 + $0x1a8] sm:$0xff] }
 0x225   :  { %7585 = vmatpush3.bf16.msra.mxu1 %v9532_v61  ;;  %7491 = vmatprep.subr.bf16.mxu0 %v9544_v20  ;;  %v4017_v61 = vld [vmem:[%s10573_s5 + $0x20] sm:$0xff] }
 0x226   :  { %7587 = vmatprep.subr.bf16.mxu1 %v9546_v0 }
 0x227   :  { %6729 = vmatmul.mubr.f32.vlgmr.msra.gmra.mrb[40].mxu0 %v9366_v53 }
 0x228   :  { %6861 = vmatmul.mubr.f32.vlgmr.msra.gmra.mrb[40].mxu1 %v9366_v53  ;;  %6731 = vmatprep.mubr.f32.mxu0 %v9398_v33  ;;  %v4064_v53 = vld [vmem:[%s10573_s5 + $0x198] sm:$0xff] }
 0x229   :  { %7493 = vmatpush3.bf16.msra.mxu0 %v9544_v20  ;;  %6863 = vmatprep.mubr.f32.mxu1 %v9398_v33  ;;  %v7654_v3 = vpack.c.bf16 %v4064_v53, %v4063_v27  ;;  %v4015_v33 = vld [vmem:[%s10573_s5 + $0x10] sm:$0xff]  ;;  %v4018_v20 = vld [vmem:[%s10573_s5 + $0x28] sm:$0xff]  ;;  %v4073_v27 = vld [vmem:[%s10573_s5 + $0x1e0] sm:$0xff] }
 0x22a   :  { %7589 = vmatpush3.bf16.msra.mxu1 %v9546_v0  ;;  %7495 = vmatprep.subr.bf16.mxu0 %v9566_v13  ;;  %v7624_v6 = vpack.c.bf16 %v4016_v24, %v4015_v33  ;;  %v4026_v33 = vld [vmem:[%s10573_s5 + $0x68] sm:$0xff] }
 0x22b   :  { %6732 = vmatmul.mubr.f32.gmra.mrb[42].mxu0 %v9430_v63  ;;  %7591 = vmatprep.subr.bf16.mxu1 %v9568_v7 }
 0x22c   :  { %6864 = vmatmul.mubr.f32.gmra.mrb[42].mxu1 %v9430_v63  ;;  %6734 = vmatprep.mubr.f32.mxu0 %v9459_v26  ;;  %v3380_v63 = vld [vmem:[#allocation2 + $0x63] ss:$2 sm:$0xff] }
 0x22d   :  { %7497 = vmatpush3.bf16.msra.mxu0 %v9566_v13  ;;  %6866 = vmatprep.mubr.f32.mxu1 %v9459_v26  ;;  %v7656_v26 = vpack.c.bf16 %v4048_v45, %v4047_v30  ;;  %v7628_v13 = vpack.c.bf16 %v4018_v20, %v4017_v61  ;;  %v4059_v61 = vld [vmem:[%s10573_s5 + $0x170] sm:$0xff]  ;;  %v4060_v20 = vld [vmem:[%s10573_s5 + $0x178] sm:$0xff] }
 0x22e   :  { %7593 = vmatpush3.bf16.msra.mxu1 %v9568_v7  ;;  %7499 = vmatprep.subr.bf16.mxu0 %v9586_v35  ;;  %v4049_v7 = vld [vmem:[%s10573_s5 + $0x120] sm:$0xff] }
 0x22f   :  { %6735 = vmatmul.mubr.f32.gmra.mrb[44].mxu0 %v9484_v19  ;;  %7595 = vmatprep.subr.bf16.mxu1 %v9588_v37 }
 0x230   :  { %6867 = vmatmul.mubr.f32.gmra.mrb[44].mxu1 %v9484_v19  ;;  %6737 = vmatprep.mubr.f32.mxu0 %v9502_v47  ;;  %v3386_v19 = vld [vmem:[#allocation2 + $0xab] ss:$2 sm:$0xff] }
 0x231   :  { %7501 = vmatpush3.bf16.msra.mxu0 %v9586_v35  ;;  %6869 = vmatprep.mubr.f32.mxu1 %v9502_v47  ;;  %v4065_v47 = vld [vmem:[%s10573_s5 + $0x1a0] sm:$0xff]  ;;  %v4050_v35 = vld [vmem:[%s10573_s5 + $0x128] sm:$0xff] }
 0x232   :  { %7597 = vmatpush3.bf16.msra.mxu1 %v9588_v37  ;;  %7503 = vmatprep.subr.bf16.mxu0 %v9606_v44  ;;  %v7658_v0 = vpack.c.bf16 %v4066_v43, %v4065_v47  ;;  %v7660_v37 = vpack.c.bf16 %v4050_v35, %v4049_v7  ;;  %v4028_v47 = vld [vmem:[%s10573_s5 + $0x78] sm:$0xff]  ;;  %v4094_v7 = vld [vmem:[%s10573_s5 + $0x288] sm:$0xff]  ;;  %v4125_v35 = vld [vmem:[%s10573_s5 + $0x380] sm:$0xff] }
 0x233   :  { %6738 = vmatmul.mubr.f32.gmra.mrb[46].mxu0 %v9528_v40  ;;  %7599 = vmatprep.subr.bf16.mxu1 %v9608_v1 }
 0x234   :  { %6870 = vmatmul.mubr.f32.gmra.mrb[46].mxu1 %v9528_v40  ;;  %6772 = vmatprep.mubr.f32.mxu0 %v3372_v32  ;;  %v7626_v40 = vpack.c.bf16 %v4034_v38, %v4033_v52  ;;  %v4076_v52 = vld [vmem:[%s10573_s5 + $0x1f8] sm:$0xff]  ;;  %v4027_v38 = vld [vmem:[%s10573_s5 + $0x70] sm:$0xff] }
 0x235   :  { %7505 = vmatpush3.bf16.msra.mxu0 %v9606_v44  ;;  %6904 = vmatprep.mubr.f32.mxu1 %v3372_v32  ;;  %v4035_v44 = vld [vmem:[%s10573_s5 + $0xb0] sm:$0xff]  ;;  %v7636_v32 = vpack.c.bf16 %v4022_v2, %v4021_v34  ;;  %v7648_v43 = vpack.c.bf16 %v4028_v47, %v4027_v38  ;;  %v10145_v38 = vld [vmem:[%s10573_s5 + $0x228] sm:$0xff]  ;;  %v10150_v47 = vld [vmem:[%s10573_s5 + $0x320] sm:$0xff] }
 0x236   :  { %7601 = vmatpush3.bf16.msra.mxu1 %v9608_v1  ;;  %7507 = vmatprep.subr.bf16.mxu0 %v9626_v11  ;;  %v4036_v1 = vld [vmem:[%s10573_s5 + $0xb8] sm:$0xff] }
 0x237   :  { %7603 = vmatprep.subr.bf16.mxu1 %v9628_v28 }
 0x239   :  { %7509 = vmatpush3.bf16.msra.mxu0 %v9626_v11  ;;  %v4067_v11 = vld [vmem:[%s10573_s5 + $0x1b0] sm:$0xff] }
 0x23a   :  { %7605 = vmatpush3.bf16.msra.mxu1 %v9628_v28  ;;  %7511 = vmatprep.subr.bf16.mxu0 %v9648_v4  ;;  %v7630_v28 = vpack.c.bf16 %v4036_v1, %v4035_v44  ;;  %v4126_v44 = vld [vmem:[%s10573_s5 + $0x388] sm:$0xff] }
 0x23b   :  { %7607 = vmatprep.subr.bf16.mxu1 %v9652_v36  ;;  %v7714_v1 = vpack.c.bf16 %v4126_v44, %v4125_v35  ;;  %v10171_v35 = vld [vmem:[%s10573_s5 + $0x2b8] sm:$0xff] }
 0x23d   :  { %7513 = vmatpush3.bf16.msra.mxu0 %v9648_v4  ;;  %v4019_v4 = vld [vmem:[%s10573_s5 + $0x30] sm:$0xff] }
 0x23e   :  { %7609 = vmatpush3.bf16.msra.mxu1 %v9652_v36  ;;  %7515 = vmatprep.subr.bf16.mxu0 %v9669_v5  ;;  %v4020_v36 = vld [vmem:[%s10573_s5 + $0x38] sm:$0xff] }
 0x23f   :  { %7611 = vmatprep.subr.bf16.mxu1 %v9672_v49 }
 0x241   :  { %7517 = vmatpush3.bf16.msra.mxu0 %v9669_v5  ;;  %v7662_v5 = vpack.c.bf16 %v4068_v56, %v4067_v11 }
 0x242   :  { %7613 = vmatpush3.bf16.msra.mxu1 %v9672_v49  ;;  %7519 = vmatprep.subr.bf16.mxu0 %v9689_v58  ;;  %v7632_v49 = vpack.c.bf16 %v4020_v36, %v4019_v4 }
 0x243   :  { %7615 = vmatprep.subr.bf16.mxu1 %v9692_v41 }
 0x245   :  { %7521 = vmatpush3.bf16.msra.mxu0 %v9689_v58  ;;  %v7664_v58 = vpack.c.bf16 %v4052_v57, %v4051_v54 }
 0x246   :  { %7617 = vmatpush3.bf16.msra.mxu1 %v9692_v41  ;;  %7619 = vmatprep.subr.bf16.mxu0 %v7618_v46  ;;  %v4037_v41 = vld [vmem:[%s10573_s5 + $0xc0] sm:$0xff]  ;;  %v4071_v46 = vld [vmem:[%s10573_s5 + $0x1d0] sm:$0xff] }
 0x247   :  { %7651 = vmatprep.subr.bf16.mxu1 %v7650_v17  ;;  %v7634_v25 = vpack.c.bf16 %v4038_v50, %v4037_v41  ;;  %v7670_v17 = vpack.c.bf16 %v4072_v10, %v4071_v46  ;;  %v10051_v46 = vld [vmem:[%s10573_s5 + $0x200] sm:$0xff] }
 0x248   :  { %6773 = vmatmul.mubr.f32.vlgmr.msra.gmra.mrb[40].mxu0 %v3374_v39  ;;  %v10061_v10 = vld [vmem:[%s10573_s5 + $0x300] sm:$0xff] }
 0x249   :  { %6905 = vmatmul.mubr.f32.vlgmr.msra.gmra.mrb[40].mxu1 %v3374_v39  ;;  %6775 = vmatprep.mubr.f32.mxu0 %v3376_v60  ;;  %v4053_v39 = vld [vmem:[%s10573_s5 + $0x140] sm:$0xff] }
 0x24a   :  { %6907 = vmatprep.mubr.f32.mxu1 %v3376_v60  ;;  %7621 = vmatpush3.bf16.msra.mxu0 %v7620_v29  ;;  %v4054_v60 = vld [vmem:[%s10573_s5 + $0x148] sm:$0xff] }
 0x24b   :  { %7653 = vmatpush3.bf16.msra.mxu1 %v7652_v8  ;;  %7623 = vmatprep.subr.bf16.mxu0 %v7622_v18  ;;  %v7668_v62 = vpack.c.bf16 %v4054_v60, %v4053_v39  ;;  %v4041_v8 = vld [vmem:[%s10573_s5 + $0xe0] sm:$0xff]  ;;  %v4074_v18 = vld [vmem:[%s10573_s5 + $0x1e8] sm:$0xff] }
 0x24c   :  { %6776 = vmatmul.mubr.f32.gmra.mrb[42].mxu0 %v3378_v12  ;;  %7655 = vmatprep.subr.bf16.mxu1 %v7654_v3  ;;  %v7642_v53 = vpack.c.bf16 %v4042_v59, %v4041_v8  ;;  %v4025_v3 = vld [vmem:[%s10573_s5 + $0x60] sm:$0xff]  ;;  %v7674_v24 = vpack.c.bf16 %v4074_v18, %v4073_v27  ;;  %v10096_v8 = vld [vmem:[%s10573_s5 + $0x210] sm:$0xff]  ;;  %v10101_v59 = vld [vmem:[%s10573_s5 + $0x218] sm:$0xff] }
 0x24d   :  { %6908 = vmatmul.mubr.f32.gmra.mrb[42].mxu1 %v3378_v12  ;;  %6778 = vmatprep.mubr.f32.mxu0 %v3380_v63  ;;  %v4024_v12 = vld [vmem:[%s10573_s5 + $0x58] sm:$0xff]  ;;  %v7644_v30 = vpack.c.bf16 %v4026_v33, %v4025_v3  ;;  %v10106_v27 = vld [vmem:[%s10573_s5 + $0x310] sm:$0xff] }
 0x24e   :  { %6910 = vmatprep.mubr.f32.mxu1 %v3380_v63  ;;  %7625 = vmatpush3.bf16.msra.mxu0 %v7624_v6  ;;  %v7640_v29 = vpack.c.bf16 %v4024_v12, %v4023_v21  ;;  %v4057_v63 = vld [vmem:[%s10573_s5 + $0x160] sm:$0xff]  ;;  %v4058_v6 = vld [vmem:[%s10573_s5 + $0x168] sm:$0xff]  ;;  %v10071_v12 = vld [vmem:[%s10573_s5 + $0x290] sm:$0xff] }
 0x24f   :  { %7657 = vmatpush3.bf16.msra.mxu1 %v7656_v26  ;;  %7627 = vmatprep.subr.bf16.mxu0 %v7626_v40  ;;  %v7676_v45 = vpack.c.bf16 %v4058_v6, %v4057_v63  ;;  %v4043_v26 = vld [vmem:[%s10573_s5 + $0xf0] sm:$0xff]  ;;  %v10066_v21 = vld [vmem:[%s10573_s5 + $0x308] sm:$0xff]  ;;  %v10111_v33 = vld [vmem:[%s10573_s5 + $0x318] sm:$0xff] }
 0x250   :  { %6779 = vmatmul.mubr.f32.gmra.mrb[44].mxu0 %v3382_v16  ;;  %7659 = vmatprep.subr.bf16.mxu1 %v7658_v0  ;;  %v7680_v0 = vpack.c.bf16 %v4060_v20, %v4059_v61 }
 0x251   :  { %6911 = vmatmul.mubr.f32.gmra.mrb[44].mxu1 %v3382_v16  ;;  %6781 = vmatprep.mubr.f32.mxu0 %v3384_v23  ;;  %v4044_v16 = vld [vmem:[%s10573_s5 + $0xf8] sm:$0xff] }
 0x252   :  { %6913 = vmatprep.mubr.f32.mxu1 %v3384_v23  ;;  %7629 = vmatpush3.bf16.msra.mxu0 %v7628_v13  ;;  %v4075_v23 = vld [vmem:[%s10573_s5 + $0x1f0] sm:$0xff]  ;;  %v4093_v13 = vld [vmem:[%s10573_s5 + $0x280] sm:$0xff] }
 0x253   :  { %7661 = vmatpush3.bf16.msra.mxu1 %v7660_v37  ;;  %7631 = vmatprep.subr.bf16.mxu0 %v7630_v28  ;;  %v7678_v40 = vpack.c.bf16 %v4076_v52, %v4075_v23  ;;  %v7682_v37 = vpack.c.bf16 %v4094_v7, %v4093_v13  ;;  %v7716_v52 = vpack.c.bf16 %v10066_v21, %v10061_v10  ;;  %v10166_v7 = vld [vmem:[%s10573_s5 + $0x2b0] sm:$0xff] }
 0x254   :  { %6782 = vmatmul.mubr.f32.gmra.mrb[46].mxu0 %v3386_v19  ;;  %7663 = vmatprep.subr.bf16.mxu1 %v7662_v5  ;;  %v7688_v13 = vpack.c.bf16 %v10101_v59, %v10096_v8  ;;  %v4102_v8 = vld [vmem:[%s10573_s5 + $0x2c8] sm:$0xff] }
 0x255   :  { %6914 = vmatmul.mubr.f32.gmra.mrb[46].mxu1 %v3386_v19  ;;  %v7646_v19 = vpack.c.bf16 %v4044_v16, %v4043_v26  ;;  %v10131_v26 = vld [vmem:[%s10573_s5 + $0x3a8] sm:$0xff]  ;;  %v10136_v16 = vld [vmem:[%s10573_s5 + $0x220] sm:$0xff] }
 0x256   :  { %7633 = vmatpush3.bf16.msra.mxu0 %v7632_v49 }
 0x257   :  { %7665 = vmatpush3.bf16.msra.mxu1 %v7664_v58  ;;  %7635 = vmatprep.subr.bf16.mxu0 %v7634_v25 }
 0x258   :  { %7667 = vmatprep.subr.bf16.mxu1 %v7666_v14 }
 0x25a   :  { %7637 = vmatpush3.bf16.msra.mxu0 %v7636_v32 }
 0x25b   :  { %7669 = vmatpush3.bf16.msra.mxu1 %v7668_v62  ;;  %7639 = vmatprep.subr.bf16.mxu0 %v7638_v55  ;;  %v10056_v55 = vld [vmem:[%s10573_s5 + $0x208] sm:$0xff] }
 0x25c   :  { %7671 = vmatprep.subr.bf16.mxu1 %v7670_v17  ;;  %v10076_v17 = vld [vmem:[%s10573_s5 + $0x298] sm:$0xff] }
 0x25d   :  { %v7686_v20 = vpack.c.bf16 %v10076_v17, %v10071_v12 }
 0x25e   :  { %7641 = vmatpush3.bf16.msra.mxu0 %v7640_v29  ;;  %v10081_v29 = vld [vmem:[%s10573_s5 + $0x390] sm:$0xff] }
 0x25f   :  { %7673 = vmatpush3.bf16.msra.mxu1 %v7672_v48  ;;  %7643 = vmatprep.subr.bf16.mxu0 %v7642_v53  ;;  %v10091_v48 = vld [vmem:[%s10572_s4] ss:$0 sm:$0xff] }
 0x260   :  { %7675 = vmatprep.subr.bf16.mxu1 %v7674_v24  ;;  %v10116_v24 = vld [vmem:[%s10573_s5 + $0x2a0] sm:$0xff] }
 0x262   :  { %7645 = vmatpush3.bf16.msra.mxu0 %v7644_v30  ;;  %v10121_v30 = vld [vmem:[%s10573_s5 + $0x2a8] sm:$0xff] }
 0x263   :  { %7677 = vmatpush3.bf16.msra.mxu1 %v7676_v45  ;;  %7647 = vmatprep.subr.bf16.mxu0 %v7646_v19  ;;  %v10126_v45 = vld [vmem:[%s10573_s5 + $0x3a0] sm:$0xff]  ;;  %v7684_v19 = vpack.c.bf16 %v10056_v55, %v10051_v46 }
 0x264   :  { %7679 = vmatprep.subr.bf16.mxu1 %v7678_v40  ;;  %v10155_v40 = vld [vmem:[%s10573_s5 + $0x328] sm:$0xff] }
 0x266   :  { %7649 = vmatpush3.bf16.msra.mxu0 %v7648_v43 }
 0x267   :  { %7681 = vmatpush3.bf16.msra.mxu1 %v7680_v0  ;;  %7683 = vmatprep.subr.bf16.mxu0 %v7682_v37  ;;  %v7718_v0 = vpack.c.bf16 %v10086_v22, %v10081_v29  ;;  %v10176_v37 = vld [vmem:[%s10573_s5 + $0x3b0] sm:$0xff] }
 0x268   :  { %7715 = vmatprep.subr.bf16.mxu1 %v7714_v1 }
 0x2b8   :  { %v6510_v11 = vpop.f32.mrb[32].mxu0 }
 0x2b9   :  { %v6642_v28 = vpop.f32.mrb[32].mxu1  ;;  %v2732_v56 = vpop.f32.mrb[33].mxu0 }
 0x2ba   :  { %v3154_v4 = vmax.f32 %v6510_v11, %v6642_v28  ;;  %v3106_v36 = vpop.f32.mrb[33].mxu1 }
 0x2bb   :  { %v3153_v5 = vmax.f32 %v2732_v56, %v3106_v36  ;;  %v7720_v56 = vpack.c.bf16 %v10111_v33, %v10106_v27  ;;  %v10186_v36 = vld [vmem:[%s10573_s5 + $0x3b8] sm:$0xff] }
 0x2bc   :  { %v6513_v49 = vpop.f32.mrb[34].mxu0 }
 0x2bd   :  { %v6645_v54 = vpop.f32.mrb[34].mxu1  ;;  %v10018_v57 = vpop.f32.mrb[35].mxu0 }
 0x2be   :  { %v3156_v58 = vmax.f32 %v6513_v49, %v6645_v54  ;;  %v10020_v41 = vpop.f32.mrb[35].mxu1  ;;  %v10196_v49 = vld [vmem:[%s10573_s5 + $0x238] sm:$0xff] }
 0x2bf   :  { %v3155_v50 = vmax.f32 %v10018_v57, %v10020_v41 }
 0x2c0   :  { %v10024_v15 = vpop.f32.mrb[36].mxu0 }
 0x2c1   :  { %v10026_v25 = vpop.f32.mrb[36].mxu1  ;;  %v10028_v31 = vpop.f32.mrb[37].mxu0 }
 0x2c2   :  { %v3158_v34 = vmax.f32 %v10024_v15, %v10026_v25  ;;  %v10032_v2 = vpop.f32.mrb[37].mxu1 }
 0x2c3   :  { %v3157_v14 = vmax.f32 %v10028_v31, %v10032_v2 }
 0x2c4   :  { %v10036_v32 = vpop.f32.mrb[38].mxu0 }
 0x2c5   :  { %v10038_v39 = vpop.f32.mrb[38].mxu1  ;;  %v10040_v60 = vpop.f32.mrb[39].mxu0 }
 0x2c6   :  { %v3160_v62 = vmax.f32 %v10036_v32, %v10038_v39  ;;  %v10044_v51 = vpop.f32.mrb[39].mxu1 }
 0x2c7   :  { %v3159_v9 = vmax.f32 %v10040_v60, %v10044_v51 }
 0x31b   :  { %v6774_v42 = vpop.f32.mrb[40].mxu0 }
 0x31c   :  { %v3501_v53 = vmax.f32 %v3154_v4, %v6774_v42  ;;  %v6906_v18 = vpop.f32.mrb[40].mxu1  ;;  %v3453_v3 = vpop.f32.mrb[41].mxu0  ;;  %v7690_v4 = vpack.c.bf16 %v10121_v30, %v10116_v24  ;;  %v7692_v42 = vpack.c.bf16 %v10145_v38, %v10136_v16  ;;  %v10592_v16 = vpack.c.bf16 %v10171_v35, %v10166_v7  ;;  %v4086_v38 = vld [vmem:[%s10573_s5 + $0x248] sm:$0xff] }
 0x31d   :  { %v3500_v63 = vmax.f32 %v3153_v5, %v3453_v3  ;;  %v3784_v6 = vpop.f32.mrb[41].mxu1  ;;  %v10191_v5 = vld [vmem:[%s10573_s5 + $0x230] sm:$0xff]  ;;  %v10593_v7 = vpack.c.bf16 %v10131_v26, %v10126_v45 }
 0x31e   :  { %v3832_v23 = vmax.f32 %v3501_v53, %v6906_v18 }
 0x31f   :  { %v3831_v43 = vmax.f32 %v3500_v63, %v3784_v6  ;;  %v6777_v61 = vpop.f32.mrb[42].mxu0 }
 0x320   :  { %v3847_v44 = vadd.f32 %v10091_v48, %v3832_v23  ;;  %v3503_v1 = vmax.f32 %v3156_v58, %v6777_v61  ;;  %v6909_v11 = vpop.f32.mrb[42].mxu1  ;;  %v3463_v28 = vpop.f32.mrb[43].mxu0 }
 0x321   :  { %v3846_v54 = vadd.f32 %v10091_v48, %v3831_v43  ;;  %v3502_v57 = vmax.f32 %v3155_v50, %v3463_v28  ;;  %v3794_v58 = vpop.f32.mrb[43].mxu1 }
 0x322   :  { %v10203_v53 = vmax.f32 %v3847_v44, 0.0  ;;  %v3834_v18 = vmax.f32 %v3503_v1, %v6909_v11 }
 0x323   :  { %v10209_v6 = vmax.f32 %v3846_v54, 0.0  ;;  %v3833_v50 = vmax.f32 %v3502_v57, %v3794_v58  ;;  %v6780_v23 = vpop.f32.mrb[44].mxu0 }
 0x324   :  { %v3849_v44 = vadd.f32 %v10091_v48, %v3834_v18  ;;  %v3505_v1 = vmax.f32 %v3158_v34, %v6780_v23  ;;  %v6912_v11 = vpop.f32.mrb[44].mxu1  ;;  %v3473_v28 = vpop.f32.mrb[45].mxu0  ;;  %v3926_v54 = vrot.slane %v10203_v53, 2  ;;  %v3870_v57 = vrot.slane %v10203_v53, 7 }
 0x325   :  { %v3848_v58 = vadd.f32 %v10091_v48, %v3833_v50  ;;  %v3504_v43 = vmax.f32 %v3157_v14, %v3473_v28  ;;  %v3804_v3 = vpop.f32.mrb[45].mxu1  ;;  %v3893_v61 = vrot.slane %v10209_v6, 1  ;;  %v3925_v18 = vrot.slane %v10209_v6, 3 }
 0x326   :  { %v10227_v41 = vmax.f32 %v3849_v44, 0.0  ;;  %v3836_v15 = vmax.f32 %v3505_v1, %v6912_v11  ;;  %v3872_v25 = vsel %vm3871_vm1, %v3870_v57, %v10209_v6  ;;  %v3909_v34 = vrot.slane %v10209_v6, 2 }
 0x327   :  { %v10232_v23 = vmax.f32 %v3848_v58, 0.0  ;;  %v3835_v50 = vmax.f32 %v3504_v43, %v3804_v3  ;;  %v6783_v63 = vpop.f32.mrb[46].mxu0  ;;  %v3894_v31 = vsel %vm3871_vm1, %v10203_v53, %v3893_v61  ;;  %v3927_v2 = vsel %vm3871_vm1, %v3926_v54, %v3925_v18 }
 0x328   :  { %v3851_v14 = vadd.f32 %v10091_v48, %v3836_v15  ;;  %v3507_v44 = vmax.f32 %v3160_v62, %v6783_v63  ;;  %v6915_v1 = vpop.f32.mrb[46].mxu1  ;;  %v3483_v11 = vpop.f32.mrb[47].mxu0  ;;  %v3897_v28 = vrot.slane %v10227_v41, 6  ;;  %v3876_v57 = vrot.slane %v10227_v41, 5 }
 0x329   :  { %v3850_v3 = vadd.f32 %v10091_v48, %v3835_v50  ;;  %v3506_v43 = vmax.f32 %v3159_v9, %v3483_v11  ;;  %v3814_v61 = vpop.f32.mrb[47].mxu1  ;;  %v3895_v54 = vrot.slane %v10232_v23, 7  ;;  %v3928_v58 = vrot.slane %v10232_v23, 1 }
 0x32a   :  { %v10249_v18 = vmax.f32 %v3851_v14, 0.0  ;;  %v3838_v32 = vmax.f32 %v3507_v44, %v6915_v1  ;;  %v3873_v39 = vrot.slane %v10232_v23, 6  ;;  %v3910_v62 = vrot.slane %v10203_v53, 1 }
 0x32b   :  { %v10253_v63 = vmax.f32 %v3850_v3, 0.0  ;;  %v3837_v15 = vmax.f32 %v3506_v43, %v3814_v61  ;;  %v3896_v60 = vsel %vm3874_vm2, %v3895_v54, %v3894_v31  ;;  %v3929_v51 = vsel %vm3874_vm2, %v3928_v58, %v3927_v2 }
 0x32c   :  { %v3853_v9 = vadd.f32 %v10091_v48, %v3838_v32  ;;  %v3898_v50 = vsel %vm3877_vm3, %v3897_v28, %v3896_v60  ;;  %v3901_v14 = vrot.slane %v10249_v18, 4  ;;  %v3930_v44 = vsel %vm3877_vm3, %v10227_v41, %v3929_v51 }
 0x32d   :  { %v3852_v1 = vadd.f32 %v10091_v48, %v3837_v15  ;;  %v3899_v11 = vrot.slane %v10253_v63, 5  ;;  %v3931_v3 = vrot.slane %v10253_v63, 7  ;;  %v3933_v43 = vrot.slane %v10249_v18, 6 }
 0x32e   :  { %v10266_v31 = vmax.f32 %v3853_v9, 0.0  ;;  %v3875_v2 = vsel %vm3874_vm2, %v3873_v39, %v3872_v25  ;;  %v3879_v61 = vrot.slane %v10253_v63, 4  ;;  %v3882_v28 = vrot.slane %v10249_v18, 3 }
 0x32f   :  { %v10271_v54 = vmax.f32 %v3852_v1, 0.0  ;;  %v3900_v58 = vsel %vm3880_vm4, %v3899_v11, %v3898_v50  ;;  %v3932_v48 = vsel %vm3880_vm4, %v3931_v3, %v3930_v44  ;;  %v3878_v32 = vsel %vm3877_vm3, %v3876_v57, %v3875_v2 }
 0x330   :  { %v3902_v15 = vsel %vm3883_vm5, %v3901_v14, %v3900_v58  ;;  %v3905_v60 = vrot.slane %v10266_v31, 2  ;;  %v3934_v51 = vsel %vm3883_vm5, %v3933_v43, %v3932_v48  ;;  %v3937_v25 = vrot.slane %v10266_v31, 4 }
 0x331   :  { %v3903_v39 = vrot.slane %v10271_v54, 3  ;;  %v3935_v9 = vrot.slane %v10271_v54, 5  ;;  %v3881_v1 = vsel %vm3880_vm4, %v3879_v61, %v3878_v32  ;;  %v3885_v50 = vrot.slane %v10271_v54, 2 }
 0x332   :  { %v3884_v44 = vsel %vm3883_vm5, %v3882_v28, %v3881_v1  ;;  %v3888_v57 = vrot.slane %v10266_v31, 1  ;;  %v3911_v14 = vsel %vm3871_vm1, %v3910_v62, %v3909_v34  ;;  %v3913_v11 = vrot.slane %v10227_v41, 7 }
 0x333   :  { %v3904_v3 = vsel %vm3886_vm6, %v3903_v39, %v3902_v15  ;;  %v3936_v43 = vsel %vm3886_vm6, %v3935_v9, %v3934_v51  ;;  %v3887_v2 = vsel %vm3886_vm6, %v3885_v50, %v3884_v44  ;;  %v3912_v58 = vsel %vm3874_vm2, %v10232_v23, %v3911_v14 }
 0x334   :  { %v3906_v61 = vsel %vm3889_vm7, %v3905_v60, %v3904_v3  ;;  %v3938_v48 = vsel %vm3889_vm7, %v3937_v25, %v3936_v43  ;;  %v3890_v28 = vsel %vm3889_vm7, %v3888_v57, %v3887_v2  ;;  %v3914_v32 = vsel %vm3877_vm3, %v3913_v11, %v3912_v58 }
 0x335   :  { %4212 = vmatprep.mubr.f32.mxu0 %v3906_v61  ;;  %4282 = vmatprep.mubr.f32.mxu1 %v3938_v48  ;;  %v3915_v34 = vrot.slane %v10253_v63, 6  ;;  %v3917_v62 = vrot.slane %v10249_v18, 5  ;;  %v3919_v15 = vrot.slane %v10271_v54, 4  ;;  %v3921_v51 = vrot.slane %v10266_v31, 3 }
 0x336   :  { %4213 = vmatmul.mubr.f32.vlgmr.msra.gmra.mrb[48].mxu0 %v3890_v28  ;;  %v3957_v39 = vrot.slane %v10209_v6, 5  ;;  %v3958_v60 = vrot.slane %v10203_v53, 4  ;;  %v3960_v25 = vrot.slane %v10232_v23, 3  ;;  %v3962_v9 = vrot.slane %v10227_v41, 2 }
 0x337   :  { %v3916_v1 = vsel %vm3880_vm4, %v3915_v34, %v3914_v32  ;;  %7685 = vmatpush3.bf16.msra.mxu0 %v7684_v19  ;;  %v3964_v50 = vrot.slane %v10253_v63, 1  ;;  %v3967_v44 = vrot.slane %v10271_v54, 7  ;;  %v3969_v57 = vrot.slane %v10266_v31, 6 }
 0x338   :  { %v3918_v14 = vsel %vm3883_vm5, %v3917_v62, %v3916_v1  ;;  %v3959_v11 = vsel %vm3871_vm1, %v3958_v60, %v3957_v39  ;;  %v3989_v3 = vrot.slane %v10209_v6, 7  ;;  %v3990_v43 = vrot.slane %v10203_v53, 6  ;;  %7687 = vmatprep.subr.bf16.mxu0 %v7686_v20  ;;  %v4116_v39 = vld [vmem:[%s10573_s5 + $0x338] sm:$0xff] }
 0x339   :  { %v3920_v46 = vsel %vm3886_vm6, %v3919_v15, %v3918_v14  ;;  %v3961_v55 = vsel %vm3874_vm2, %v3960_v25, %v3959_v11  ;;  %v3992_v19 = vrot.slane %v10232_v23, 5  ;;  %v3994_v2 = vrot.slane %v10227_v41, 4  ;;  %v4101_v15 = vld [vmem:[%s10573_s5 + $0x2c0] sm:$0xff] }
 0x33a   :  { %v3922_v58 = vsel %vm3889_vm7, %v3921_v51, %v3920_v46  ;;  %v3963_v61 = vsel %vm3877_vm3, %v3962_v9, %v3961_v55  ;;  %v3991_v48 = vsel %vm3871_vm1, %v3990_v43, %v3989_v3  ;;  %v3996_v28 = vrot.slane %v10253_v63, 3  ;;  %v4115_v51 = vld [vmem:[%s10573_s5 + $0x330] sm:$0xff]  ;;  %v4085_v25 = vld [vmem:[%s10573_s5 + $0x240] sm:$0xff] }
 0x33b   :  { %4283 = vmatmul.mubr.f32.vlgmr.msra.gmra.mrb[48].mxu1 %v3922_v58  ;;  %v3965_v12 = vsel %vm3880_vm4, %v3964_v50, %v3963_v61  ;;  %v3993_v17 = vsel %vm3874_vm2, %v3992_v19, %v3991_v48  ;;  %v3998_v20 = vrot.slane %v10249_v18, 2  ;;  %v4000_v32 = vrot.slane %v10271_v54, 1  ;;  %7689 = vmatpush3.bf16.msra.mxu0 %v7688_v13  ;;  %v4133_v3 = vld [vmem:[%s10573_s5 + $0x3c0] sm:$0xff] }
 0x33c   :  { %7717 = vmatpush3.bf16.msra.mxu1 %v7716_v52  ;;  %v3966_v34 = vsel %vm3883_vm5, %v10249_v18, %v3965_v12  ;;  %v3995_v62 = vsel %vm3877_vm3, %v3994_v2, %v3993_v17  ;;  %7691 = vmatprep.subr.bf16.mxu0 %v7690_v4  ;;  %v3941_v10 = vrot.slane %v10209_v6, 4  ;;  %v3942_v21 = vrot.slane %v10203_v53, 3  ;;  %v4117_v58 = vld [vmem:[%s10573_s5 + $0x340] sm:$0xff]  ;;  %v4118_v12 = vld [vmem:[%s10573_s5 + $0x348] sm:$0xff] }
 0x33d   :  { %v3968_v59 = vsel %vm3886_vm6, %v3967_v44, %v3966_v34  ;;  %v3997_v52 = vsel %vm3880_vm4, %v3996_v28, %v3995_v62  ;;  %7719 = vmatprep.subr.bf16.mxu1 %v7718_v0  ;;  %v3944_v24 = vrot.slane %v10232_v23, 2  ;;  %v3946_v30 = vrot.slane %v10227_v41, 1  ;;  %v4104_v44 = vld [vmem:[%s10573_s5 + $0x2d8] sm:$0xff]  ;;  %v4105_v17 = vld [vmem:[%s10573_s5 + $0x2e0] sm:$0xff] }
 0x33e   :  { %v3970_v13 = vsel %vm3889_vm7, %v3969_v57, %v3968_v59  ;;  %v3999_v4 = vsel %vm3883_vm5, %v3998_v20, %v3997_v52  ;;  %v3943_v60 = vsel %vm3871_vm1, %v3942_v21, %v3941_v10  ;;  %v3949_v29 = vrot.slane %v10249_v18, 7  ;;  %v4106_v20 = vld [vmem:[%s10573_s5 + $0x2e8] sm:$0xff]  ;;  %v4089_v10 = vld [vmem:[%s10573_s5 + $0x260] sm:$0xff]  ;;  %v4120_v52 = vld [vmem:[%s10573_s5 + $0x358] sm:$0xff] }
 0x33f   :  { %4352 = vmatprep.mubr.f32.mxu0 %v3970_v13  ;;  %v4001_v22 = vsel %vm3886_vm6, %v4000_v32, %v3999_v4  ;;  %7693 = vmatpush3.bf16.msra.mxu0 %v7692_v42  ;;  %v7698_v0 = vpack.c.bf16 %v4102_v8, %v4101_v15  ;;  %v3945_v9 = vsel %vm3874_vm2, %v3944_v24, %v3943_v60  ;;  %v3951_v1 = vrot.slane %v10271_v54, 6  ;;  %v4103_v42 = vld [vmem:[%s10573_s5 + $0x2d0] sm:$0xff]  ;;  %v4090_v21 = vld [vmem:[%s10573_s5 + $0x268] sm:$0xff]  ;;  %v4137_v13 = vld [vmem:[%s10573_s5 + $0x3e0] sm:$0xff] }
 0x340   :  { %v4002_v50 = vsel %vm3889_vm7, %v10266_v31, %v4001_v22  ;;  %7721 = vmatpush3.bf16.msra.mxu1 %v7720_v56  ;;  %7695 = vmatprep.subr.bf16.mxu0 %v10592_v16  ;;  %v3947_v57 = vsel %vm3877_vm3, %v3946_v30, %v3945_v9  ;;  %v3973_v27 = vrot.slane %v10209_v6, 6  ;;  %v3974_v33 = vrot.slane %v10203_v53, 5  ;;  %v4134_v53 = vld [vmem:[%s10573_s5 + $0x3c8] sm:$0xff]  ;;  %v4119_v15 = vld [vmem:[%s10573_s5 + $0x350] sm:$0xff]  ;;  %v4108_v30 = vld [vmem:[%s10573_s5 + $0x2f8] sm:$0xff] }
 0x341   :  { %4422 = vmatprep.mubr.f32.mxu1 %v4002_v50  ;;  %7723 = vmatprep.subr.bf16.mxu1 %v10593_v7  ;;  %v7728_v35 = vpack.c.bf16 %v4116_v39, %v4115_v51  ;;  %v3948_v56 = vsel %vm3880_vm4, %v10253_v63, %v3947_v57  ;;  %v3976_v14 = vrot.slane %v10232_v23, 4  ;;  %v3980_v11 = vrot.slane %v10253_v63, 2  ;;  %v4107_v24 = vld [vmem:[%s10573_s5 + $0x2f0] sm:$0xff]  ;;  %v4138_v4 = vld [vmem:[%s10573_s5 + $0x3e8] sm:$0xff]  ;;  %v4092_v22 = vld [vmem:[%s10573_s5 + $0x278] sm:$0xff] }
 0x342   :  { %v3950_v6 = vsel %vm3883_vm5, %v3949_v29, %v3948_v56  ;;  %v3953_v45 = vrot.slane %v10266_v31, 5  ;;  %v3975_v26 = vsel %vm3871_vm1, %v3974_v33, %v3973_v27  ;;  %v3978_v43 = vrot.slane %v10227_v41, 3  ;;  %v4091_v29 = vld [vmem:[%s10573_s5 + $0x270] sm:$0xff]  ;;  %v4122_v9 = vld [vmem:[%s10573_s5 + $0x368] sm:$0xff]  ;;  %v4140_v50 = vld [vmem:[%s10573_s5 + $0x3f8] sm:$0xff] }
 0x343   :  { %v10594_v23 = vpack.c.bf16 %v10196_v49, %v10191_v5  ;;  %v7700_v63 = vpack.c.bf16 %v4086_v38, %v4085_v25  ;;  %v7702_v46 = vpack.c.bf16 %v4104_v44, %v4103_v42  ;;  %v3952_v55 = vsel %vm3886_vm6, %v3951_v1, %v3950_v6  ;;  %v4087_v5 = vld [vmem:[%s10573_s5 + $0x250] sm:$0xff]  ;;  %v4088_v49 = vld [vmem:[%s10573_s5 + $0x258] sm:$0xff]  ;;  %v4121_v25 = vld [vmem:[%s10573_s5 + $0x360] sm:$0xff] }
 0x344   :  { %v3977_v19 = vsel %vm3874_vm2, %v3976_v14, %v3975_v26  ;;  %v10595_v2 = vpack.c.bf16 %v10155_v40, %v10150_v47  ;;  %v3954_v41 = vsel %vm3889_vm7, %v3953_v45, %v3952_v55  ;;  %v3982_v47 = vrot.slane %v10249_v18, 1  ;;  %v4139_v1 = vld [vmem:[%s10573_s5 + $0x3f0] sm:$0xff]  ;;  %v4124_v57 = vld [vmem:[%s10573_s5 + $0x378] sm:$0xff]  ;;  %v4429_v33 = vld [vmem:[%s10575_s7] sm:$0xff] }
 0x345   :  { %7697 = vmatpush3.bf16.msra.mxu0 %v10594_v23  ;;  %v3979_v61 = vsel %vm3877_vm3, %v3978_v43, %v3977_v19  ;;  %v3985_v40 = vrot.slane %v10266_v31, 7  ;;  %v10596_v48 = vpack.c.bf16 %v10186_v36, %v10176_v37  ;;  %v7730_v28 = vpack.c.bf16 %v4134_v53, %v4133_v3  ;;  %v4135_v37 = vld [vmem:[%s10573_s5 + $0x3d0] sm:$0xff]  ;;  %v4136_v36 = vld [vmem:[%s10573_s5 + $0x3d8] sm:$0xff]  ;;  %v4430_v7 = vld [vmem:[%s10575_s7 + $0x8] sm:$0xff] }
 0x346   :  { %7725 = vmatpush3.bf16.msra.mxu1 %v10595_v2  ;;  %7699 = vmatprep.subr.bf16.mxu0 %v7698_v0  ;;  %v3981_v18 = vsel %vm3880_vm4, %v3980_v11, %v3979_v61  ;;  %v7704_v32 = vpack.c.bf16 %v4088_v49, %v4087_v5  ;;  %v7732_v62 = vpack.c.bf16 %v4118_v12, %v4117_v58  ;;  %v4123_v44 = vld [vmem:[%s10573_s5 + $0x370] sm:$0xff]  ;;  %v7989_v56 = vmov 0.0|0.0   ;;  %v4432_v11 = vld [vmem:[%s10575_s7 + $0x18] sm:$0xff]  ;;  %v4433_v53 = vld [vmem:[%s10575_s7 + $0x20] sm:$0xff] }
 0x347   :  { %7727 = vmatprep.subr.bf16.mxu1 %v10596_v48  ;;  %v3983_v31 = vsel %vm3883_vm5, %v3982_v47, %v3981_v18  ;;  %v7706_v8 = vpack.c.bf16 %v4106_v20, %v4105_v17  ;;  %v7708_v51 = vpack.c.bf16 %v4090_v21, %v4089_v10  ;;  %v7736_v39 = vpack.c.bf16 %v4120_v52, %v4119_v15  ;;  %v4434_v6 = vld [vmem:[%s10575_s7 + $0x28] sm:$0xff]  ;;  %v4435_v45 = vld [vmem:[%s10575_s7 + $0x30] sm:$0xff]  ;;  %v4436_v43 = vld [vmem:[%s10575_s7 + $0x38] sm:$0xff] }
 0x348   :  { %v3984_v34 = vsel %vm3886_vm6, %v10271_v54, %v3983_v31  ;;  %v7734_v54 = vpack.c.bf16 %v4136_v36, %v4135_v37  ;;  %v7710_v60 = vpack.c.bf16 %v4108_v30, %v4107_v24  ;;  %v7738_v0 = vpack.c.bf16 %v4138_v4, %v4137_v13  ;;  %v5029_v5 = vld [vmem:[%s10574_s6] ss:$0 sm:$0xff] }
 0x349   :  { %7701 = vmatpush3.bf16.msra.mxu0 %v7700_v63  ;;  %v3986_v59 = vsel %vm3889_vm7, %v3985_v40, %v3984_v34  ;;  %v7712_v16 = vpack.c.bf16 %v4092_v22, %v4091_v29  ;;  %v7740_v38 = vpack.c.bf16 %v4122_v9, %v4121_v25  ;;  %v7742_v42 = vpack.c.bf16 %v4140_v50, %v4139_v1  ;;  %v4519_v63 = vld [vmem:[%s10577_s9] sm:$0xff]  ;;  %v4521_v34 = vld [vmem:[%s10577_s9 + $0x10] sm:$0xff] }
 0x34a   :  { %7729 = vmatpush3.bf16.msra.mxu1 %v7728_v35  ;;  %7703 = vmatprep.subr.bf16.mxu0 %v7702_v46  ;;  %v7744_v27 = vpack.c.bf16 %v4124_v57, %v4123_v44  ;;  %v4431_v35 = vld [vmem:[%s10575_s7 + $0x10] sm:$0xff]  ;;  %v7747_v14 = vpack.c.bf16 %v4430_v7, %v4429_v33  ;;  %v7753_v26 = vpack.c.bf16 %v4434_v6, %v4433_v53  ;;  %v10597_v23 = vmov 0.0   ;;  %v4520_v46 = vld [vmem:[%s10577_s9 + $0x8] sm:$0xff]  ;;  %v5032_v52 = vld [vmem:[%s10578_s10] ss:$0 sm:$0xff] }
 0x34b   :  { %7731 = vmatprep.subr.bf16.mxu1 %v7730_v28  ;;  %v7750_v3 = vpack.c.bf16 %v4432_v11, %v4431_v35  ;;  %v7756_v55 = vpack.c.bf16 %v4436_v43, %v4435_v45  ;;  %v7759_v19 = vpack.c.bf16 %v4520_v46, %v4519_v63 }
 0x34d   :  { %7705 = vmatpush3.bf16.msra.mxu0 %v7704_v32 }
 0x34e   :  { %7733 = vmatpush3.bf16.msra.mxu1 %v7732_v62  ;;  %7707 = vmatprep.subr.bf16.mxu0 %v7706_v8  ;;  %v4522_v62 = vld [vmem:[%s10577_s9 + $0x18] sm:$0xff]  ;;  %v5030_v8 = vld [vmem:[%s10576_s8] ss:$0 sm:$0xff]  ;;  %s7991_s8 = smov [#allocation4]  }
 0x34f   :  { %7735 = vmatprep.subr.bf16.mxu1 %v7734_v54  ;;  %v7762_v15 = vpack.c.bf16 %v4522_v62, %v4521_v34  ;;  %s4624_s9 = sshll.u32 %s7991_s8, 4  ;;  %s4625_s9 = int_to_ptr.vmem [resolvable:$true] %s4624_s9 }
 0x350   :  { %s7964_s10 = scalar_lea.vmem %s4625_s9, 128  ;;  %p7969_p1 = scmp.lt.s32.totalorder %s4625_s9, %s4625_s9 }
 0x351   :  { %7709 = vmatpush3.bf16.msra.mxu0 %v7708_v51  ;;  %p7965_p0 = scmp.ne.s32.totalorder %s4625_s9, %s7964_s10  ;;  %p7970_p2 = scmp.lt.s32.totalorder %s7964_s10, %s7964_s10 }
 0x352   :  { %7737 = vmatpush3.bf16.msra.mxu1 %v7736_v39  ;;  %7711 = vmatprep.subr.bf16.mxu0 %v7710_v60 }
 0x353   :  { %7739 = vmatprep.subr.bf16.mxu1 %v7738_v0  ;;  %p7971_p3 = por %p7970_p2, %p7969_p1 }
 0x355   :  { %7713 = vmatpush3.bf16.msra.mxu0 %v7712_v16  ;;  %p7972_p4 = pnand %p7971_p3, %p7965_p0 }
 0x356   :  { %7741 = vmatpush3.bf16.msra.mxu1 %v7740_v38  ;;  %7746 = vmatprep.subr.bf16.mxu0 %v7989_v56 }
 0x357   :  { %7743 = vmatprep.subr.bf16.mxu1 %v7742_v42 }
 0x358   :  { %4353 = vmatmul.mubr.f32.vlgmr.msra.gmra.mrb[50].mxu0 %v3954_v41 }
 0x359   :  { %7748 = vmatpush3.bf16.msra.mxu0 %v7747_v14  ;;  %6932 = vmatprep.mubr.msk.f32.mxu0 %vm7990_vm8, %v10597_v23 }
 0x35a   :  { %7745 = vmatpush3.bf16.msra.mxu1 %v7744_v27  ;;  %7749 = vmatprep.subr.bf16.mxu0 %v7989_v56 }
 0x35b   :  { %7758 = vmatprep.subr.bf16.mxu1 %v7989_v56 }
 0x35d   :  { %4423 = vmatmul.mubr.f32.vlgmr.msra.gmra.mrb[50].mxu1 %v3986_v59  ;;  %7751 = vmatpush3.bf16.msra.mxu0 %v7750_v3 }
 0x35e   :  { %7752 = vmatprep.subr.bf16.mxu0 %v7989_v56  ;;  %6943 = vmatprep.mubr.msk.f32.mxu1 %vm7990_vm8, %v10597_v23 }
 0x35f   :  { %7760 = vmatpush3.bf16.msra.mxu1 %v7759_v19 }
 0x360   :  { %7761 = vmatprep.subr.bf16.mxu1 %v7989_v56 }
 0x361   :  { %7754 = vmatpush3.bf16.msra.mxu0 %v7753_v26 }
 0x362   :  { %7755 = vmatprep.subr.bf16.mxu0 %v7989_v56 }
 0x363   :  { %7763 = vmatpush3.bf16.msra.mxu1 %v7762_v15 }
 0x365   :  { %7757 = vmatpush3.bf16.msra.mxu0 %v7756_v55 }
 0x409   :  { %v5690_v2 = vpop.f32.mrb[48].mxu0 }
 0x40a   :  { %v5691_v58 = vpop.f32.mrb[49].mxu0 }
 0x40b   :  { %v5692_v49 = vadd.f32 %v5691_v58, %v5690_v2 }
 0x40d   :  { %v4215_v61 = vadd.f32 %v5692_v49, %v5029_v5 }
 0x40e   :  { %v5725_v41 = vpop.f32.mrb[48].mxu1 }
 0x40f   :  { %v5726_v47 = vpop.f32.mrb[49].mxu1 }
 0x410   :  { %v5727_v40 = vadd.f32 %v5726_v47, %v5725_v41 }
 0x412   :  { %v4285_v48 = vadd.f32 %v5727_v40, %v4215_v61 }
 0x42b   :  { %v5760_v28 = vpop.f32.mrb[50].mxu0 }
 0x42c   :  { %v5761_v12 = vpop.f32.mrb[51].mxu0 }
 0x42d   :  { %v5762_v17 = vadd.f32 %v5761_v12, %v5760_v28 }
 0x42f   :  { %v4355_v20 = vadd.f32 %v5762_v17, %v4285_v48 }
 0x430   :  { %v5795_v18 = vpop.f32.mrb[50].mxu1 }
 0x431   :  { %v5796_v37 = vpop.f32.mrb[51].mxu1 }
 0x432   :  { %v5797_v36 = vadd.f32 %v5796_v37, %v5795_v18 }
 0x434   :  { %v4425_v31 = vadd.f32 %v5797_v36, %v4355_v20 }
 0x436   :  { %v4428_v32 = vmax.f32 %v4425_v31, 0.0 }
 0x438   :  { %6933 = vmatmul.mubr.msk.f32.vlgmr.msra.gmra.mrb[52].mxu0 %vm4444_vm9, %v4428_v32 }
 0x50b   :  { %v4514_v10 = vpop.f32.mrb[52].mxu0 }
 0x50c   :  { %v4515_v21 = vadd.f32 %v5030_v8, %v4514_v10  ;;  %v6934_v59 = vpop.f32.mrb[53].mxu0 }
 0x50e   :  { %v4518_v54 = vmax.f32 %v4515_v21, 0.0 }
 0x510   :  { %6944 = vmatmul.mubr.msk.f32.vlgmr.msra.gmra.mrb[52].mxu1 %vm4530_vm10, %v4518_v54 }
 0x5e3   :  { %v4600_v24 = vpop.f32.mrb[52].mxu1 }
 0x5e4   :  { %v4601_v30 = vadd.f32 %v5032_v52, %v4600_v24  ;;  %v6945_v13 = vpop.f32.mrb[53].mxu1 }
 0x5e6   :  { %v4605_v4 = vsel %vm4604_vm11, %v4601_v30, -inf }
 0x5e7   :  { %4606 = vmax.xlane.f32.xlu0 %v4605_v4 }
 0x674   :  { %v4607_v51 = vpop.xlane.xlu0 %4606 }
 0x675   :  { %v4608_v39 = vsub.f32 %v4601_v30, %v4607_v51 }
 0x677   :  { %v4609_v60 = vmul.f32 1.442695, %v4608_v39 }
 0x679   :  { %7960 = vpow2.f32 %v4609_v60 }
 0x683   :  { %v7961_v29 = vpop.eup %7960 }
 0x684   :  { %v4611_v22 = vsel %vm4604_vm11, %v7961_v29, 0.0 }
 0x685   :  { %4612 = vadd.xlane.f32.xlu0 %v4611_v22 }
 0x712   :  { %v4613_v0 = vpop.xlane.xlu0 %4612 }
 0x713   :  { %7962 = vlog2.f32 %v4613_v0 }
 0x71d   :  { %v7963_v25 = vpop.eup %7962 }
 0x71e   :  { %v4615_v9 = vmul.f32 0.6931472, %v7963_v25 }
 0x720   :  { %v4616_v1 = vsub.f32 %v4608_v39, %v4615_v9 }
 0x722   :  { %4617 = vst.msk [vmem:[#allocation4] sm:$0xff] %vm4604_vm11, %v4616_v1 }
 0x723   :  { %7975 = shalt.err (!%p7972_p4)
}
 0x724   :  { %s7976_s0 = scalar_lea.hbm %s10579_s11, 128 }
 0x725   :  { %p7977_p5 = scmp.ne.s32.totalorder %s10579_s11, %s7976_s0  ;;  %p7980_p6 = scmp.lt.u32.totalorder %s7976_s0, %s10579_s11 }
 0x727   :  { %p7982_p7 = pnand %p7980_p6, %p7977_p5 }
 0x729   :  { %7985 = shalt.err (!%p7982_p7)
}
 0x72a   :  { %4627 = dma.vmem_to_hbm [thread:$0]  %s4625_s9, 128, %s10579_s11, [#allocation5]  }
 0x72b   :  { %7986 = dma.done.wait [#allocation5], 128  }
 0x72c   :  { %7987 = vsyncadd [#allocation5], 4294967168 }
 0x72d   :  { %4631 = vsyncpa [#allocation5], 1 }

</bundles_post_ra>
